<compile_context>
chip_gen: v7x
topology: tpu7x:2x2x1
jax: 0.10.0
libtpu: 0.0.40
codegen_flags: <defaults>
</compile_context>

<pallas_src>
import jax
import jax.numpy as jnp
from jax import lax
from jax.experimental import pallas as pl
from jax.experimental.pallas import tpu as pltpu


def _round_up(a, b):
    return (a + b - 1) // b * b


def component_dec_conv(x, weight, *, b_tile=8, k_tile=8, acc_vreg_budget=32):
    """x: (N, 1, H, W) float ; weight: (K, 1, ks, ks) float -> (N, K, H_out, W_out) f32."""
    N, C, H, W = x.shape
    assert C == 1, "ComponentDecConv weight has in_channels == 1"
    K, Cin, ks, ks_w = weight.shape
    assert Cin == 1 and ks == ks_w

    H_out = H - ks + 1
    W_out = W - ks + 1
    ks2 = ks * ks

    # ---- lane/sublane-dense padded geometry -------------------------------
    W_cols = _round_up(W_out, 128)            # output lane width (dense stores)
    W_in = W_cols + ks - 1                    # input width: covers all dj windows
    H_out8 = _round_up(H_out, 8)              # output sublane height
    H_pad = _round_up(H_out8 + ks - 1, 8)     # input height: covers all di windows

    # ---- batch / channel tiling, bounded by accumulator vreg pressure -----
    per_img_vregs = (H_out8 // 8) * (W_cols // 128)   # acc vregs per (image, channel)
    B_TILE = max(1, min(b_tile, N))
    while B_TILE > 1 and B_TILE * per_img_vregs > acc_vreg_budget:
        B_TILE -= 1
    K_TILE = max(1, min(k_tile, K,
                        acc_vreg_budget // max(1, B_TILE * per_img_vregs)))
    N_pad = _round_up(N, B_TILE)
    K_pad = _round_up(K, K_TILE)

    # ---- wrapper-side layout plumbing (zero padding, squeeze C) -----------
    x_sq = x[:, 0, :, :].astype(jnp.float32)                      # (N, H, W)
    x_p = jnp.pad(x_sq, ((0, N_pad - N), (0, H_pad - H), (0, W_in - W)))
    w2 = weight[:, 0, :, :].astype(jnp.float32).reshape(K, ks2)   # (K, ks*ks)
    w_flat = jnp.pad(w2, ((0, K_pad - K), (0, 0))).reshape(K_pad * ks2)

    def conv_kernel(w_ref, x_ref, o_ref):
        # w_ref: SMEM (K_pad*ks*ks,) f32  -- scalar weight table
        # x_ref: VMEM (B_TILE, H_pad, W_in)
        # o_ref: VMEM (B_TILE, K_TILE, H_out8, W_cols)
        kt = pl.program_id(1)
        k_base = kt * K_TILE
        x = x_ref[...]                                     # whole padded tile

        accs = [jnp.zeros((B_TILE, H_out8, W_cols), jnp.float32)
                for _ in range(K_TILE)]

        for dj in range(ks):
            # one lane-direction window per dj, reused for every di / k
            x_dj = x[:, :, dj:dj + W_cols]                 # (B_TILE, H_pad, W_cols)
            for di in range(ks):
                patch = x_dj[:, di:di + H_out8, :]         # sublane-only slice
                for k in range(K_TILE):
                    w_s = w_ref[(k_base + k) * ks2 + di * ks + dj]   # SMEM scalar
                    accs[k] = accs[k] + w_s * patch
        for k in range(K_TILE):
            o_ref[:, k, :, :] = accs[k]                    # lane-dense vst

    flops = 2 * N * K * H_out * W_out * ks2
    bytes_accessed = 4 * (N_pad * H_pad * W_in
                          + K_pad * ks2
                          + N_pad * K_pad * H_out8 * W_cols)

    out_p = pl.pallas_call(
        conv_kernel,
        out_shape=jax.ShapeDtypeStruct((N_pad, K_pad, H_out8, W_cols), jnp.float32),
        # K-tiles iterate fastest -> input block index repeats -> no re-DMA.
        grid=(N_pad // B_TILE, K_pad // K_TILE),
        in_specs=[
            # small flat weight table lives in SMEM (scalar reads in-kernel)
            pl.BlockSpec(memory_space=pltpu.MemorySpace.SMEM),
            # B_TILE padded images per step; last dim is the full array dim,
            # second-to-last is a multiple of 8.
            pl.BlockSpec((B_TILE, H_pad, W_in), lambda bt, kt: (bt, 0, 0)),
        ],
        out_specs=pl.BlockSpec((B_TILE, K_TILE, H_out8, W_cols),
                               lambda bt, kt: (bt, kt, 0, 0)),
        compiler_params=pltpu.CompilerParams(
            dimension_semantics=("parallel", "parallel")),
        cost_estimate=pl.CostEstimate(flops=flops, transcendentals=0,
                                      bytes_accessed=bytes_accessed),
    )(w_flat, x_p)

    # strip batch/channel/spatial padding
    return out_p[:N, :K, :H_out, :W_out]


if __name__ == "__main__":
    # Small deterministic setup consistent with the module: the pickled kernel
    # buffer would be (K, 1, ks, ks); initialize it with PRNGKey(0) instead of
    # reading a file.
    N, C, H, W = 2, 1, 16, 16
    K, ks = 8, 3

    key = jax.random.PRNGKey(0)
    kx, kw = jax.random.split(key)
    x = jax.random.normal(kx, (N, C, H, W), dtype=jnp.float32)
    weight = jax.random.normal(kw, (K, 1, ks, ks), dtype=jnp.float32)

    # k_tile=4 -> 2 grid steps over K (exercises the K-tiling path and gives
    # both v7x TensorCores work even with a tiny batch).
    out = component_dec_conv(x, weight, b_tile=8, k_tile=4)
    out = jax.block_until_ready(out)

    # Reference check against XLA's conv (same semantics as F.conv2d).
    ref = lax.conv_general_dilated(
        x, weight, window_strides=(1, 1), padding="VALID",
        dimension_numbers=("NCHW", "OIHW", "NCHW"))
    ref = jax.block_until_ready(ref)

    assert out.shape == (N, K, H - ks + 1, W - ks + 1), out.shape
    assert jnp.allclose(out, ref, atol=1e-4, rtol=1e-4), "mismatch vs reference"

    print("KERNEL_OK")
</pallas_src>

<mosaic_0001>
module attributes {stable_mosaic.version = 11 : i64} {
  func.func @conv_kernel(%arg0: i32, %arg1: i32, %arg2: memref<72xf32, #tpu.memory_space<smem>>, %arg3: memref<2x24x130xf32, #tpu.memory_space<vmem>>, %arg4: memref<2x4x16x128xf32, #tpu.memory_space<vmem>>) attributes {dimension_semantics = [#tpu.dimension_semantics<parallel>, #tpu.dimension_semantics<parallel>], iteration_bounds = array<i64: 1, 2>, scalar_prefetch = 0 : i64, scratch_operands = 0 : i64, tpu.core_type = #tpu.core_type<tc>, window_params = [{transform_indices = @transform_0, window_bounds = array<i64: 72>}, {transform_indices = @transform_1, window_bounds = array<i64: 2, 24, 130>}, {transform_indices = @transform_2, window_bounds = array<i64: 2, 4, 16, 128>}]} {
    %c4_i32 = arith.constant 4 : i32
    %0 = arith.muli %arg1, %c4_i32 : i32
    %c0 = arith.constant 0 : index
    %c0_0 = arith.constant 0 : index
    %c0_1 = arith.constant 0 : index
    %1 = vector.load %arg3[%c0, %c0_0, %c0_1] : memref<2x24x130xf32, #tpu.memory_space<vmem>>, vector<2x24x130xf32>
    %cst = arith.constant 0.000000e+00 : f32
    %2 = vector.broadcast %cst : f32 to vector<2x16x128xf32>
    %cst_2 = arith.constant 0.000000e+00 : f32
    %3 = vector.broadcast %cst_2 : f32 to vector<2x16x128xf32>
    %cst_3 = arith.constant 0.000000e+00 : f32
    %4 = vector.broadcast %cst_3 : f32 to vector<2x16x128xf32>
    %cst_4 = arith.constant 0.000000e+00 : f32
    %5 = vector.broadcast %cst_4 : f32 to vector<2x16x128xf32>
    %6 = vector.extract_strided_slice %1 {offsets = [0, 0, 0], sizes = [2, 24, 128], strides = [1, 1, 1]} : vector<2x24x130xf32> to vector<2x24x128xf32>
    %7 = vector.extract_strided_slice %6 {offsets = [0, 0, 0], sizes = [2, 16, 128], strides = [1, 1, 1]} : vector<2x24x128xf32> to vector<2x16x128xf32>
    %c0_i32 = arith.constant 0 : i32
    %8 = arith.addi %0, %c0_i32 : i32
    %c9_i32 = arith.constant 9 : i32
    %9 = arith.muli %8, %c9_i32 : i32
    %c0_i32_5 = arith.constant 0 : i32
    %10 = arith.addi %9, %c0_i32_5 : i32
    %c0_i32_6 = arith.constant 0 : i32
    %11 = arith.addi %10, %c0_i32_6 : i32
    %12 = arith.index_cast %11 : i32 to index
    %13 = memref.load %arg2[%12] : memref<72xf32, #tpu.memory_space<smem>>
    %14 = vector.broadcast %13 : f32 to vector<2x16x128xf32>
    %15 = arith.mulf %14, %7 : vector<2x16x128xf32>
    %16 = arith.addf %2, %15 : vector<2x16x128xf32>
    %c1_i32 = arith.constant 1 : i32
    %17 = arith.addi %0, %c1_i32 : i32
    %c9_i32_7 = arith.constant 9 : i32
    %18 = arith.muli %17, %c9_i32_7 : i32
    %c0_i32_8 = arith.constant 0 : i32
    %19 = arith.addi %18, %c0_i32_8 : i32
    %c0_i32_9 = arith.constant 0 : i32
    %20 = arith.addi %19, %c0_i32_9 : i32
    %21 = arith.index_cast %20 : i32 to index
    %22 = memref.load %arg2[%21] : memref<72xf32, #tpu.memory_space<smem>>
    %23 = vector.broadcast %22 : f32 to vector<2x16x128xf32>
    %24 = arith.mulf %23, %7 : vector<2x16x128xf32>
    %25 = arith.addf %3, %24 : vector<2x16x128xf32>
    %c2_i32 = arith.constant 2 : i32
    %26 = arith.addi %0, %c2_i32 : i32
    %c9_i32_10 = arith.constant 9 : i32
    %27 = arith.muli %26, %c9_i32_10 : i32
    %c0_i32_11 = arith.constant 0 : i32
    %28 = arith.addi %27, %c0_i32_11 : i32
    %c0_i32_12 = arith.constant 0 : i32
    %29 = arith.addi %28, %c0_i32_12 : i32
    %30 = arith.index_cast %29 : i32 to index
    %31 = memref.load %arg2[%30] : memref<72xf32, #tpu.memory_space<smem>>
    %32 = vector.broadcast %31 : f32 to vector<2x16x128xf32>
    %33 = arith.mulf %32, %7 : vector<2x16x128xf32>
    %34 = arith.addf %4, %33 : vector<2x16x128xf32>
    %c3_i32 = arith.constant 3 : i32
    %35 = arith.addi %0, %c3_i32 : i32
    %c9_i32_13 = arith.constant 9 : i32
    %36 = arith.muli %35, %c9_i32_13 : i32
    %c0_i32_14 = arith.constant 0 : i32
    %37 = arith.addi %36, %c0_i32_14 : i32
    %c0_i32_15 = arith.constant 0 : i32
    %38 = arith.addi %37, %c0_i32_15 : i32
    %39 = arith.index_cast %38 : i32 to index
    %40 = memref.load %arg2[%39] : memref<72xf32, #tpu.memory_space<smem>>
    %41 = vector.broadcast %40 : f32 to vector<2x16x128xf32>
    %42 = arith.mulf %41, %7 : vector<2x16x128xf32>
    %43 = arith.addf %5, %42 : vector<2x16x128xf32>
    %44 = vector.extract_strided_slice %6 {offsets = [0, 1, 0], sizes = [2, 16, 128], strides = [1, 1, 1]} : vector<2x24x128xf32> to vector<2x16x128xf32>
    %c0_i32_16 = arith.constant 0 : i32
    %45 = arith.addi %0, %c0_i32_16 : i32
    %c9_i32_17 = arith.constant 9 : i32
    %46 = arith.muli %45, %c9_i32_17 : i32
    %c3_i32_18 = arith.constant 3 : i32
    %47 = arith.addi %46, %c3_i32_18 : i32
    %c0_i32_19 = arith.constant 0 : i32
    %48 = arith.addi %47, %c0_i32_19 : i32
    %49 = arith.index_cast %48 : i32 to index
    %50 = memref.load %arg2[%49] : memref<72xf32, #tpu.memory_space<smem>>
    %51 = vector.broadcast %50 : f32 to vector<2x16x128xf32>
    %52 = arith.mulf %51, %44 : vector<2x16x128xf32>
    %53 = arith.addf %16, %52 : vector<2x16x128xf32>
    %c1_i32_20 = arith.constant 1 : i32
    %54 = arith.addi %0, %c1_i32_20 : i32
    %c9_i32_21 = arith.constant 9 : i32
    %55 = arith.muli %54, %c9_i32_21 : i32
    %c3_i32_22 = arith.constant 3 : i32
    %56 = arith.addi %55, %c3_i32_22 : i32
    %c0_i32_23 = arith.constant 0 : i32
    %57 = arith.addi %56, %c0_i32_23 : i32
    %58 = arith.index_cast %57 : i32 to index
    %59 = memref.load %arg2[%58] : memref<72xf32, #tpu.memory_space<smem>>
    %60 = vector.broadcast %59 : f32 to vector<2x16x128xf32>
    %61 = arith.mulf %60, %44 : vector<2x16x128xf32>
    %62 = arith.addf %25, %61 : vector<2x16x128xf32>
    %c2_i32_24 = arith.constant 2 : i32
    %63 = arith.addi %0, %c2_i32_24 : i32
    %c9_i32_25 = arith.constant 9 : i32
    %64 = arith.muli %63, %c9_i32_25 : i32
    %c3_i32_26 = arith.constant 3 : i32
    %65 = arith.addi %64, %c3_i32_26 : i32
    %c0_i32_27 = arith.constant 0 : i32
    %66 = arith.addi %65, %c0_i32_27 : i32
    %67 = arith.index_cast %66 : i32 to index
    %68 = memref.load %arg2[%67] : memref<72xf32, #tpu.memory_space<smem>>
    %69 = vector.broadcast %68 : f32 to vector<2x16x128xf32>
    %70 = arith.mulf %69, %44 : vector<2x16x128xf32>
    %71 = arith.addf %34, %70 : vector<2x16x128xf32>
    %c3_i32_28 = arith.constant 3 : i32
    %72 = arith.addi %0, %c3_i32_28 : i32
    %c9_i32_29 = arith.constant 9 : i32
    %73 = arith.muli %72, %c9_i32_29 : i32
    %c3_i32_30 = arith.constant 3 : i32
    %74 = arith.addi %73, %c3_i32_30 : i32
    %c0_i32_31 = arith.constant 0 : i32
    %75 = arith.addi %74, %c0_i32_31 : i32
    %76 = arith.index_cast %75 : i32 to index
    %77 = memref.load %arg2[%76] : memref<72xf32, #tpu.memory_space<smem>>
    %78 = vector.broadcast %77 : f32 to vector<2x16x128xf32>
    %79 = arith.mulf %78, %44 : vector<2x16x128xf32>
    %80 = arith.addf %43, %79 : vector<2x16x128xf32>
    %81 = vector.extract_strided_slice %6 {offsets = [0, 2, 0], sizes = [2, 16, 128], strides = [1, 1, 1]} : vector<2x24x128xf32> to vector<2x16x128xf32>
    %c0_i32_32 = arith.constant 0 : i32
    %82 = arith.addi %0, %c0_i32_32 : i32
    %c9_i32_33 = arith.constant 9 : i32
    %83 = arith.muli %82, %c9_i32_33 : i32
    %c6_i32 = arith.constant 6 : i32
    %84 = arith.addi %83, %c6_i32 : i32
    %c0_i32_34 = arith.constant 0 : i32
    %85 = arith.addi %84, %c0_i32_34 : i32
    %86 = arith.index_cast %85 : i32 to index
    %87 = memref.load %arg2[%86] : memref<72xf32, #tpu.memory_space<smem>>
    %88 = vector.broadcast %87 : f32 to vector<2x16x128xf32>
    %89 = arith.mulf %88, %81 : vector<2x16x128xf32>
    %90 = arith.addf %53, %89 : vector<2x16x128xf32>
    %c1_i32_35 = arith.constant 1 : i32
    %91 = arith.addi %0, %c1_i32_35 : i32
    %c9_i32_36 = arith.constant 9 : i32
    %92 = arith.muli %91, %c9_i32_36 : i32
    %c6_i32_37 = arith.constant 6 : i32
    %93 = arith.addi %92, %c6_i32_37 : i32
    %c0_i32_38 = arith.constant 0 : i32
    %94 = arith.addi %93, %c0_i32_38 : i32
    %95 = arith.index_cast %94 : i32 to index
    %96 = memref.load %arg2[%95] : memref<72xf32, #tpu.memory_space<smem>>
    %97 = vector.broadcast %96 : f32 to vector<2x16x128xf32>
    %98 = arith.mulf %97, %81 : vector<2x16x128xf32>
    %99 = arith.addf %62, %98 : vector<2x16x128xf32>
    %c2_i32_39 = arith.constant 2 : i32
    %100 = arith.addi %0, %c2_i32_39 : i32
    %c9_i32_40 = arith.constant 9 : i32
    %101 = arith.muli %100, %c9_i32_40 : i32
    %c6_i32_41 = arith.constant 6 : i32
    %102 = arith.addi %101, %c6_i32_41 : i32
    %c0_i32_42 = arith.constant 0 : i32
    %103 = arith.addi %102, %c0_i32_42 : i32
    %104 = arith.index_cast %103 : i32 to index
    %105 = memref.load %arg2[%104] : memref<72xf32, #tpu.memory_space<smem>>
    %106 = vector.broadcast %105 : f32 to vector<2x16x128xf32>
    %107 = arith.mulf %106, %81 : vector<2x16x128xf32>
    %108 = arith.addf %71, %107 : vector<2x16x128xf32>
    %c3_i32_43 = arith.constant 3 : i32
    %109 = arith.addi %0, %c3_i32_43 : i32
    %c9_i32_44 = arith.constant 9 : i32
    %110 = arith.muli %109, %c9_i32_44 : i32
    %c6_i32_45 = arith.constant 6 : i32
    %111 = arith.addi %110, %c6_i32_45 : i32
    %c0_i32_46 = arith.constant 0 : i32
    %112 = arith.addi %111, %c0_i32_46 : i32
    %113 = arith.index_cast %112 : i32 to index
    %114 = memref.load %arg2[%113] : memref<72xf32, #tpu.memory_space<smem>>
    %115 = vector.broadcast %114 : f32 to vector<2x16x128xf32>
    %116 = arith.mulf %115, %81 : vector<2x16x128xf32>
    %117 = arith.addf %80, %116 : vector<2x16x128xf32>
    %118 = vector.extract_strided_slice %1 {offsets = [0, 0, 1], sizes = [2, 24, 128], strides = [1, 1, 1]} : vector<2x24x130xf32> to vector<2x24x128xf32>
    %119 = vector.extract_strided_slice %118 {offsets = [0, 0, 0], sizes = [2, 16, 128], strides = [1, 1, 1]} : vector<2x24x128xf32> to vector<2x16x128xf32>
    %c0_i32_47 = arith.constant 0 : i32
    %120 = arith.addi %0, %c0_i32_47 : i32
    %c9_i32_48 = arith.constant 9 : i32
    %121 = arith.muli %120, %c9_i32_48 : i32
    %c0_i32_49 = arith.constant 0 : i32
    %122 = arith.addi %121, %c0_i32_49 : i32
    %c1_i32_50 = arith.constant 1 : i32
    %123 = arith.addi %122, %c1_i32_50 : i32
    %124 = arith.index_cast %123 : i32 to index
    %125 = memref.load %arg2[%124] : memref<72xf32, #tpu.memory_space<smem>>
    %126 = vector.broadcast %125 : f32 to vector<2x16x128xf32>
    %127 = arith.mulf %126, %119 : vector<2x16x128xf32>
    %128 = arith.addf %90, %127 : vector<2x16x128xf32>
    %c1_i32_51 = arith.constant 1 : i32
    %129 = arith.addi %0, %c1_i32_51 : i32
    %c9_i32_52 = arith.constant 9 : i32
    %130 = arith.muli %129, %c9_i32_52 : i32
    %c0_i32_53 = arith.constant 0 : i32
    %131 = arith.addi %130, %c0_i32_53 : i32
    %c1_i32_54 = arith.constant 1 : i32
    %132 = arith.addi %131, %c1_i32_54 : i32
    %133 = arith.index_cast %132 : i32 to index
    %134 = memref.load %arg2[%133] : memref<72xf32, #tpu.memory_space<smem>>
    %135 = vector.broadcast %134 : f32 to vector<2x16x128xf32>
    %136 = arith.mulf %135, %119 : vector<2x16x128xf32>
    %137 = arith.addf %99, %136 : vector<2x16x128xf32>
    %c2_i32_55 = arith.constant 2 : i32
    %138 = arith.addi %0, %c2_i32_55 : i32
    %c9_i32_56 = arith.constant 9 : i32
    %139 = arith.muli %138, %c9_i32_56 : i32
    %c0_i32_57 = arith.constant 0 : i32
    %140 = arith.addi %139, %c0_i32_57 : i32
    %c1_i32_58 = arith.constant 1 : i32
    %141 = arith.addi %140, %c1_i32_58 : i32
    %142 = arith.index_cast %141 : i32 to index
    %143 = memref.load %arg2[%142] : memref<72xf32, #tpu.memory_space<smem>>
    %144 = vector.broadcast %143 : f32 to vector<2x16x128xf32>
    %145 = arith.mulf %144, %119 : vector<2x16x128xf32>
    %146 = arith.addf %108, %145 : vector<2x16x128xf32>
    %c3_i32_59 = arith.constant 3 : i32
    %147 = arith.addi %0, %c3_i32_59 : i32
    %c9_i32_60 = arith.constant 9 : i32
    %148 = arith.muli %147, %c9_i32_60 : i32
    %c0_i32_61 = arith.constant 0 : i32
    %149 = arith.addi %148, %c0_i32_61 : i32
    %c1_i32_62 = arith.constant 1 : i32
    %150 = arith.addi %149, %c1_i32_62 : i32
    %151 = arith.index_cast %150 : i32 to index
    %152 = memref.load %arg2[%151] : memref<72xf32, #tpu.memory_space<smem>>
    %153 = vector.broadcast %152 : f32 to vector<2x16x128xf32>
    %154 = arith.mulf %153, %119 : vector<2x16x128xf32>
    %155 = arith.addf %117, %154 : vector<2x16x128xf32>
    %156 = vector.extract_strided_slice %118 {offsets = [0, 1, 0], sizes = [2, 16, 128], strides = [1, 1, 1]} : vector<2x24x128xf32> to vector<2x16x128xf32>
    %c0_i32_63 = arith.constant 0 : i32
    %157 = arith.addi %0, %c0_i32_63 : i32
    %c9_i32_64 = arith.constant 9 : i32
    %158 = arith.muli %157, %c9_i32_64 : i32
    %c3_i32_65 = arith.constant 3 : i32
    %159 = arith.addi %158, %c3_i32_65 : i32
    %c1_i32_66 = arith.constant 1 : i32
    %160 = arith.addi %159, %c1_i32_66 : i32
    %161 = arith.index_cast %160 : i32 to index
    %162 = memref.load %arg2[%161] : memref<72xf32, #tpu.memory_space<smem>>
    %163 = vector.broadcast %162 : f32 to vector<2x16x128xf32>
    %164 = arith.mulf %163, %156 : vector<2x16x128xf32>
    %165 = arith.addf %128, %164 : vector<2x16x128xf32>
    %c1_i32_67 = arith.constant 1 : i32
    %166 = arith.addi %0, %c1_i32_67 : i32
    %c9_i32_68 = arith.constant 9 : i32
    %167 = arith.muli %166, %c9_i32_68 : i32
    %c3_i32_69 = arith.constant 3 : i32
    %168 = arith.addi %167, %c3_i32_69 : i32
    %c1_i32_70 = arith.constant 1 : i32
    %169 = arith.addi %168, %c1_i32_70 : i32
    %170 = arith.index_cast %169 : i32 to index
    %171 = memref.load %arg2[%170] : memref<72xf32, #tpu.memory_space<smem>>
    %172 = vector.broadcast %171 : f32 to vector<2x16x128xf32>
    %173 = arith.mulf %172, %156 : vector<2x16x128xf32>
    %174 = arith.addf %137, %173 : vector<2x16x128xf32>
    %c2_i32_71 = arith.constant 2 : i32
    %175 = arith.addi %0, %c2_i32_71 : i32
    %c9_i32_72 = arith.constant 9 : i32
    %176 = arith.muli %175, %c9_i32_72 : i32
    %c3_i32_73 = arith.constant 3 : i32
    %177 = arith.addi %176, %c3_i32_73 : i32
    %c1_i32_74 = arith.constant 1 : i32
    %178 = arith.addi %177, %c1_i32_74 : i32
    %179 = arith.index_cast %178 : i32 to index
    %180 = memref.load %arg2[%179] : memref<72xf32, #tpu.memory_space<smem>>
    %181 = vector.broadcast %180 : f32 to vector<2x16x128xf32>
    %182 = arith.mulf %181, %156 : vector<2x16x128xf32>
    %183 = arith.addf %146, %182 : vector<2x16x128xf32>
    %c3_i32_75 = arith.constant 3 : i32
    %184 = arith.addi %0, %c3_i32_75 : i32
    %c9_i32_76 = arith.constant 9 : i32
    %185 = arith.muli %184, %c9_i32_76 : i32
    %c3_i32_77 = arith.constant 3 : i32
    %186 = arith.addi %185, %c3_i32_77 : i32
    %c1_i32_78 = arith.constant 1 : i32
    %187 = arith.addi %186, %c1_i32_78 : i32
    %188 = arith.index_cast %187 : i32 to index
    %189 = memref.load %arg2[%188] : memref<72xf32, #tpu.memory_space<smem>>
    %190 = vector.broadcast %189 : f32 to vector<2x16x128xf32>
    %191 = arith.mulf %190, %156 : vector<2x16x128xf32>
    %192 = arith.addf %155, %191 : vector<2x16x128xf32>
    %193 = vector.extract_strided_slice %118 {offsets = [0, 2, 0], sizes = [2, 16, 128], strides = [1, 1, 1]} : vector<2x24x128xf32> to vector<2x16x128xf32>
    %c0_i32_79 = arith.constant 0 : i32
    %194 = arith.addi %0, %c0_i32_79 : i32
    %c9_i32_80 = arith.constant 9 : i32
    %195 = arith.muli %194, %c9_i32_80 : i32
    %c6_i32_81 = arith.constant 6 : i32
    %196 = arith.addi %195, %c6_i32_81 : i32
    %c1_i32_82 = arith.constant 1 : i32
    %197 = arith.addi %196, %c1_i32_82 : i32
    %198 = arith.index_cast %197 : i32 to index
    %199 = memref.load %arg2[%198] : memref<72xf32, #tpu.memory_space<smem>>
    %200 = vector.broadcast %199 : f32 to vector<2x16x128xf32>
    %201 = arith.mulf %200, %193 : vector<2x16x128xf32>
    %202 = arith.addf %165, %201 : vector<2x16x128xf32>
    %c1_i32_83 = arith.constant 1 : i32
    %203 = arith.addi %0, %c1_i32_83 : i32
    %c9_i32_84 = arith.constant 9 : i32
    %204 = arith.muli %203, %c9_i32_84 : i32
    %c6_i32_85 = arith.constant 6 : i32
    %205 = arith.addi %204, %c6_i32_85 : i32
    %c1_i32_86 = arith.constant 1 : i32
    %206 = arith.addi %205, %c1_i32_86 : i32
    %207 = arith.index_cast %206 : i32 to index
    %208 = memref.load %arg2[%207] : memref<72xf32, #tpu.memory_space<smem>>
    %209 = vector.broadcast %208 : f32 to vector<2x16x128xf32>
    %210 = arith.mulf %209, %193 : vector<2x16x128xf32>
    %211 = arith.addf %174, %210 : vector<2x16x128xf32>
    %c2_i32_87 = arith.constant 2 : i32
    %212 = arith.addi %0, %c2_i32_87 : i32
    %c9_i32_88 = arith.constant 9 : i32
    %213 = arith.muli %212, %c9_i32_88 : i32
    %c6_i32_89 = arith.constant 6 : i32
    %214 = arith.addi %213, %c6_i32_89 : i32
    %c1_i32_90 = arith.constant 1 : i32
    %215 = arith.addi %214, %c1_i32_90 : i32
    %216 = arith.index_cast %215 : i32 to index
    %217 = memref.load %arg2[%216] : memref<72xf32, #tpu.memory_space<smem>>
    %218 = vector.broadcast %217 : f32 to vector<2x16x128xf32>
    %219 = arith.mulf %218, %193 : vector<2x16x128xf32>
    %220 = arith.addf %183, %219 : vector<2x16x128xf32>
    %c3_i32_91 = arith.constant 3 : i32
    %221 = arith.addi %0, %c3_i32_91 : i32
    %c9_i32_92 = arith.constant 9 : i32
    %222 = arith.muli %221, %c9_i32_92 : i32
    %c6_i32_93 = arith.constant 6 : i32
    %223 = arith.addi %222, %c6_i32_93 : i32
    %c1_i32_94 = arith.constant 1 : i32
    %224 = arith.addi %223, %c1_i32_94 : i32
    %225 = arith.index_cast %224 : i32 to index
    %226 = memref.load %arg2[%225] : memref<72xf32, #tpu.memory_space<smem>>
    %227 = vector.broadcast %226 : f32 to vector<2x16x128xf32>
    %228 = arith.mulf %227, %193 : vector<2x16x128xf32>
    %229 = arith.addf %192, %228 : vector<2x16x128xf32>
    %230 = vector.extract_strided_slice %1 {offsets = [0, 0, 2], sizes = [2, 24, 128], strides = [1, 1, 1]} : vector<2x24x130xf32> to vector<2x24x128xf32>
    %231 = vector.extract_strided_slice %230 {offsets = [0, 0, 0], sizes = [2, 16, 128], strides = [1, 1, 1]} : vector<2x24x128xf32> to vector<2x16x128xf32>
    %c0_i32_95 = arith.constant 0 : i32
    %232 = arith.addi %0, %c0_i32_95 : i32
    %c9_i32_96 = arith.constant 9 : i32
    %233 = arith.muli %232, %c9_i32_96 : i32
    %c0_i32_97 = arith.constant 0 : i32
    %234 = arith.addi %233, %c0_i32_97 : i32
    %c2_i32_98 = arith.constant 2 : i32
    %235 = arith.addi %234, %c2_i32_98 : i32
    %236 = arith.index_cast %235 : i32 to index
    %237 = memref.load %arg2[%236] : memref<72xf32, #tpu.memory_space<smem>>
    %238 = vector.broadcast %237 : f32 to vector<2x16x128xf32>
    %239 = arith.mulf %238, %231 : vector<2x16x128xf32>
    %240 = arith.addf %202, %239 : vector<2x16x128xf32>
    %c1_i32_99 = arith.constant 1 : i32
    %241 = arith.addi %0, %c1_i32_99 : i32
    %c9_i32_100 = arith.constant 9 : i32
    %242 = arith.muli %241, %c9_i32_100 : i32
    %c0_i32_101 = arith.constant 0 : i32
    %243 = arith.addi %242, %c0_i32_101 : i32
    %c2_i32_102 = arith.constant 2 : i32
    %244 = arith.addi %243, %c2_i32_102 : i32
    %245 = arith.index_cast %244 : i32 to index
    %246 = memref.load %arg2[%245] : memref<72xf32, #tpu.memory_space<smem>>
    %247 = vector.broadcast %246 : f32 to vector<2x16x128xf32>
    %248 = arith.mulf %247, %231 : vector<2x16x128xf32>
    %249 = arith.addf %211, %248 : vector<2x16x128xf32>
    %c2_i32_103 = arith.constant 2 : i32
    %250 = arith.addi %0, %c2_i32_103 : i32
    %c9_i32_104 = arith.constant 9 : i32
    %251 = arith.muli %250, %c9_i32_104 : i32
    %c0_i32_105 = arith.constant 0 : i32
    %252 = arith.addi %251, %c0_i32_105 : i32
    %c2_i32_106 = arith.constant 2 : i32
    %253 = arith.addi %252, %c2_i32_106 : i32
    %254 = arith.index_cast %253 : i32 to index
    %255 = memref.load %arg2[%254] : memref<72xf32, #tpu.memory_space<smem>>
    %256 = vector.broadcast %255 : f32 to vector<2x16x128xf32>
    %257 = arith.mulf %256, %231 : vector<2x16x128xf32>
    %258 = arith.addf %220, %257 : vector<2x16x128xf32>
    %c3_i32_107 = arith.constant 3 : i32
    %259 = arith.addi %0, %c3_i32_107 : i32
    %c9_i32_108 = arith.constant 9 : i32
    %260 = arith.muli %259, %c9_i32_108 : i32
    %c0_i32_109 = arith.constant 0 : i32
    %261 = arith.addi %260, %c0_i32_109 : i32
    %c2_i32_110 = arith.constant 2 : i32
    %262 = arith.addi %261, %c2_i32_110 : i32
    %263 = arith.index_cast %262 : i32 to index
    %264 = memref.load %arg2[%263] : memref<72xf32, #tpu.memory_space<smem>>
    %265 = vector.broadcast %264 : f32 to vector<2x16x128xf32>
    %266 = arith.mulf %265, %231 : vector<2x16x128xf32>
    %267 = arith.addf %229, %266 : vector<2x16x128xf32>
    %268 = vector.extract_strided_slice %230 {offsets = [0, 1, 0], sizes = [2, 16, 128], strides = [1, 1, 1]} : vector<2x24x128xf32> to vector<2x16x128xf32>
    %c0_i32_111 = arith.constant 0 : i32
    %269 = arith.addi %0, %c0_i32_111 : i32
    %c9_i32_112 = arith.constant 9 : i32
    %270 = arith.muli %269, %c9_i32_112 : i32
    %c3_i32_113 = arith.constant 3 : i32
    %271 = arith.addi %270, %c3_i32_113 : i32
    %c2_i32_114 = arith.constant 2 : i32
    %272 = arith.addi %271, %c2_i32_114 : i32
    %273 = arith.index_cast %272 : i32 to index
    %274 = memref.load %arg2[%273] : memref<72xf32, #tpu.memory_space<smem>>
    %275 = vector.broadcast %274 : f32 to vector<2x16x128xf32>
    %276 = arith.mulf %275, %268 : vector<2x16x128xf32>
    %277 = arith.addf %240, %276 : vector<2x16x128xf32>
    %c1_i32_115 = arith.constant 1 : i32
    %278 = arith.addi %0, %c1_i32_115 : i32
    %c9_i32_116 = arith.constant 9 : i32
    %279 = arith.muli %278, %c9_i32_116 : i32
    %c3_i32_117 = arith.constant 3 : i32
    %280 = arith.addi %279, %c3_i32_117 : i32
    %c2_i32_118 = arith.constant 2 : i32
    %281 = arith.addi %280, %c2_i32_118 : i32
    %282 = arith.index_cast %281 : i32 to index
    %283 = memref.load %arg2[%282] : memref<72xf32, #tpu.memory_space<smem>>
    %284 = vector.broadcast %283 : f32 to vector<2x16x128xf32>
    %285 = arith.mulf %284, %268 : vector<2x16x128xf32>
    %286 = arith.addf %249, %285 : vector<2x16x128xf32>
    %c2_i32_119 = arith.constant 2 : i32
    %287 = arith.addi %0, %c2_i32_119 : i32
    %c9_i32_120 = arith.constant 9 : i32
    %288 = arith.muli %287, %c9_i32_120 : i32
    %c3_i32_121 = arith.constant 3 : i32
    %289 = arith.addi %288, %c3_i32_121 : i32
    %c2_i32_122 = arith.constant 2 : i32
    %290 = arith.addi %289, %c2_i32_122 : i32
    %291 = arith.index_cast %290 : i32 to index
    %292 = memref.load %arg2[%291] : memref<72xf32, #tpu.memory_space<smem>>
    %293 = vector.broadcast %292 : f32 to vector<2x16x128xf32>
    %294 = arith.mulf %293, %268 : vector<2x16x128xf32>
    %295 = arith.addf %258, %294 : vector<2x16x128xf32>
    %c3_i32_123 = arith.constant 3 : i32
    %296 = arith.addi %0, %c3_i32_123 : i32
    %c9_i32_124 = arith.constant 9 : i32
    %297 = arith.muli %296, %c9_i32_124 : i32
    %c3_i32_125 = arith.constant 3 : i32
    %298 = arith.addi %297, %c3_i32_125 : i32
    %c2_i32_126 = arith.constant 2 : i32
    %299 = arith.addi %298, %c2_i32_126 : i32
    %300 = arith.index_cast %299 : i32 to index
    %301 = memref.load %arg2[%300] : memref<72xf32, #tpu.memory_space<smem>>
    %302 = vector.broadcast %301 : f32 to vector<2x16x128xf32>
    %303 = arith.mulf %302, %268 : vector<2x16x128xf32>
    %304 = arith.addf %267, %303 : vector<2x16x128xf32>
    %305 = vector.extract_strided_slice %230 {offsets = [0, 2, 0], sizes = [2, 16, 128], strides = [1, 1, 1]} : vector<2x24x128xf32> to vector<2x16x128xf32>
    %c0_i32_127 = arith.constant 0 : i32
    %306 = arith.addi %0, %c0_i32_127 : i32
    %c9_i32_128 = arith.constant 9 : i32
    %307 = arith.muli %306, %c9_i32_128 : i32
    %c6_i32_129 = arith.constant 6 : i32
    %308 = arith.addi %307, %c6_i32_129 : i32
    %c2_i32_130 = arith.constant 2 : i32
    %309 = arith.addi %308, %c2_i32_130 : i32
    %310 = arith.index_cast %309 : i32 to index
    %311 = memref.load %arg2[%310] : memref<72xf32, #tpu.memory_space<smem>>
    %312 = vector.broadcast %311 : f32 to vector<2x16x128xf32>
    %313 = arith.mulf %312, %305 : vector<2x16x128xf32>
    %314 = arith.addf %277, %313 : vector<2x16x128xf32>
    %c1_i32_131 = arith.constant 1 : i32
    %315 = arith.addi %0, %c1_i32_131 : i32
    %c9_i32_132 = arith.constant 9 : i32
    %316 = arith.muli %315, %c9_i32_132 : i32
    %c6_i32_133 = arith.constant 6 : i32
    %317 = arith.addi %316, %c6_i32_133 : i32
    %c2_i32_134 = arith.constant 2 : i32
    %318 = arith.addi %317, %c2_i32_134 : i32
    %319 = arith.index_cast %318 : i32 to index
    %320 = memref.load %arg2[%319] : memref<72xf32, #tpu.memory_space<smem>>
    %321 = vector.broadcast %320 : f32 to vector<2x16x128xf32>
    %322 = arith.mulf %321, %305 : vector<2x16x128xf32>
    %323 = arith.addf %286, %322 : vector<2x16x128xf32>
    %c2_i32_135 = arith.constant 2 : i32
    %324 = arith.addi %0, %c2_i32_135 : i32
    %c9_i32_136 = arith.constant 9 : i32
    %325 = arith.muli %324, %c9_i32_136 : i32
    %c6_i32_137 = arith.constant 6 : i32
    %326 = arith.addi %325, %c6_i32_137 : i32
    %c2_i32_138 = arith.constant 2 : i32
    %327 = arith.addi %326, %c2_i32_138 : i32
    %328 = arith.index_cast %327 : i32 to index
    %329 = memref.load %arg2[%328] : memref<72xf32, #tpu.memory_space<smem>>
    %330 = vector.broadcast %329 : f32 to vector<2x16x128xf32>
    %331 = arith.mulf %330, %305 : vector<2x16x128xf32>
    %332 = arith.addf %295, %331 : vector<2x16x128xf32>
    %c3_i32_139 = arith.constant 3 : i32
    %333 = arith.addi %0, %c3_i32_139 : i32
    %c9_i32_140 = arith.constant 9 : i32
    %334 = arith.muli %333, %c9_i32_140 : i32
    %c6_i32_141 = arith.constant 6 : i32
    %335 = arith.addi %334, %c6_i32_141 : i32
    %c2_i32_142 = arith.constant 2 : i32
    %336 = arith.addi %335, %c2_i32_142 : i32
    %337 = arith.index_cast %336 : i32 to index
    %338 = memref.load %arg2[%337] : memref<72xf32, #tpu.memory_space<smem>>
    %339 = vector.broadcast %338 : f32 to vector<2x16x128xf32>
    %340 = arith.mulf %339, %305 : vector<2x16x128xf32>
    %341 = arith.addf %304, %340 : vector<2x16x128xf32>
    %c0_143 = arith.constant 0 : index
    %c0_144 = arith.constant 0 : index
    %c0_145 = arith.constant 0 : index
    %c0_146 = arith.constant 0 : index
    %342 = vector.load %arg4[%c0_143, %c0_144, %c0_145, %c0_146] : memref<2x4x16x128xf32, #tpu.memory_space<vmem>>, vector<2x1x16x128xf32>
    %343 = vector.shape_cast %342 : vector<2x1x16x128xf32> to vector<2x16x128xf32>
    %344 = vector.shape_cast %314 : vector<2x16x128xf32> to vector<2x1x16x128xf32>
    tpu.vector_store %arg4[%c0_143, %c0_144, %c0_145, %c0_146], %344 {strides = array<i32>} : memref<2x4x16x128xf32, #tpu.memory_space<vmem>>, vector<2x1x16x128xf32>,
    %c0_147 = arith.constant 0 : index
    %c1 = arith.constant 1 : index
    %c0_148 = arith.constant 0 : index
    %c0_149 = arith.constant 0 : index
    %345 = vector.load %arg4[%c0_147, %c1, %c0_148, %c0_149] : memref<2x4x16x128xf32, #tpu.memory_space<vmem>>, vector<2x1x16x128xf32>
    %346 = vector.shape_cast %345 : vector<2x1x16x128xf32> to vector<2x16x128xf32>
    %347 = vector.shape_cast %323 : vector<2x16x128xf32> to vector<2x1x16x128xf32>
    tpu.vector_store %arg4[%c0_147, %c1, %c0_148, %c0_149], %347 {strides = array<i32>} : memref<2x4x16x128xf32, #tpu.memory_space<vmem>>, vector<2x1x16x128xf32>,
    %c0_150 = arith.constant 0 : index
    %c2 = arith.constant 2 : index
    %c0_151 = arith.constant 0 : index
    %c0_152 = arith.constant 0 : index
    %348 = vector.load %arg4[%c0_150, %c2, %c0_151, %c0_152] : memref<2x4x16x128xf32, #tpu.memory_space<vmem>>, vector<2x1x16x128xf32>
    %349 = vector.shape_cast %348 : vector<2x1x16x128xf32> to vector<2x16x128xf32>
    %350 = vector.shape_cast %332 : vector<2x16x128xf32> to vector<2x1x16x128xf32>
    tpu.vector_store %arg4[%c0_150, %c2, %c0_151, %c0_152], %350 {strides = array<i32>} : memref<2x4x16x128xf32, #tpu.memory_space<vmem>>, vector<2x1x16x128xf32>,
    %c0_153 = arith.constant 0 : index
    %c3 = arith.constant 3 : index
    %c0_154 = arith.constant 0 : index
    %c0_155 = arith.constant 0 : index
    %351 = vector.load %arg4[%c0_153, %c3, %c0_154, %c0_155] : memref<2x4x16x128xf32, #tpu.memory_space<vmem>>, vector<2x1x16x128xf32>
    %352 = vector.shape_cast %351 : vector<2x1x16x128xf32> to vector<2x16x128xf32>
    %353 = vector.shape_cast %341 : vector<2x16x128xf32> to vector<2x1x16x128xf32>
    tpu.vector_store %arg4[%c0_153, %c3, %c0_154, %c0_155], %353 {strides = array<i32>} : memref<2x4x16x128xf32, #tpu.memory_space<vmem>>, vector<2x1x16x128xf32>,
    return
  }
  func.func @transform_0(%arg0: i32, %arg1: i32) -> i32 {
    %c0_i32 = arith.constant 0 : i32
    %c0_i32_0 = arith.constant 0 : i32
    return %c0_i32 : i32
  }
  func.func @transform_1(%arg0: i32, %arg1: i32) -> (i32, i32, i32) {
    %c0_i32 = arith.constant 0 : i32
    %c0_i32_0 = arith.constant 0 : i32
    %c0_i32_1 = arith.constant 0 : i32
    return %arg0, %c0_i32, %c0_i32_0 : i32, i32, i32
  }
  func.func @transform_2(%arg0: i32, %arg1: i32) -> (i32, i32, i32, i32) {
    %c0_i32 = arith.constant 0 : i32
    %c0_i32_0 = arith.constant 0 : i32
    %c0_i32_1 = arith.constant 0 : i32
    return %arg0, %arg1, %c0_i32, %c0_i32_0 : i32, i32, i32, i32
  }
}

</mosaic_0001>

<bundles_post_ra>
// kernel: tpu_custom_call.1
= control target key start
LH: loop header
LB: loop body
LE: loop exit
PB: predicated region body
PF: predicated region fallthrough
CT: control target
= control target key end

     0   :  { %7 = vsyncpa [#allocation5], 0  ;;  %s4149_s0 = inlined_call_operand.hbm [shape: f32[72], index: 0, kind: input, shape index: {}]   ;;  %s4150_s1 = inlined_call_operand.hbm [shape: f32[2,24,130], index: 1, kind: input, shape index: {}]   ;;  %s4151_s2 = inlined_call_operand.hbm [shape: f32[2,8,16,128], index: 2, kind: output, shape index: {}]  }
   0x1   :  { %8 = vsyncpa [#allocation3], 0 }
   0x2   :  { %9 = vsyncpa [#allocation4], 0 }
   0x3   :  { %11 = vsyncpa [#allocation4 + $0x1], 0  ;;  %s2500_s9 = smov 0   ;;  %s2502_s10 = smov 0  }
   0x4   :  { %s2504_s11 = smov 0   ;;  %s2506_s12 = smov 0  }
   0x5   :  { %s2508_s13 = smov 0   ;;  %s2510_s14 = smov 0  }
   0x6 LB: > { %s2232_s15 = sadd.s32 4294967295, %s2471_s14   ;;  %s2233_s16 = sadd.s32 4294967294, %s2471_s14   ;;  %s2471_s14 = sphi %s2510_s14, %s17_s14   ;;  %s2467_s13 = sphi %s2508_s13, %s4408_s13   ;;  %s2463_s12 = sphi %s2506_s12, %s4407_s12   ;;  %s2459_s11 = sphi %s2504_s11, %s4406_s11   ;;  %s2455_s10 = sphi %s2502_s10, %s4405_s10   ;;  %s2451_s9 = sphi %s2500_s9, %s4404_s9  }
   0x7   : > { %s26_s17 = sadd.s32 1, %s2467_s13  ;;  %s85_s18 = sadd.s32 1, %s2459_s11 }
   0x8   : > { %p27_p0 = scmp.ge.s32.totalorder %s26_s17, 2  ;;  %p95_p1 = scmp.ne.s32.totalorder %s2459_s11, %s2455_s10 }
   0x9   : > { %p96_p2 = scmp.eq.s32.totalorder %s2232_s15, 1  ;;  %p101_p3 = scmp.ne.s32.totalorder %s2455_s10, %s2451_s9 }
   0xa   : > { %s4410_s17 = smov (%p27_p0, %s26_s17), 0  ;;  %p102_p5 = scmp.eq.s32.totalorder %s2233_s16, 1 }
   0xb   : > { %p2540_p4 = por %p96_p2, %p95_p1  ;;  %s81_s20 = ssub.s32 %s2467_s13, %s4410_s17 }
   0xc   : > { %p2234_p6 = scmp.ge.s32.totalorder %s2471_s14, 1  ;;  %p83_p7 = scmp.eq.s32.totalorder %s81_s20, 0 }
   0xd   : > { %s4162_s19 = scalar_select %p2540_p4, 1, 0 }
   0xe   : > { %p2547_p8 = por %p102_p5, %p101_p3  ;;  %p109_p9 = scmp.lt.s32.totalorder %s2471_s14, 3 }
   0xf   : > { %s2553_s22 = scalar_select %p83_p7, %s2459_s11, %s85_s18  }
  0x10   : > { %s4163_s21 = scalar_select %p2547_p8, 1, 0 }
  0x11   : > { %p2555_p10 = pnand %p2234_p6, %p109_p9  ;;  %p2559_p11 = scmp.eq.s32.totalorder %s2232_s15, 0 }
  0x12   : > { %s2473_s25 = smov [#allocation6]   ;;  %s2372_s30 = scalar_lea.hbm %s4149_s0, 16 }
  0x13   : > { %p2278_p12 = pneg %p2555_p10  ;;  %s134_s26 = sshll.u32 %s2473_s25, 4  ;;  %s2571_s26 = int_to_ptr.vmem [resolvable:$true] %s134_s26 }
  0x14   : > { %p2373_p0 = scmp.ne.s32.totalorder %s4149_s0, %s2372_s30  ;;  %p2379_p5 = scmp.lt.u32.totalorder %s2372_s30, %s4149_s0 }
  0x15   : > { %p2567_p13 = pnand %p2559_p11, %p2278_p12 }
  0x17   : > { %p2374_p1 = pneg %p2567_p13 }
  0x19   : > { %p2375_p2 = pnand %p2374_p1, %p2373_p0 }
  0x1b   : > { %p2376_p3 = pneg %p2375_p2 }
  0x1d   : > { %p2381_p6 = pnand %p2379_p5, %p2376_p3 }
  0x1f   : > { %2384 = shalt.err (!%p2381_p6)
}
  0x20   : > { %s2474_s7 = smov [#allocation2]   ;;  %s2385_s20 = scalar_lea.hbm %s4150_s1, 1536 }
  0x21   : > { %2281 = dma.hbm_to_smem (!%p2567_p13), %s4149_s0, 16, %s2474_s7, [#allocation5]  }
  0x22   : > { %p2386_p7 = scmp.ne.s32.totalorder %s4150_s1, %s2385_s20  ;;  %p2392_p0 = scmp.lt.u32.totalorder %s2385_s20, %s4150_s1 }
  0x24   : > { %p2388_p9 = pnand %p2386_p7, %p2374_p1 }
  0x26   : > { %p2389_p12 = pneg %p2388_p9 }
  0x28   : > { %p2394_p2 = pnand %p2392_p0, %p2389_p12 }
  0x2a   : > { %2397 = shalt.err (!%p2394_p2)
}
  0x2b   : > { %s2398_s3 = scalar_lea.vmem %s2571_s26, 1536  ;;  %p2406_p8 = scmp.lt.s32.totalorder %s2571_s26, %s2571_s26 }
  0x2c   : > { %p2399_p3 = scmp.ne.s32.totalorder %s2571_s26, %s2398_s3  ;;  %p2407_p7 = scmp.lt.s32.totalorder %s2398_s3, %s2398_s3 }
  0x2e   : > { %p2401_p5 = pnand %p2399_p3, %p2374_p1  ;;  %p2408_p9 = por %p2407_p7, %p2406_p8 }
  0x30   : > { %p2402_p6 = pneg %p2401_p5 }
  0x32   : > { %p2409_p4 = pnand %p2408_p9, %p2402_p6 }
  0x34   : > { %2412 = shalt.err (!%p2409_p4)
}
  0x35   : > { %s2475_s4 = smov 256   ;;  %s2476_s5 = smov 16  }
  0x36   : > { %2284 = dma.hbm_to_vmem [thread:$0]  (!%p2567_p13), %s4150_s1, 1536, %s2571_s26, [#allocation3], %s2475_s4, %s2475_s4, %s2476_s5  }
  0x37   : > { %150 = sbr.rel (%p2555_p10) target bundleno = 589 (0x24d), region = 28 }
  0x3e   : > { %2438 = dma.done.wait (%p2559_p11), [#allocation5], 16  }
  0x3f   : > { %2440 = vsyncadd (%p2559_p11), [#allocation5], 4294967280 }
  0x40   : > { %2442 = dma.done.wait (%p2559_p11), [#allocation3], 1536  }
  0x41   : > { %2444 = vsyncadd (%p2559_p11), [#allocation3], 4294965760 }
  0x42   : > { %160 = sfence }
  0x43   : > { %s2628_s27 = smul.u32 36, %s2463_s12  ;;  %s2631_s23 = sshll.u32 %s2463_s12, 2  ;;  %v2637_v0 = vld [vmem:[#allocation6 + $0x10] sm:$0xff]  ;;  %v2639_v1 = vld [vmem:[#allocation6] sm:$0xff]  ;;  %v2641_v3 = vld [vmem:[#allocation6 + $0x18] sm:$0xff]  ;;  %vm250_vm0 = vcmask 1046528  }
  0x44   : > { %s199_s15 = sadd.s32 1, %s2631_s23  ;;  %v2643_v4 = vld [vmem:[#allocation6 + $0x8] sm:$0xff]  ;;  %s2477_s18 = smov 127   ;;  %v2652_v9 = vld [vmem:[#allocation6 + $0x38] sm:$0xff]  ;;  %v2654_v10 = vld [vmem:[#allocation6 + $0x30] sm:$0xff]  ;;  %vm383_vm1 = vcmask 1045504  }
  0x45   : > { %s501_s26 = sadd.s32 1, %s2628_s27  ;;  %s2635_s16 = smul.u32 9, %s199_s15  ;;  %v2660_v13 = vld [vmem:[#allocation6 + $0x48] sm:$0xff]  ;;  %v2662_v14 = vld [vmem:[#allocation6 + $0x40] sm:$0xff]  ;;  %vm536_vm2 = vcmask 1039360   ;;  %vm1325_vm3 = vcmask 1031168  }
  0x46   : > { %s502_s8 = sld [smem:[#allocation2 + %s501_s26]]  ;;  %s211_s25 = sadd.s32 2, %s2631_s23  ;;  %v2725_v47 = vld [vmem:[#allocation6 + $0x28] sm:$0xff]  ;;  %v2727_v48 = vld [vmem:[#allocation6 + $0x20] sm:$0xff] }
  0x47   : > { %s549_s24 = sadd.s32 1, %s2635_s16  ;;  %s2669_s28 = smul.u32 9, %s211_s25 }
  0x48   : > { %s550_s20 = sld [smem:[#allocation2 + %s549_s24]]  ;;  %s223_s3 = sadd.s32 3, %s2631_s23 }
  0x49   : > { %s596_s29 = sadd.s32 1, %s2669_s28  ;;  %s2689_s4 = smul.u32 9, %s223_s3 }
  0x4a   : > { %s597_s30 = sld [smem:[#allocation2 + %s596_s29]]  ;;  %s690_s7 = sadd.s32 4, %s2628_s27 }
  0x4b   : > { %s643_s5 = sadd.s32 1, %s2689_s4  ;;  %s691_s23 = sld [smem:[#allocation2 + %s690_s7]] }
  0x4c   : > { %v503_v2 = vstv %s502_s8  ;;  %s644_s6 = sld [smem:[#allocation2 + %s643_s5]]  ;;  %s765_s26 = sadd.s32 4, %s2635_s16 }
  0x4d   : > { %v506_v5 = vmul.f32 %v503_v2, %v2637_v0  ;;  %v504_v6 = vmul.f32 %v503_v2, %v2639_v1  ;;  %v507_v7 = vmul.f32 %v503_v2, %v2641_v3  ;;  %v505_v8 = vmul.f32 %v503_v2, %v2643_v4  ;;  %s766_s8 = sld [smem:[#allocation2 + %s765_s26]]  ;;  %s840_s15 = sadd.s32 4, %s2669_s28 }
  0x4e   : > { %v509_v11 = vmul.f32 %v503_v2, %v2652_v9  ;;  %v508_v12 = vmul.f32 %v503_v2, %v2654_v10  ;;  %v511_v15 = vmul.f32 %v503_v2, %v2660_v13  ;;  %v510_v16 = vmul.f32 %v503_v2, %v2662_v14  ;;  %s841_s24 = sld [smem:[#allocation2 + %s840_s15]]  ;;  %s990_s29 = sadd.s32 7, %s2628_s27 }
  0x4f   : > { %524 = vrot.lane.b32.xlu1 %v506_v5, %s2477_s18  ;;  %520 = vrot.lane.b32.xlu0 %v504_v6, %s2477_s18  ;;  %v551_v17 = vstv %s550_s20  ;;  %v2744_v5 = vld [vmem:[#allocation6 + $0x58] sm:$0xff]  ;;  %v2746_v6 = vld [vmem:[#allocation6 + $0x50] sm:$0xff]  ;;  %s915_s20 = sadd.s32 4, %s2689_s4  ;;  %s1065_s3 = sadd.s32 7, %s2635_s16 }
  0x50   : > { %v553_v18 = vmul.f32 %v551_v17, %v2643_v4  ;;  %v552_v19 = vmul.f32 %v551_v17, %v2639_v1  ;;  %v555_v20 = vmul.f32 %v551_v17, %v2641_v3  ;;  %v554_v21 = vmul.f32 %v551_v17, %v2637_v0  ;;  %s916_s25 = sld [smem:[#allocation2 + %s915_s20]]  ;;  %s2478_s20 = smov 126  }
  0x51   : > { %v557_v22 = vmul.f32 %v551_v17, %v2652_v9  ;;  %v556_v23 = vmul.f32 %v551_v17, %v2654_v10  ;;  %v559_v24 = vmul.f32 %v551_v17, %v2660_v13  ;;  %v558_v25 = vmul.f32 %v551_v17, %v2662_v14  ;;  %s1066_s5 = sld [smem:[#allocation2 + %s1065_s3]] }
  0x52   : > { %v598_v26 = vstv %s597_s30  ;;  %v645_v35 = vstv %s644_s6  ;;  %v692_v40 = vstv %s691_s23  ;;  %s991_s30 = sld [smem:[#allocation2 + %s990_s29]]  ;;  %s1140_s6 = sadd.s32 7, %s2669_s28 }
  0x53   : > { %526 = vrot.lane.b32.xlu1 %v507_v7, %s2477_s18  ;;  %522 = vrot.lane.b32.xlu0 %v505_v8, %s2477_s18  ;;  %v600_v27 = vmul.f32 %v598_v26, %v2643_v4  ;;  %v599_v28 = vmul.f32 %v598_v26, %v2639_v1  ;;  %v602_v29 = vmul.f32 %v598_v26, %v2641_v3  ;;  %s1141_s7 = sld [smem:[#allocation2 + %s1140_s6]]  ;;  %s1215_s23 = sadd.s32 7, %s2689_s4 }
  0x54   : > { %v601_v30 = vmul.f32 %v598_v26, %v2637_v0  ;;  %v604_v31 = vmul.f32 %v598_v26, %v2652_v9  ;;  %v603_v32 = vmul.f32 %v598_v26, %v2654_v10  ;;  %v606_v33 = vmul.f32 %v598_v26, %v2660_v13  ;;  %s1216_s26 = sld [smem:[#allocation2 + %s1215_s23]] }
  0x55   : > { %v605_v34 = vmul.f32 %v598_v26, %v2662_v14  ;;  %v647_v36 = vmul.f32 %v645_v35, %v2643_v4  ;;  %v646_v37 = vmul.f32 %v645_v35, %v2639_v1  ;;  %v649_v38 = vmul.f32 %v645_v35, %v2641_v3 }
  0x56   : > { %v648_v39 = vmul.f32 %v645_v35, %v2637_v0  ;;  %v651_v41 = vmul.f32 %v645_v35, %v2652_v9  ;;  %v650_v42 = vmul.f32 %v645_v35, %v2654_v10  ;;  %v694_v43 = vmul.f32 %v692_v40, %v2643_v4 }
  0x57   : > { %530 = vrot.lane.b32.xlu1 %v509_v11, %s2477_s18  ;;  %528 = vrot.lane.b32.xlu0 %v508_v12, %s2477_s18  ;;  %v696_v44 = vmul.f32 %v692_v40, %v2641_v3  ;;  %v693_v45 = vmul.f32 %v692_v40, %v2639_v1  ;;  %v695_v46 = vmul.f32 %v692_v40, %v2637_v0 }
  0x58   : > { %v653_v49 = vmul.f32 %v645_v35, %v2660_v13  ;;  %v652_v50 = vmul.f32 %v645_v35, %v2662_v14  ;;  %v698_v51 = vmul.f32 %v692_v40, %v2725_v47  ;;  %v697_v52 = vmul.f32 %v692_v40, %v2727_v48 }
  0x59   : > { %v720_v53 = vrot.slane %v694_v43, 1  ;;  %v721_v54 = vrot.slane %v696_v44, 1  ;;  %v717_v55 = vrot.slane %v693_v45, 1  ;;  %v718_v56 = vrot.slane %v695_v46, 1 }
  0x5a   : > { %v700_v57 = vmul.f32 %v692_v40, %v2652_v9  ;;  %v702_v58 = vmul.f32 %v692_v40, %v2660_v13  ;;  %v725_v59 = vrot.slane %v698_v51, 1  ;;  %v723_v60 = vrot.slane %v697_v52, 1 }
  0x5b   : > { %534 = vrot.lane.b32.xlu1 %v511_v15, %s2477_s18  ;;  %532 = vrot.lane.b32.xlu0 %v510_v16, %s2477_s18  ;;  %v722_v61 = vsel %vm250_vm0, %v720_v53, %v721_v54  ;;  %v719_v62 = vsel %vm250_vm0, %v717_v55, %v718_v56  ;;  %v699_v63 = vmul.f32 %v692_v40, %v2654_v10  ;;  %v767_v15 = vstv %s766_s8  ;;  %s1290_s8 = sadd.s32 2, %s2628_s27 }
  0x5c   : > { %v701_v2 = vmul.f32 %v692_v40, %v2662_v14  ;;  %v730_v7 = vrot.slane %v700_v57, 1  ;;  %v731_v8 = vrot.slane %v702_v58, 1  ;;  %v726_v11 = vsel %vm250_vm0, %v721_v54, %v725_v59  ;;  %s1291_s15 = sld [smem:[#allocation2 + %s1290_s8]] }
  0x5d   : > { %v724_v12 = vsel %vm250_vm0, %v718_v56, %v723_v60  ;;  %v727_v16 = vrot.slane %v699_v63, 1  ;;  %v772_v35 = vmul.f32 %v767_v15, %v2727_v48  ;;  %v776_v43 = vmul.f32 %v767_v15, %v2662_v14 }
  0x5e   : > { %v728_v17 = vrot.slane %v701_v2, 1  ;;  %v778_v54 = vmul.f32 %v767_v15, %v2746_v6 }
  0x5f   : > { %570 = vrot.lane.b32.xlu1 %v553_v18, %s2477_s18  ;;  %568 = vrot.lane.b32.xlu0 %v552_v19, %s2477_s18  ;;  %v704_v18 = vmul.f32 %v692_v40, %v2744_v5  ;;  %v703_v19 = vmul.f32 %v692_v40, %v2746_v6  ;;  %v803_v53 = vrot.slane %v776_v43, 1 }
  0x60   : > { %v808_v60 = vrot.slane %v778_v54, 1 }
  0x61   : > { %v733_v26 = vrot.slane %v703_v19, 1 }
  0x63   : > { %574 = vrot.lane.b32.xlu1 %v555_v20, %s2477_s18  ;;  %572 = vrot.lane.b32.xlu0 %v554_v21, %s2477_s18  ;;  %v732_v20 = vsel %vm250_vm0, %v730_v7, %v731_v8  ;;  %v769_v21 = vmul.f32 %v767_v15, %v2643_v4 }
  0x67   : > { %578 = vrot.lane.b32.xlu1 %v557_v22, %s2477_s18  ;;  %576 = vrot.lane.b32.xlu0 %v556_v23, %s2477_s18  ;;  %v771_v22 = vmul.f32 %v767_v15, %v2641_v3  ;;  %v768_v23 = vmul.f32 %v767_v15, %v2639_v1 }
  0x6b   : > { %582 = vrot.lane.b32.xlu1 %v559_v24, %s2477_s18  ;;  %580 = vrot.lane.b32.xlu0 %v558_v25, %s2477_s18  ;;  %v729_v24 = vsel %vm250_vm0, %v727_v16, %v728_v17  ;;  %v735_v25 = vrot.slane %v704_v18, 1 }
  0x6f   : > { %617 = vrot.lane.b32.xlu1 %v600_v27, %s2477_s18  ;;  %615 = vrot.lane.b32.xlu0 %v599_v28, %s2477_s18  ;;  %v770_v27 = vmul.f32 %v767_v15, %v2637_v0  ;;  %v773_v28 = vmul.f32 %v767_v15, %v2725_v47 }
  0x73   : > { %621 = vrot.lane.b32.xlu1 %v602_v29, %s2477_s18  ;;  %619 = vrot.lane.b32.xlu0 %v601_v30, %s2477_s18  ;;  %v795_v29 = vrot.slane %v769_v21, 1  ;;  %v796_v30 = vrot.slane %v771_v22, 1 }
  0x77   : > { %625 = vrot.lane.b32.xlu1 %v604_v31, %s2477_s18  ;;  %623 = vrot.lane.b32.xlu0 %v603_v32, %s2477_s18  ;;  %v792_v31 = vrot.slane %v768_v23, 1  ;;  %v736_v32 = vsel %vm250_vm0, %v731_v8, %v735_v25 }
  0x7b   : > { %629 = vrot.lane.b32.xlu1 %v606_v33, %s2477_s18  ;;  %627 = vrot.lane.b32.xlu0 %v605_v34, %s2477_s18  ;;  %v734_v33 = vsel %vm250_vm0, %v728_v17, %v733_v26  ;;  %v793_v34 = vrot.slane %v770_v27, 1 }
  0x7d   : > { %v794_v40 = vsel %vm250_vm0, %v792_v31, %v793_v34 }
  0x7f   : > { %664 = vrot.lane.b32.xlu1 %v647_v36, %s2477_s18  ;;  %662 = vrot.lane.b32.xlu0 %v646_v37, %s2477_s18  ;;  %v800_v36 = vrot.slane %v773_v28, 1  ;;  %v797_v37 = vsel %vm250_vm0, %v795_v29, %v796_v30 }
  0x81   : > { %v801_v44 = vsel %vm250_vm0, %v796_v30, %v800_v36 }
  0x83   : > { %668 = vrot.lane.b32.xlu1 %v649_v38, %s2477_s18  ;;  %666 = vrot.lane.b32.xlu0 %v648_v39, %s2477_s18  ;;  %v775_v38 = vmul.f32 %v767_v15, %v2652_v9  ;;  %v777_v39 = vmul.f32 %v767_v15, %v2660_v13 }
  0x85   : > { %v805_v45 = vrot.slane %v775_v38, 1  ;;  %v806_v46 = vrot.slane %v777_v39, 1 }
  0x87   : > { %672 = vrot.lane.b32.xlu1 %v651_v41, %s2477_s18  ;;  %670 = vrot.lane.b32.xlu0 %v650_v42, %s2477_s18  ;;  %v798_v41 = vrot.slane %v772_v35, 1  ;;  %v774_v42 = vmul.f32 %v767_v15, %v2654_v10  ;;  %v807_v55 = vsel %vm250_vm0, %v805_v45, %v806_v46 }
  0x89   : > { %v799_v51 = vsel %vm250_vm0, %v793_v34, %v798_v41  ;;  %v802_v52 = vrot.slane %v774_v42, 1 }
  0x8b   : > { %676 = vrot.lane.b32.xlu1 %v653_v49, %s2477_s18  ;;  %674 = vrot.lane.b32.xlu0 %v652_v50, %s2477_s18  ;;  %v779_v49 = vmul.f32 %v767_v15, %v2744_v5  ;;  %v842_v50 = vstv %s841_s24  ;;  %v804_v59 = vsel %vm250_vm0, %v802_v52, %v803_v53  ;;  %s1338_s24 = sadd.s32 2, %s2635_s16 }
  0x8c   : > { %v844_v57 = vmul.f32 %v842_v50, %v2643_v4  ;;  %v846_v58 = vmul.f32 %v842_v50, %v2641_v3  ;;  %v848_v8 = vmul.f32 %v842_v50, %v2725_v47  ;;  %v847_v16 = vmul.f32 %v842_v50, %v2727_v48 }
  0x8d   : > { %v810_v56 = vrot.slane %v779_v49, 1  ;;  %v850_v17 = vmul.f32 %v842_v50, %v2652_v9  ;;  %v852_v18 = vmul.f32 %v842_v50, %v2660_v13  ;;  %v849_v19 = vmul.f32 %v842_v50, %v2654_v10 }
  0x8e   : > { %v870_v2 = vrot.slane %v844_v57, 1  ;;  %v871_v7 = vrot.slane %v846_v58, 1  ;;  %v875_v23 = vrot.slane %v848_v8, 1  ;;  %v854_v29 = vmul.f32 %v842_v50, %v2744_v5 }
  0x8f   : > { %739 = vrot.lane.b32.xlu1 %v722_v61, %s2477_s18  ;;  %737 = vrot.lane.b32.xlu0 %v719_v62, %s2477_s18  ;;  %v843_v61 = vmul.f32 %v842_v50, %v2639_v1  ;;  %v845_v62 = vmul.f32 %v842_v50, %v2637_v0  ;;  %v811_v63 = vsel %vm250_vm0, %v806_v46, %v810_v56  ;;  %v880_v25 = vrot.slane %v850_v17, 1 }
  0x90   : > { %v872_v21 = vsel %vm250_vm0, %v870_v2, %v871_v7  ;;  %v881_v26 = vrot.slane %v852_v18, 1  ;;  %v877_v27 = vrot.slane %v849_v19, 1  ;;  %v876_v30 = vsel %vm250_vm0, %v871_v7, %v875_v23 }
  0x91   : > { %v868_v15 = vrot.slane %v845_v62, 1  ;;  %v885_v36 = vrot.slane %v854_v29, 1 }
  0x92   : > { %v882_v34 = vsel %vm250_vm0, %v880_v25, %v881_v26 }
  0x93   : > { %743 = vrot.lane.b32.xlu1 %v726_v11, %s2477_s18  ;;  %741 = vrot.lane.b32.xlu0 %v724_v12, %s2477_s18  ;;  %v809_v11 = vsel %vm250_vm0, %v803_v53, %v808_v60  ;;  %v867_v12 = vrot.slane %v843_v61, 1  ;;  %v886_v42 = vsel %vm250_vm0, %v881_v26, %v885_v36 }
  0x95   : > { %v869_v22 = vsel %vm250_vm0, %v867_v12, %v868_v15 }
  0x97   : > { %747 = vrot.lane.b32.xlu1 %v732_v20, %s2477_s18  ;;  %745 = vrot.lane.b32.xlu0 %v729_v24, %s2477_s18  ;;  %v851_v20 = vmul.f32 %v842_v50, %v2662_v14  ;;  %v873_v24 = vrot.slane %v847_v16, 1  ;;  %v992_v16 = vstv %s991_s30  ;;  %s1432_s30 = sadd.s32 2, %s2689_s4 }
  0x98   : > { %v993_v23 = vmul.f32 %v992_v16, %v2639_v1  ;;  %s1433_s3 = sld [smem:[#allocation2 + %s1432_s30]]  ;;  %s1854_s30 = sadd.s32 8, %s2635_s16 }
  0x99   : > { %v878_v28 = vrot.slane %v851_v20, 1  ;;  %v874_v31 = vsel %vm250_vm0, %v868_v15, %v873_v24  ;;  %v995_v24 = vmul.f32 %v992_v16, %v2637_v0 }
  0x9b   : > { %751 = vrot.lane.b32.xlu1 %v736_v32, %s2477_s18  ;;  %749 = vrot.lane.b32.xlu0 %v734_v33, %s2477_s18  ;;  %v853_v32 = vmul.f32 %v842_v50, %v2746_v6  ;;  %v917_v33 = vstv %s916_s25  ;;  %v879_v35 = vsel %vm250_vm0, %v877_v27, %v878_v28  ;;  %v998_v27 = vmul.f32 %v992_v16, %v2725_v47  ;;  %s1339_s25 = sld [smem:[#allocation2 + %s1338_s24]] }
  0x9c   : > { %v921_v39 = vmul.f32 %v917_v33, %v2641_v3  ;;  %v920_v41 = vmul.f32 %v917_v33, %v2637_v0  ;;  %v922_v45 = vmul.f32 %v917_v33, %v2727_v48  ;;  %v925_v52 = vmul.f32 %v917_v33, %v2652_v9 }
  0x9d   : > { %v883_v38 = vrot.slane %v853_v32, 1  ;;  %v927_v53 = vmul.f32 %v917_v33, %v2660_v13  ;;  %v924_v54 = vmul.f32 %v917_v33, %v2654_v10  ;;  %v929_v2 = vmul.f32 %v917_v33, %v2744_v5 }
  0x9e   : > { %v946_v49 = vrot.slane %v921_v39, 1  ;;  %v955_v60 = vrot.slane %v925_v52, 1  ;;  %v928_v7 = vmul.f32 %v917_v33, %v2746_v6  ;;  %v1000_v39 = vmul.f32 %v992_v16, %v2652_v9 }
  0x9f   : > { %814 = vrot.lane.b32.xlu1 %v797_v37, %s2477_s18  ;;  %812 = vrot.lane.b32.xlu0 %v794_v40, %s2477_s18  ;;  %v919_v37 = vmul.f32 %v917_v33, %v2643_v4  ;;  %v918_v40 = vmul.f32 %v917_v33, %v2639_v1  ;;  %v884_v46 = vsel %vm250_vm0, %v878_v28, %v883_v38  ;;  %v956_v61 = vrot.slane %v927_v53, 1 }
  0xa0   : > { %v952_v62 = vrot.slane %v924_v54, 1  ;;  %v960_v19 = vrot.slane %v929_v2, 1  ;;  %v958_v20 = vrot.slane %v928_v7, 1  ;;  %v1067_v53 = vstv %s1066_s5  ;;  %s1479_s5 = sadd.s32 5, %s2628_s27 }
  0xa1   : > { %v945_v43 = vrot.slane %v919_v37, 1  ;;  %v942_v50 = vrot.slane %v918_v40, 1  ;;  %v957_v17 = vsel %vm250_vm0, %v955_v60, %v956_v61  ;;  %v1025_v37 = vrot.slane %v998_v27, 2  ;;  %s1480_s6 = sld [smem:[#allocation2 + %s1479_s5]]  ;;  %s1929_s5 = sadd.s32 8, %s2669_s28 }
  0xa2   : > { %v961_v28 = vsel %vm250_vm0, %v956_v61, %v960_v19  ;;  %v1002_v40 = vmul.f32 %v992_v16, %v2660_v13  ;;  %v1069_v60 = vmul.f32 %v1067_v53, %v2643_v4  ;;  %v1071_v61 = vmul.f32 %v1067_v53, %v2641_v3 }
  0xa3   : > { %818 = vrot.lane.b32.xlu1 %v801_v44, %s2477_s18  ;;  %816 = vrot.lane.b32.xlu0 %v799_v51, %s2477_s18  ;;  %v923_v44 = vmul.f32 %v917_v33, %v2725_v47  ;;  %v943_v51 = vrot.slane %v920_v41, 1  ;;  %v947_v56 = vsel %vm250_vm0, %v945_v43, %v946_v49  ;;  %v999_v43 = vmul.f32 %v992_v16, %v2654_v10 }
  0xa4   : > { %v1031_v52 = vrot.slane %v1002_v40, 2  ;;  %v1073_v19 = vmul.f32 %v1067_v53, %v2725_v47 }
  0xa5   : > { %v944_v57 = vsel %vm250_vm0, %v942_v50, %v943_v51  ;;  %v950_v58 = vrot.slane %v923_v44, 1  ;;  %v1001_v44 = vmul.f32 %v992_v16, %v2662_v14  ;;  %v1027_v54 = vrot.slane %v999_v43, 2 }
  0xa7   : > { %822 = vrot.lane.b32.xlu1 %v807_v55, %s2477_s18  ;;  %820 = vrot.lane.b32.xlu0 %v804_v59, %s2477_s18  ;;  %v926_v55 = vmul.f32 %v917_v33, %v2662_v14  ;;  %v948_v59 = vrot.slane %v922_v45, 1  ;;  %v951_v8 = vsel %vm250_vm0, %v946_v49, %v950_v58  ;;  %v1017_v33 = vrot.slane %v993_v23, 2 }
  0xa8   : > { %v1072_v23 = vmul.f32 %v1067_v53, %v2727_v48 }
  0xab   : > { %826 = vrot.lane.b32.xlu1 %v811_v63, %s2477_s18  ;;  %824 = vrot.lane.b32.xlu0 %v809_v11, %s2477_s18  ;;  %v953_v63 = vrot.slane %v926_v55, 1  ;;  %v949_v11 = vsel %vm250_vm0, %v943_v51, %v948_v59  ;;  %v1030_v51 = vrot.slane %v1000_v39, 2  ;;  %v1028_v55 = vrot.slane %v1001_v44, 2 }
  0xac   : > { %v1076_v39 = vmul.f32 %v1067_v53, %v2662_v14  ;;  %v1079_v44 = vmul.f32 %v1067_v53, %v2744_v5 }
  0xad   : > { %v954_v18 = vsel %vm250_vm0, %v952_v62, %v953_v63  ;;  %v959_v29 = vsel %vm250_vm0, %v953_v63, %v958_v20  ;;  %v1068_v62 = vmul.f32 %v1067_v53, %v2639_v1  ;;  %v1070_v63 = vmul.f32 %v1067_v53, %v2637_v0 }
  0xae   : > { %v1032_v2 = vsel %vm383_vm1, %v1030_v51, %v1031_v52  ;;  %v1029_v7 = vsel %vm383_vm1, %v1027_v54, %v1028_v55  ;;  %v1096_v20 = vrot.slane %v1071_v61, 2 }
  0xaf   : > { %889 = vrot.lane.b32.xlu1 %v872_v21, %s2477_s18  ;;  %887 = vrot.lane.b32.xlu0 %v869_v22, %s2477_s18  ;;  %v994_v21 = vmul.f32 %v992_v16, %v2643_v4  ;;  %v996_v22 = vmul.f32 %v992_v16, %v2641_v3 }
  0xb1   : > { %v1021_v32 = vrot.slane %v996_v22, 2  ;;  %v1093_v22 = vrot.slane %v1070_v63, 2 }
  0xb3   : > { %893 = vrot.lane.b32.xlu1 %v876_v30, %s2477_s18  ;;  %891 = vrot.lane.b32.xlu0 %v874_v31, %s2477_s18  ;;  %v997_v30 = vmul.f32 %v992_v16, %v2727_v48  ;;  %v1020_v31 = vrot.slane %v994_v21, 2  ;;  %v1026_v49 = vsel %vm383_vm1, %v1021_v32, %v1025_v37  ;;  %v1092_v21 = vrot.slane %v1068_v62, 2 }
  0xb4   : > { %v1077_v37 = vmul.f32 %v1067_v53, %v2660_v13 }
  0xb5   : > { %v1023_v38 = vrot.slane %v997_v30, 2  ;;  %v1022_v41 = vsel %vm383_vm1, %v1020_v31, %v1021_v32  ;;  %v1100_v30 = vrot.slane %v1073_v19, 2  ;;  %v1094_v32 = vsel %vm383_vm1, %v1092_v21, %v1093_v22 }
  0xb7   : > { %897 = vrot.lane.b32.xlu1 %v882_v34, %s2477_s18  ;;  %895 = vrot.lane.b32.xlu0 %v879_v35, %s2477_s18  ;;  %v1018_v34 = vrot.slane %v995_v24, 2 }
  0xb9   : > { %v1024_v50 = vsel %vm383_vm1, %v1018_v34, %v1023_v38  ;;  %v1074_v38 = vmul.f32 %v1067_v53, %v2654_v10 }
  0xbb   : > { %901 = vrot.lane.b32.xlu1 %v886_v42, %s2477_s18  ;;  %899 = vrot.lane.b32.xlu0 %v884_v46, %s2477_s18  ;;  %v1019_v42 = vsel %vm383_vm1, %v1017_v33, %v1018_v34  ;;  %v1098_v33 = vrot.slane %v1072_v23, 2  ;;  %v1075_v34 = vmul.f32 %v1067_v53, %v2652_v9  ;;  %v1102_v54 = vrot.slane %v1074_v38, 2 }
  0xbd   : > { %v1099_v43 = vsel %vm383_vm1, %v1093_v22, %v1098_v33  ;;  %v1105_v51 = vrot.slane %v1075_v34, 2 }
  0xbf   : > { %964 = vrot.lane.b32.xlu1 %v947_v56, %s2477_s18  ;;  %962 = vrot.lane.b32.xlu0 %v944_v57, %s2477_s18  ;;  %v1004_v56 = vmul.f32 %v992_v16, %v2744_v5  ;;  %v1003_v57 = vmul.f32 %v992_v16, %v2746_v6 }
  0xc1   : > { %v2841_v12 = vpop.permute.xlu1 %524  ;;  %v2843_v15 = vpop.permute.xlu0 %520 }
  0xc3   : > { %968 = vrot.lane.b32.xlu1 %v951_v8, %s2477_s18  ;;  %966 = vrot.lane.b32.xlu0 %v949_v11, %s2477_s18  ;;  %v1035_v8 = vrot.slane %v1004_v56, 2  ;;  %v1033_v11 = vrot.slane %v1003_v57, 2 }
  0xc5   : > { %v2854_v25 = vpop.permute.xlu1 %526  ;;  %v2856_v26 = vpop.permute.xlu0 %522  ;;  %v1036_v24 = vsel %vm383_vm1, %v1031_v52, %v1035_v8  ;;  %v1034_v27 = vsel %vm383_vm1, %v1028_v55, %v1033_v11  ;;  %v1106_v52 = vrot.slane %v1077_v37, 2  ;;  %v1103_v55 = vrot.slane %v1076_v39, 2 }
  0xc7   : > { %972 = vrot.lane.b32.xlu1 %v957_v17, %s2477_s18  ;;  %970 = vrot.lane.b32.xlu0 %v954_v18, %s2477_s18  ;;  %v1095_v18 = vrot.slane %v1069_v60, 2  ;;  %v1110_v60 = vrot.slane %v1079_v44, 2  ;;  %v1107_v63 = vsel %vm383_vm1, %v1105_v51, %v1106_v52 }
  0xc9   : > { %v2864_v35 = vpop.permute.xlu1 %530  ;;  %v2866_v36 = vpop.permute.xlu0 %528  ;;  %v1097_v31 = vsel %vm383_vm1, %v1095_v18, %v1096_v20  ;;  %v1111_v19 = vsel %vm383_vm1, %v1106_v52, %v1110_v60 }
  0xcb   : > { %976 = vrot.lane.b32.xlu1 %v961_v28, %s2477_s18  ;;  %974 = vrot.lane.b32.xlu0 %v959_v29, %s2477_s18 }
  0xcd   : > { %v2876_v45 = vpop.permute.xlu1 %534  ;;  %v2878_v46 = vpop.permute.xlu0 %532 }
  0xcf   : > { %1039 = vrot.lane.b32.xlu1 %v1022_v41, %s2477_s18  ;;  %1037 = vrot.lane.b32.xlu0 %v1019_v42, %s2477_s18  ;;  %v1101_v42 = vsel %vm383_vm1, %v1096_v20, %v1100_v30 }
  0xd1   : > { %v2886_v58 = vpop.permute.xlu1 %570  ;;  %v2888_v59 = vpop.permute.xlu0 %568 }
  0xd2   : > { %4167 = vst [vmem:[#allocation13_spill] sm:$0xff] %v2886_v58  ;;  %4168 = vst [vmem:[#allocation14_spill] sm:$0xff] %v2888_v59 }
  0xd3   : > { %1043 = vrot.lane.b32.xlu1 %v1026_v49, %s2477_s18  ;;  %1041 = vrot.lane.b32.xlu0 %v1024_v50, %s2477_s18  ;;  %v1078_v49 = vmul.f32 %v1067_v53, %v2746_v6  ;;  %v1142_v50 = vstv %s1141_s7  ;;  %s1554_s7 = sadd.s32 5, %s2635_s16 }
  0xd4   : > { %v1144_v62 = vmul.f32 %v1142_v50, %v2643_v4  ;;  %v1146_v53 = vmul.f32 %v1142_v50, %v2641_v3  ;;  %v1145_v8 = vmul.f32 %v1142_v50, %v2637_v0  ;;  %v1147_v30 = vmul.f32 %v1142_v50, %v2727_v48  ;;  %s1555_s23 = sld [smem:[#allocation2 + %s1554_s7]]  ;;  %s335_s7 = sadd.s32 3, %s2689_s4 }
  0xd5   : > { %v2899_v16 = vpop.permute.xlu1 %574  ;;  %v2901_v17 = vpop.permute.xlu0 %572  ;;  %v1108_v61 = vrot.slane %v1078_v49, 2  ;;  %v1150_v33 = vmul.f32 %v1142_v50, %v2652_v9  ;;  %v1152_v34 = vmul.f32 %v1142_v50, %v2660_v13  ;;  %v1149_v37 = vmul.f32 %v1142_v50, %v2654_v10 }
  0xd6   : > { %4169 = vst [vmem:[#allocation15_spill] sm:$0xff] %v2899_v16  ;;  %4170 = vst [vmem:[#allocation16_spill] sm:$0xff] %v2901_v17  ;;  %v1170_v21 = vrot.slane %v1144_v62, 2  ;;  %v1171_v22 = vrot.slane %v1146_v53, 2  ;;  %v1151_v38 = vmul.f32 %v1142_v50, %v2662_v14  ;;  %v1173_v44 = vrot.slane %v1147_v30, 2 }
  0xd7   : > { %1047 = vrot.lane.b32.xlu1 %v1032_v2, %s2477_s18  ;;  %1045 = vrot.lane.b32.xlu0 %v1029_v7, %s2477_s18  ;;  %v1104_v2 = vsel %vm383_vm1, %v1102_v54, %v1103_v55  ;;  %v1143_v7 = vmul.f32 %v1142_v50, %v2639_v1  ;;  %v1109_v20 = vsel %vm383_vm1, %v1103_v55, %v1108_v61  ;;  %v1180_v52 = vrot.slane %v1150_v33, 2 }
  0xd8   : > { %v1172_v39 = vsel %vm383_vm1, %v1170_v21, %v1171_v22  ;;  %v1154_v54 = vmul.f32 %v1142_v50, %v2744_v5  ;;  %v1181_v55 = vrot.slane %v1152_v34, 2  ;;  %v1177_v60 = vrot.slane %v1149_v37, 2 }
  0xd9   : > { %v2909_v28 = vpop.permute.xlu1 %578  ;;  %v2911_v29 = vpop.permute.xlu0 %576  ;;  %v1167_v23 = vrot.slane %v1143_v7, 2  ;;  %v1178_v61 = vrot.slane %v1151_v38, 2  ;;  %v1153_v62 = vmul.f32 %v1142_v50, %v2746_v6 }
  0xda   : > { %4171 = vst [vmem:[#allocation17_spill] sm:$0xff] %v2909_v28  ;;  %4172 = vst [vmem:[#allocation18_spill] sm:$0xff] %v2911_v29 }
  0xdb   : > { %1051 = vrot.lane.b32.xlu1 %v1036_v24, %s2477_s18  ;;  %1049 = vrot.lane.b32.xlu0 %v1034_v27, %s2477_s18  ;;  %v1168_v24 = vrot.slane %v1145_v8, 2  ;;  %v1148_v27 = vmul.f32 %v1142_v50, %v2725_v47  ;;  %v1217_v8 = vstv %s1216_s26  ;;  %v1179_v21 = vsel %vm383_vm1, %v1177_v60, %v1178_v61  ;;  %s1629_s26 = sadd.s32 5, %s2669_s28 }
  0xdc   : > { %v1219_v50 = vmul.f32 %v1217_v8, %v2643_v4  ;;  %v1223_v38 = vmul.f32 %v1217_v8, %v2725_v47  ;;  %s1630_s8 = sld [smem:[#allocation2 + %s1629_s26]] }
  0xdd   : > { %v2921_v40 = vpop.permute.xlu1 %582  ;;  %v2923_v41 = vpop.permute.xlu0 %580  ;;  %s336_s26 = sld [smem:[#allocation2 + %s335_s7]] }
  0xde   : > { %4173 = vst [vmem:[#allocation19_spill] sm:$0xff] %v2921_v40  ;;  %4174 = vst [vmem:[#allocation20_spill] sm:$0xff] %v2923_v41 }
  0xdf   : > { %1114 = vrot.lane.b32.xlu1 %v1097_v31, %s2477_s18  ;;  %1112 = vrot.lane.b32.xlu0 %v1094_v32, %s2477_s18 }
  0xe1   : > { %v2931_v56 = vpop.permute.xlu1 %617  ;;  %v2933_v57 = vpop.permute.xlu0 %615 }
  0xe2   : > { %4175 = vst [vmem:[#allocation21_spill] sm:$0xff] %v2931_v56  ;;  %4176 = vst [vmem:[#allocation22_spill] sm:$0xff] %v2933_v57 }
  0xe3   : > { %1118 = vrot.lane.b32.xlu1 %v1101_v42, %s2477_s18  ;;  %1116 = vrot.lane.b32.xlu0 %v1099_v43, %s2477_s18  ;;  %v1169_v42 = vsel %vm383_vm1, %v1167_v23, %v1168_v24  ;;  %v1175_v43 = vrot.slane %v1148_v27, 2  ;;  %v1183_v23 = vrot.slane %v1153_v62, 2  ;;  %v1220_v27 = vmul.f32 %v1217_v8, %v2637_v0 }
  0xe5   : > { %v2943_v11 = vpop.permute.xlu1 %621  ;;  %v2945_v18 = vpop.permute.xlu0 %619  ;;  %v1176_v53 = vsel %vm383_vm1, %v1171_v22, %v1175_v43  ;;  %v1221_v22 = vmul.f32 %v1217_v8, %v2641_v3  ;;  %v1184_v37 = vsel %vm383_vm1, %v1178_v61, %v1183_v23  ;;  %v1225_v61 = vmul.f32 %v1217_v8, %v2652_v9 }
  0xe6   : > { %4177 = vst [vmem:[#allocation23_spill] sm:$0xff] %v2943_v11  ;;  %4178 = vst [vmem:[#allocation24_spill] sm:$0xff] %v2945_v18 }
  0xe7   : > { %1122 = vrot.lane.b32.xlu1 %v1107_v63, %s2477_s18  ;;  %1120 = vrot.lane.b32.xlu0 %v1104_v2, %s2477_s18  ;;  %v1174_v63 = vsel %vm383_vm1, %v1168_v24, %v1173_v44  ;;  %v1218_v24 = vmul.f32 %v1217_v8, %v2639_v1  ;;  %v1246_v43 = vrot.slane %v1221_v22, 2 }
  0xe9   : > { %v2954_v31 = vpop.permute.xlu1 %625  ;;  %v2956_v32 = vpop.permute.xlu0 %623  ;;  %v1242_v44 = vrot.slane %v1218_v24, 2 }
  0xea   : > { %4179 = vst [vmem:[#allocation25_spill] sm:$0xff] %v2954_v31  ;;  %4180 = vst [vmem:[#allocation26_spill] sm:$0xff] %v2956_v32 }
  0xeb   : > { %1126 = vrot.lane.b32.xlu1 %v1111_v19, %s2477_s18  ;;  %1124 = vrot.lane.b32.xlu0 %v1109_v20, %s2477_s18  ;;  %v1185_v19 = vrot.slane %v1154_v54, 2  ;;  %v1182_v20 = vsel %vm383_vm1, %v1180_v52, %v1181_v55  ;;  %v1243_v52 = vrot.slane %v1220_v27, 2  ;;  %v1255_v27 = vrot.slane %v1225_v61, 2 }
  0xed   : > { %v2966_v49 = vpop.permute.xlu1 %629  ;;  %v2968_v51 = vpop.permute.xlu0 %627  ;;  %v1186_v34 = vsel %vm383_vm1, %v1181_v55, %v1185_v19  ;;  %v1250_v55 = vrot.slane %v1223_v38, 2  ;;  %v1244_v19 = vsel %vm383_vm1, %v1242_v44, %v1243_v52 }
  0xee   : > { %4181 = vst [vmem:[#allocation27_spill] sm:$0xff] %v2966_v49  ;;  %4182 = vst [vmem:[#allocation28_spill] sm:$0xff] %v2968_v51 }
  0xef   : > { %1189 = vrot.lane.b32.xlu1 %v1172_v39, %s2477_s18  ;;  %1187 = vrot.lane.b32.xlu0 %v1169_v42, %s2477_s18  ;;  %v1222_v39 = vmul.f32 %v1217_v8, %v2727_v48  ;;  %v1245_v42 = vrot.slane %v1219_v50, 2  ;;  %v1251_v22 = vsel %vm383_vm1, %v1246_v43, %v1250_v55 }
  0xf1   : > { %v2976_v2 = vpop.permute.xlu1 %664  ;;  %v2978_v7 = vpop.permute.xlu0 %662  ;;  %v1248_v62 = vrot.slane %v1222_v39, 2  ;;  %v1229_v39 = vmul.f32 %v1217_v8, %v2744_v5 }
  0xf2   : > { %4183 = vst [vmem:[#allocation29_spill] sm:$0xff] %v2976_v2  ;;  %4184 = vst [vmem:[#allocation30_spill] sm:$0xff] %v2978_v7 }
  0xf3   : > { %1193 = vrot.lane.b32.xlu1 %v1176_v53, %s2477_s18  ;;  %1191 = vrot.lane.b32.xlu0 %v1174_v63, %s2477_s18  ;;  %v1227_v53 = vmul.f32 %v1217_v8, %v2660_v13  ;;  %v1247_v63 = vsel %vm383_vm1, %v1245_v42, %v1246_v43  ;;  %v1249_v24 = vsel %vm383_vm1, %v1243_v52, %v1248_v62  ;;  %v1260_v55 = vrot.slane %v1229_v39, 2 }
  0xf4   : > { %v1228_v42 = vmul.f32 %v1217_v8, %v2746_v6 }
  0xf5   : > { %v2988_v30 = vpop.permute.xlu1 %668  ;;  %v2990_v33 = vpop.permute.xlu0 %666 }
  0xf6   : > { %4185 = vst [vmem:[#allocation31_spill] sm:$0xff] %v2988_v30  ;;  %4186 = vst [vmem:[#allocation32_spill] sm:$0xff] %v2990_v33  ;;  %v1258_v62 = vrot.slane %v1228_v42, 2 }
  0xf7   : > { %1197 = vrot.lane.b32.xlu1 %v1182_v20, %s2477_s18  ;;  %1195 = vrot.lane.b32.xlu0 %v1179_v21, %s2477_s18  ;;  %v1224_v20 = vmul.f32 %v1217_v8, %v2654_v10  ;;  %v1226_v21 = vmul.f32 %v1217_v8, %v2662_v14 }
  0xf9   : > { %v2998_v54 = vpop.permute.xlu1 %672  ;;  %v3000_v60 = vpop.permute.xlu0 %670  ;;  %v1253_v38 = vrot.slane %v1226_v21, 2 }
  0xfa   : > { %4187 = vst [vmem:[#allocation33_spill] sm:$0xff] %v2998_v54  ;;  %4188 = vst [vmem:[#allocation34_spill] sm:$0xff] %v3000_v60  ;;  %v3086_v54 = vld [vmem:[#allocation6 + $0x10] sm:$0xff] }
  0xfb   : > { %1201 = vrot.lane.b32.xlu1 %v1186_v34, %s2477_s18  ;;  %1199 = vrot.lane.b32.xlu0 %v1184_v37, %s2477_s18  ;;  %v1256_v34 = vrot.slane %v1227_v53, 2  ;;  %v1252_v37 = vrot.slane %v1224_v20, 2 }
  0xfd   : > { %v3010_v23 = vpop.permute.xlu1 %676  ;;  %v3012_v50 = vpop.permute.xlu0 %674  ;;  %v1257_v43 = vsel %vm383_vm1, %v1255_v27, %v1256_v34  ;;  %v1254_v52 = vsel %vm383_vm1, %v1252_v37, %v1253_v38  ;;  %v1261_v8 = vsel %vm383_vm1, %v1256_v34, %v1260_v55 }
  0xff   : > { %1264 = vrot.lane.b32.xlu1 %v1247_v63, %s2477_s18  ;;  %1262 = vrot.lane.b32.xlu0 %v1244_v19, %s2477_s18  ;;  %v1259_v63 = vsel %vm383_vm1, %v1253_v38, %v1258_v62  ;;  %v1292_v19 = vstv %s1291_s15  ;;  %s1704_s15 = sadd.s32 5, %s2689_s4 }
 0x100   : > { %v1296_v34 = vmul.f32 %v1292_v19, %v2641_v3  ;;  %v1295_v38 = vmul.f32 %v1292_v19, %v2637_v0  ;;  %v1300_v0 = vmul.f32 %v1292_v19, %v2660_v13  ;;  %s1705_s24 = sld [smem:[#allocation2 + %s1704_s15]] }
 0x101   : > { %v3021_v44 = vpop.permute.xlu1 %739  ;;  %v3023_v60 = vpop.permute.xlu0 %737  ;;  %s3449_s15 = sld [smem:[#allocation2 + %s2689_s4]] }
 0x103   : > { %1268 = vrot.lane.b32.xlu1 %v1251_v22, %s2477_s18  ;;  %1266 = vrot.lane.b32.xlu0 %v1249_v24, %s2477_s18  ;;  %v1294_v22 = vmul.f32 %v1292_v19, %v2643_v4  ;;  %v1293_v24 = vmul.f32 %v1292_v19, %v2639_v1 }
 0x105   : > { %v3029_v61 = vpop.permute.xlu1 %743  ;;  %v3031_v53 = vpop.permute.xlu0 %741 }
 0x107   : > { %1272 = vrot.lane.b32.xlu1 %v1257_v43, %s2477_s18  ;;  %1270 = vrot.lane.b32.xlu0 %v1254_v52, %s2477_s18  ;;  %v1298_v43 = vmul.f32 %v1292_v19, %v2652_v9  ;;  %v1297_v52 = vmul.f32 %v1292_v19, %v2654_v10 }
 0x109   : > { %v3037_v20 = vpop.permute.xlu1 %747  ;;  %v3039_v21 = vpop.permute.xlu0 %745 }
 0x10b   : > { %1276 = vrot.lane.b32.xlu1 %v1261_v8, %s2477_s18  ;;  %1274 = vrot.lane.b32.xlu0 %v1259_v63, %s2477_s18  ;;  %v1299_v8 = vmul.f32 %v1292_v19, %v2662_v14  ;;  %v1340_v63 = vstv %s1339_s25  ;;  %s1385_s18 = sadd.s32 2, %s2669_s28  ;;  %s1779_s25 = sadd.s32 8, %s2628_s27 }
 0x10c   : > { %v1344_v19 = vmul.f32 %v1340_v63, %v2641_v3  ;;  %s1386_s29 = sld [smem:[#allocation2 + %s1385_s18]]  ;;  %v1348_v33 = vmul.f32 %v1340_v63, %v2660_v13  ;;  %v1347_v30 = vmul.f32 %v1340_v63, %v2662_v14 }
 0x10d   : > { %v3045_v27 = vpop.permute.xlu1 %751  ;;  %v3047_v37 = vpop.permute.xlu0 %749  ;;  %s1780_s18 = sld [smem:[#allocation2 + %s1779_s25]]  ;;  %s235_s25 = sadd.s32 3, %s2628_s27 }
 0x10e   : > { %4189 = vst [vmem:[#allocation35_spill] sm:$0xff] %v3045_v27  ;;  %4190 = vst [vmem:[#allocation36_spill] sm:$0xff] %v3047_v37 }
 0x10f   : > { %1311 = vrot.lane.b32.xlu1 %v1294_v22, %s2478_s20  ;;  %1309 = vrot.lane.b32.xlu0 %v1293_v24, %s2478_s20 }
 0x111   : > { %v3054_v39 = vpop.permute.xlu1 %814  ;;  %v3056_v42 = vpop.permute.xlu0 %812 }
 0x112   : > { %4191 = vst [vmem:[#allocation37_spill] sm:$0xff] %v3054_v39  ;;  %4192 = vst [vmem:[#allocation38_spill] sm:$0xff] %v3056_v42 }
 0x113   : > { %1315 = vrot.lane.b32.xlu1 %v1296_v34, %s2478_s20  ;;  %1313 = vrot.lane.b32.xlu0 %v1295_v38, %s2478_s20  ;;  %v1342_v34 = vmul.f32 %v1340_v63, %v2643_v4  ;;  %v1341_v38 = vmul.f32 %v1340_v63, %v2639_v1  ;;  %v1346_v1 = vmul.f32 %v1340_v63, %v2652_v9  ;;  %v3111_v9 = vld [vmem:[#allocation6 + $0x8] sm:$0xff] }
 0x115   : > { %v3062_v55 = vpop.permute.xlu1 %818  ;;  %v3064_v62 = vpop.permute.xlu0 %816 }
 0x116   : > { %4193 = vst [vmem:[#allocation39_spill] sm:$0xff] %v3062_v55  ;;  %4194 = vst [vmem:[#allocation40_spill] sm:$0xff] %v3064_v62  ;;  %v1556_v55 = vstv %s1555_s23  ;;  %s468_s23 = sadd.s32 6, %s2689_s4 }
 0x117   : > { %1319 = vrot.lane.b32.xlu1 %v1298_v43, %s2478_s20  ;;  %1317 = vrot.lane.b32.xlu0 %v1297_v52, %s2478_s20 }
 0x119   : > { %v3070_v22 = vpop.permute.xlu1 %822  ;;  %v3072_v24 = vpop.permute.xlu0 %820 }
 0x11a   : > { %4195 = vst [vmem:[#allocation41_spill] sm:$0xff] %v3070_v22  ;;  %4196 = vst [vmem:[#allocation42_spill] sm:$0xff] %v3072_v24 }
 0x11b   : > { %1323 = vrot.lane.b32.xlu1 %v1300_v0, %s2478_s20  ;;  %1321 = vrot.lane.b32.xlu0 %v1299_v8, %s2478_s20  ;;  %v1343_v0 = vmul.f32 %v3086_v54, %v1340_v63 }
 0x11d   : > { %v3078_v43 = vpop.permute.xlu1 %826  ;;  %v3080_v52 = vpop.permute.xlu0 %824 }
 0x11e   : > { %4197 = vst [vmem:[#allocation43_spill] sm:$0xff] %v3078_v43  ;;  %4198 = vst [vmem:[#allocation44_spill] sm:$0xff] %v3080_v52 }
 0x11f   : > { %1359 = vrot.lane.b32.xlu1 %v1342_v34, %s2478_s20  ;;  %1357 = vrot.lane.b32.xlu0 %v1341_v38, %s2478_s20  ;;  %v1345_v34 = vmul.f32 %v1340_v63, %v2654_v10 }
 0x121   : > { %v3089_v8 = vpop.permute.xlu1 %889  ;;  %v3091_v4 = vpop.permute.xlu0 %887 }
 0x122   : > { %4199 = vst [vmem:[#allocation45_spill] sm:$0xff] %v3089_v8  ;;  %4200 = vst [vmem:[#allocation46_spill] sm:$0xff] %v3091_v4 }
 0x123   : > { %1363 = vrot.lane.b32.xlu1 %v1344_v19, %s2478_s20  ;;  %1361 = vrot.lane.b32.xlu0 %v1343_v0, %s2478_s20  ;;  %v1387_v19 = vstv %s1386_s29  ;;  %s169_s29 = sand.u32 1, %s2455_s10  }
 0x124   : > { %v1389_v10 = vmul.f32 %v3111_v9, %v1387_v19  ;;  %v1390_v63 = vmul.f32 %v3086_v54, %v1387_v19 }
 0x125   : > { %v3097_v38 = vpop.permute.xlu1 %893  ;;  %v3099_v3 = vpop.permute.xlu0 %891 }
 0x126   : > { %4201 = vst [vmem:[#allocation47_spill] sm:$0xff] %v3097_v38  ;;  %4202 = vst [vmem:[#allocation48_spill] sm:$0xff] %v3099_v3 }
 0x127   : > { %1367 = vrot.lane.b32.xlu1 %v1346_v1, %s2478_s20  ;;  %1365 = vrot.lane.b32.xlu0 %v1345_v34, %s2478_s20  ;;  %v3114_v1 = vld [vmem:[#allocation6] sm:$0xff] }
 0x128   : > { %v1388_v34 = vmul.f32 %v3114_v1, %v1387_v19 }
 0x129   : > { %v3105_v7 = vpop.permute.xlu1 %897  ;;  %v3107_v0 = vpop.permute.xlu0 %895 }
 0x12a   : > { %4203 = vst [vmem:[#allocation49_spill] sm:$0xff] %v3105_v7  ;;  %4204 = vst [vmem:[#allocation50_spill] sm:$0xff] %v3107_v0  ;;  %v1434_v7 = vstv %s1433_s3  ;;  %s1855_s3 = sld [smem:[#allocation2 + %s1854_s30]]  ;;  %s368_s30 = sadd.s32 6, %s2628_s27 }
 0x12b   : > { %1371 = vrot.lane.b32.xlu1 %v1348_v33, %s2478_s20  ;;  %1369 = vrot.lane.b32.xlu0 %v1347_v30, %s2478_s20  ;;  %v3124_v33 = vld [vmem:[#allocation6 + $0x18] sm:$0xff] }
 0x12c   : > { %v1391_v30 = vmul.f32 %v3124_v33, %v1387_v19 }
 0x12d   : > { %v3117_v13 = vpop.permute.xlu1 %901  ;;  %v3119_v14 = vpop.permute.xlu0 %899 }
 0x12e   : > { %4205 = vst [vmem:[#allocation51_spill] sm:$0xff] %v3117_v13  ;;  %4206 = vst [vmem:[#allocation52_spill] sm:$0xff] %v3119_v14  ;;  %v3134_v14 = vld [vmem:[#allocation6 + $0x38] sm:$0xff] }
 0x12f   : > { %1406 = vrot.lane.b32.xlu1 %v1389_v10, %s2478_s20  ;;  %1404 = vrot.lane.b32.xlu0 %v1388_v34, %s2478_s20  ;;  %v1393_v10 = vmul.f32 %v3134_v14, %v1387_v19  ;;  %v3137_v34 = vld [vmem:[#allocation6 + $0x30] sm:$0xff]  ;;  %v1440_v3 = vmul.f32 %v3134_v14, %v1434_v7 }
 0x130   : > { %v1392_v13 = vmul.f32 %v3137_v34, %v1387_v19 }
 0x131   : > { %v3128_v2 = vpop.permute.xlu1 %964  ;;  %v3130_v51 = vpop.permute.xlu0 %962 }
 0x132   : > { %4207 = vst [vmem:[#allocation53_spill] sm:$0xff] %v3128_v2  ;;  %4208 = vst [vmem:[#allocation54_spill] sm:$0xff] %v3130_v51  ;;  %v3150_v51 = vld [vmem:[#allocation6 + $0x40] sm:$0xff] }
 0x133   : > { %1410 = vrot.lane.b32.xlu1 %v1391_v30, %s2478_s20  ;;  %1408 = vrot.lane.b32.xlu0 %v1390_v63, %s2478_s20  ;;  %v3147_v30 = vld [vmem:[#allocation6 + $0x48] sm:$0xff]  ;;  %v1394_v2 = vmul.f32 %v3150_v51, %v1387_v19 }
 0x134   : > { %v1395_v63 = vmul.f32 %v3147_v30, %v1387_v19  ;;  %v1438_v19 = vmul.f32 %v3124_v33, %v1434_v7 }
 0x135   : > { %v3140_v49 = vpop.permute.xlu1 %968  ;;  %v3142_v0 = vpop.permute.xlu0 %966 }
 0x136   : > { %4209 = vst [vmem:[#allocation55_spill] sm:$0xff] %v3140_v49  ;;  %4210 = vst [vmem:[#allocation56_spill] sm:$0xff] %v3142_v0 }
 0x137   : > { %1414 = vrot.lane.b32.xlu1 %v1393_v10, %s2478_s20  ;;  %1412 = vrot.lane.b32.xlu0 %v1392_v13, %s2478_s20  ;;  %v1436_v13 = vmul.f32 %v3111_v9, %v1434_v7  ;;  %v1435_v10 = vmul.f32 %v3114_v1, %v1434_v7 }
 0x139   : > { %v3153_v32 = vpop.permute.xlu1 %972  ;;  %v3155_v31 = vpop.permute.xlu0 %970 }
 0x13a   : > { %4211 = vst [vmem:[#allocation57_spill] sm:$0xff] %v3153_v32  ;;  %4212 = vst [vmem:[#allocation58_spill] sm:$0xff] %v3155_v31  ;;  %v1437_v31 = vmul.f32 %v3086_v54, %v1434_v7  ;;  %v1481_v32 = vstv %s1480_s6  ;;  %s3419_s6 = sld [smem:[#allocation2 + %s1929_s5]] }
 0x13b   : > { %1418 = vrot.lane.b32.xlu1 %v1395_v63, %s2478_s20  ;;  %1416 = vrot.lane.b32.xlu0 %v1394_v2, %s2478_s20  ;;  %v1485_v38 = vmul.f32 %v3124_v33, %v1481_v32  ;;  %v1482_v18 = vmul.f32 %v3114_v1, %v1481_v32  ;;  %v1484_v11 = vmul.f32 %v3086_v54, %v1481_v32  ;;  %s189_s5 = sld [smem:[#allocation2 + %s2628_s27]] }
 0x13c   : > { %v1487_v57 = vmul.f32 %v1481_v32, %v2725_v47  ;;  %v1486_v56 = vmul.f32 %v1481_v32, %v2727_v48  ;;  %v1489_v29 = vmul.f32 %v3134_v14, %v1481_v32  ;;  %v1491_v47 = vmul.f32 %v3147_v30, %v1481_v32 }
 0x13d   : > { %v3161_v0 = vpop.permute.xlu1 %976  ;;  %v3163_v49 = vpop.permute.xlu0 %974  ;;  %v1510_v43 = vrot.slane %v1485_v38, 1  ;;  %v1506_v41 = vrot.slane %v1482_v18, 1  ;;  %v1507_v40 = vrot.slane %v1484_v11, 1  ;;  %v1488_v11 = vmul.f32 %v3137_v34, %v1481_v32 }
 0x13e   : > { %v1490_v38 = vmul.f32 %v3150_v51, %v1481_v32  ;;  %v1519_v28 = vrot.slane %v1489_v29, 1  ;;  %v1492_v62 = vmul.f32 %v1481_v32, %v2746_v6 }
 0x13f   : > { %1453 = vrot.lane.b32.xlu1 %v1436_v13, %s2478_s20  ;;  %1451 = vrot.lane.b32.xlu0 %v1435_v10, %s2478_s20  ;;  %v1439_v13 = vmul.f32 %v3137_v34, %v1434_v7  ;;  %v1483_v10 = vmul.f32 %v3111_v9, %v1481_v32  ;;  %v1508_v18 = vsel %vm250_vm0, %v1506_v41, %v1507_v40 }
 0x140   : > { %v1493_v41 = vmul.f32 %v1481_v32, %v2744_v5  ;;  %v1560_v5 = vmul.f32 %v3124_v33, %v1556_v55  ;;  %v1522_v6 = vrot.slane %v1492_v62, 1  ;;  %v1557_v32 = vmul.f32 %v3114_v1, %v1556_v55 }
 0x141   : > { %v3169_v63 = vpop.permute.xlu1 %1039  ;;  %v3171_v2 = vpop.permute.xlu0 %1037  ;;  %v1509_v52 = vrot.slane %v1483_v10, 1 }
 0x143   : > { %1457 = vrot.lane.b32.xlu1 %v1438_v19, %s2478_s20  ;;  %1455 = vrot.lane.b32.xlu0 %v1437_v31, %s2478_s20  ;;  %v1442_v19 = vmul.f32 %v3147_v30, %v1434_v7  ;;  %v1441_v31 = vmul.f32 %v3150_v51, %v1434_v7  ;;  %v1514_v7 = vrot.slane %v1487_v57, 1  ;;  %v1511_v48 = vsel %vm250_vm0, %v1509_v52, %v1510_v43 }
 0x144   : > { %v1520_v52 = vrot.slane %v1491_v47, 1  ;;  %v1559_v47 = vmul.f32 %v3086_v54, %v1556_v55 }
 0x145   : > { %v3181_v4 = vpop.permute.xlu1 %1043  ;;  %v3183_v8 = vpop.permute.xlu0 %1041 }
 0x147   : > { %1461 = vrot.lane.b32.xlu1 %v1440_v3, %s2478_s20  ;;  %1459 = vrot.lane.b32.xlu0 %v1439_v13, %s2478_s20  ;;  %v1512_v3 = vrot.slane %v1486_v56, 1  ;;  %v1515_v56 = vsel %vm250_vm0, %v1510_v43, %v1514_v7  ;;  %v1521_v43 = vsel %vm250_vm0, %v1519_v28, %v1520_v52  ;;  %v1558_v7 = vmul.f32 %v3111_v9, %v1556_v55 }
 0x149   : > { %v3192_v24 = vpop.permute.xlu1 %1047  ;;  %v3194_v22 = vpop.permute.xlu0 %1045  ;;  %v1513_v57 = vsel %vm250_vm0, %v1507_v40, %v1512_v3  ;;  %v1524_v40 = vrot.slane %v1493_v41, 1  ;;  %v1584_v62 = vrot.slane %v1558_v7, 1  ;;  %v1581_v41 = vrot.slane %v1557_v32, 1 }
 0x14a   : > { %4213 = vst [vmem:[#allocation59_spill] sm:$0xff] %v3194_v22 }
 0x14b   : > { %1465 = vrot.lane.b32.xlu1 %v1442_v19, %s2478_s20  ;;  %1463 = vrot.lane.b32.xlu0 %v1441_v31, %s2478_s20  ;;  %v1516_v19 = vrot.slane %v1488_v11, 1  ;;  %v1517_v31 = vrot.slane %v1490_v38, 1  ;;  %v3231_v11 = vld [vmem:[#allocation6 + $0x28] sm:$0xff]  ;;  %v1525_v38 = vsel %vm250_vm0, %v1520_v52, %v1524_v40  ;;  %v1566_v40 = vmul.f32 %v3147_v30, %v1556_v55 }
 0x14c   : > { %v1562_v28 = vmul.f32 %v3231_v11, %v1556_v55 }
 0x14d   : > { %v3204_v13 = vpop.permute.xlu1 %1051  ;;  %v3206_v10 = vpop.permute.xlu0 %1049  ;;  %v1518_v3 = vsel %vm250_vm0, %v1516_v19, %v1517_v31  ;;  %v1582_v19 = vrot.slane %v1559_v47, 1 }
 0x14e   : > { %4214 = vst [vmem:[#allocation60_spill] sm:$0xff] %v3204_v13  ;;  %4215 = vst [vmem:[#allocation61_spill] sm:$0xff] %v3206_v10 }
 0x14f   : > { %1528 = vrot.lane.b32.xlu1 %v1511_v48, %s2478_s20  ;;  %1526 = vrot.lane.b32.xlu0 %v1508_v18, %s2478_s20  ;;  %v1583_v7 = vsel %vm250_vm0, %v1581_v41, %v1582_v19  ;;  %v3263_v41 = vld [vmem:[#allocation6 + $0x50] sm:$0xff] }
 0x151   : > { %v3214_v17 = vpop.permute.xlu1 %1114  ;;  %v3216_v29 = vpop.permute.xlu0 %1112 }
 0x152   : > { %4216 = vst [vmem:[#allocation62_spill] sm:$0xff] %v3214_v17  ;;  %4217 = vst [vmem:[#allocation63_spill] sm:$0xff] %v3216_v29 }
 0x153   : > { %1532 = vrot.lane.b32.xlu1 %v1515_v56, %s2478_s20  ;;  %1530 = vrot.lane.b32.xlu0 %v1513_v57, %s2478_s20  ;;  %v1585_v56 = vrot.slane %v1560_v5, 1  ;;  %v1523_v57 = vsel %vm250_vm0, %v1517_v31, %v1522_v6  ;;  %v1564_v31 = vmul.f32 %v3134_v14, %v1556_v55  ;;  %v1565_v6 = vmul.f32 %v3150_v51, %v1556_v55 }
 0x155   : > { %v3226_v48 = vpop.permute.xlu1 %1118  ;;  %v3228_v18 = vpop.permute.xlu0 %1116  ;;  %v1586_v52 = vsel %vm250_vm0, %v1584_v62, %v1585_v56  ;;  %v1595_v62 = vrot.slane %v1566_v40, 1 }
 0x156   : > { %4218 = vst [vmem:[#allocation64_spill] sm:$0xff] %v3226_v48  ;;  %4219 = vst [vmem:[#allocation65_spill] sm:$0xff] %v3228_v18  ;;  %v3238_v48 = vld [vmem:[#allocation6 + $0x20] sm:$0xff] }
 0x157   : > { %1536 = vrot.lane.b32.xlu1 %v1521_v43, %s2478_s20  ;;  %1534 = vrot.lane.b32.xlu0 %v1518_v3, %s2478_s20  ;;  %v1561_v18 = vmul.f32 %v3238_v48, %v1556_v55  ;;  %v1589_v43 = vrot.slane %v1562_v28, 1  ;;  %v1563_v3 = vmul.f32 %v3137_v34, %v1556_v55 }
 0x159   : > { %v3241_v29 = vpop.permute.xlu1 %1122  ;;  %v3243_v17 = vpop.permute.xlu0 %1120  ;;  %v1587_v5 = vrot.slane %v1561_v18, 1  ;;  %v1590_v28 = vsel %vm250_vm0, %v1585_v56, %v1589_v43  ;;  %v1631_v56 = vstv %s1630_s8  ;;  %s3434_s8 = sld [smem:[#allocation2 + %s468_s23]]  ;;  %s302_s23 = sadd.s32 3, %s2669_s28 }
 0x15a   : > { %4220 = vst [vmem:[#allocation66_spill] sm:$0xff] %v3241_v29  ;;  %4221 = vst [vmem:[#allocation67_spill] sm:$0xff] %v3243_v17  ;;  %v1567_v17 = vmul.f32 %v3263_v41, %v1556_v55  ;;  %v1591_v29 = vrot.slane %v1563_v3, 1  ;;  %v1632_v3 = vmul.f32 %v3114_v1, %v1631_v56  ;;  %v1636_v42 = vmul.f32 %v3238_v48, %v1631_v56 }
 0x15b   : > { %1540 = vrot.lane.b32.xlu1 %v1525_v38, %s2478_s20  ;;  %1538 = vrot.lane.b32.xlu0 %v1523_v57, %s2478_s20  ;;  %v1594_v38 = vrot.slane %v1564_v31, 1  ;;  %v3260_v57 = vld [vmem:[#allocation6 + $0x58] sm:$0xff] }
 0x15c   : > { %v1568_v18 = vmul.f32 %v3260_v57, %v1556_v55  ;;  %v1633_v55 = vmul.f32 %v3111_v9, %v1631_v56 }
 0x15d   : > { %v3253_v32 = vpop.permute.xlu1 %1126  ;;  %v3255_v47 = vpop.permute.xlu0 %1124  ;;  %v1596_v31 = vsel %vm250_vm0, %v1594_v38, %v1595_v62 }
 0x15e   : > { %4222 = vst [vmem:[#allocation68_spill] sm:$0xff] %v3253_v32  ;;  %4223 = vst [vmem:[#allocation69_spill] sm:$0xff] %v3255_v47  ;;  %v1588_v32 = vsel %vm250_vm0, %v1582_v19, %v1587_v5  ;;  %v1592_v47 = vrot.slane %v1565_v6, 1  ;;  %v1599_v40 = vrot.slane %v1568_v18, 1  ;;  %v1635_v5 = vmul.f32 %v3124_v33, %v1631_v56 }
 0x15f   : > { %1603 = vrot.lane.b32.xlu1 %v1586_v52, %s2478_s20  ;;  %1601 = vrot.lane.b32.xlu0 %v1583_v7, %s2478_s20  ;;  %v1597_v7 = vrot.slane %v1567_v17, 1  ;;  %v1634_v6 = vmul.f32 %v3086_v54, %v1631_v56  ;;  %v1656_v18 = vrot.slane %v1632_v3, 1 }
 0x160   : > { %v1593_v19 = vsel %vm250_vm0, %v1591_v29, %v1592_v47  ;;  %v1600_v17 = vsel %vm250_vm0, %v1595_v62, %v1599_v40  ;;  %v1659_v29 = vrot.slane %v1633_v55, 1  ;;  %v1660_v38 = vrot.slane %v1635_v5, 1 }
 0x161   : > { %v3267_v43 = vpop.permute.xlu1 %1189  ;;  %v3269_v52 = vpop.permute.xlu0 %1187  ;;  %v1657_v16 = vrot.slane %v1634_v6, 1  ;;  %v1638_v62 = vmul.f32 %v3137_v34, %v1631_v56  ;;  %v1640_v40 = vmul.f32 %v3150_v51, %v1631_v56  ;;  %v1662_v5 = vrot.slane %v1636_v42, 1 }
 0x162   : > { %4224 = vst [vmem:[#allocation70_spill] sm:$0xff] %v3267_v43  ;;  %4225 = vst [vmem:[#allocation71_spill] sm:$0xff] %v3269_v52  ;;  %v1642_v42 = vmul.f32 %v3263_v41, %v1631_v56 }
 0x163   : > { %1607 = vrot.lane.b32.xlu1 %v1590_v28, %s2478_s20  ;;  %1605 = vrot.lane.b32.xlu0 %v1588_v32, %s2478_s20  ;;  %v1598_v32 = vsel %vm250_vm0, %v1592_v47, %v1597_v7  ;;  %v1637_v28 = vmul.f32 %v3231_v11, %v1631_v56  ;;  %v1661_v7 = vsel %vm250_vm0, %v1659_v29, %v1660_v38 }
 0x164   : > { %v1658_v55 = vsel %vm250_vm0, %v1656_v18, %v1657_v16  ;;  %v1663_v39 = vsel %vm250_vm0, %v1657_v16, %v1662_v5  ;;  %v1643_v29 = vmul.f32 %v3260_v57, %v1631_v56  ;;  %v1706_v18 = vstv %s1705_s24  ;;  %s2004_s24 = sadd.s32 8, %s2689_s4 }
 0x165   : > { %v3279_v43 = vpop.permute.xlu1 %1193  ;;  %v3281_v52 = vpop.permute.xlu0 %1191  ;;  %v1664_v47 = vrot.slane %v1637_v28, 1  ;;  %v1667_v28 = vrot.slane %v1640_v40, 1  ;;  %v1708_v16 = vmul.f32 %v3111_v9, %v1706_v18  ;;  %v1707_v40 = vmul.f32 %v3114_v1, %v1706_v18  ;;  %s3489_s4 = sld [smem:[#allocation2 + %s2004_s24]] }
 0x166   : > { %4226 = vst [vmem:[#allocation72_spill] sm:$0xff] %v3279_v43  ;;  %4227 = vst [vmem:[#allocation73_spill] sm:$0xff] %v3281_v52  ;;  %s3698_s24 = sld [smem:[#allocation2 + %s2669_s28]] }
 0x167   : > { %1611 = vrot.lane.b32.xlu1 %v1596_v31, %s2478_s20  ;;  %1609 = vrot.lane.b32.xlu0 %v1593_v19, %s2478_s20  ;;  %v1639_v31 = vmul.f32 %v3134_v14, %v1631_v56  ;;  %v1641_v19 = vmul.f32 %v3147_v30, %v1631_v56  ;;  %v1672_v56 = vrot.slane %v1642_v42, 1 }
 0x169   : > { %v3290_v43 = vpop.permute.xlu1 %1197  ;;  %v3292_v52 = vpop.permute.xlu0 %1195  ;;  %v1673_v42 = vsel %vm250_vm0, %v1667_v28, %v1672_v56 }
 0x16a   : > { %4228 = vst [vmem:[#allocation74_spill] sm:$0xff] %v3290_v43  ;;  %4229 = vst [vmem:[#allocation75_spill] sm:$0xff] %v3292_v52  ;;  %v1669_v52 = vrot.slane %v1639_v31, 1  ;;  %v1670_v43 = vrot.slane %v1641_v19, 1 }
 0x16b   : > { %1615 = vrot.lane.b32.xlu1 %v1600_v17, %s2478_s20  ;;  %1613 = vrot.lane.b32.xlu0 %v1598_v32, %s2478_s20  ;;  %v1665_v17 = vsel %vm250_vm0, %v1660_v38, %v1664_v47  ;;  %v1666_v32 = vrot.slane %v1638_v62, 1  ;;  %v1710_v47 = vmul.f32 %v3124_v33, %v1706_v18  ;;  %v1674_v62 = vrot.slane %v1643_v29, 1 }
 0x16c   : > { %v1671_v19 = vsel %vm250_vm0, %v1669_v52, %v1670_v43  ;;  %v1712_v52 = vmul.f32 %v3231_v11, %v1706_v18 }
 0x16d   : > { %v3302_v3 = vpop.permute.xlu1 %1201  ;;  %v3304_v6 = vpop.permute.xlu0 %1199  ;;  %v1668_v38 = vsel %vm250_vm0, %v1666_v32, %v1667_v28  ;;  %v1711_v32 = vmul.f32 %v3238_v48, %v1706_v18  ;;  %v1675_v29 = vsel %vm250_vm0, %v1670_v43, %v1674_v62  ;;  %v1716_v28 = vmul.f32 %v3147_v30, %v1706_v18 }
 0x16e   : > { %4230 = vst [vmem:[#allocation76_spill] sm:$0xff] %v3302_v3  ;;  %4231 = vst [vmem:[#allocation77_spill] sm:$0xff] %v3304_v6  ;;  %v1739_v6 = vrot.slane %v1712_v52, 1  ;;  %v1715_v62 = vmul.f32 %v3150_v51, %v1706_v18 }
 0x16f   : > { %1678 = vrot.lane.b32.xlu1 %v1661_v7, %s2478_s20  ;;  %1676 = vrot.lane.b32.xlu0 %v1658_v55, %s2478_s20  ;;  %v1709_v7 = vmul.f32 %v3086_v54, %v1706_v18 }
 0x171   : > { %v3312_v3 = vpop.permute.xlu1 %1264  ;;  %v3314_v31 = vpop.permute.xlu0 %1262 }
 0x172   : > { %4232 = vst [vmem:[#allocation78_spill] sm:$0xff] %v3312_v3  ;;  %4233 = vst [vmem:[#allocation79_spill] sm:$0xff] %v3314_v31  ;;  %v1731_v31 = vrot.slane %v1707_v40, 1  ;;  %v1732_v3 = vrot.slane %v1709_v7, 1 }
 0x173   : > { %1682 = vrot.lane.b32.xlu1 %v1665_v17, %s2478_s20  ;;  %1680 = vrot.lane.b32.xlu0 %v1663_v39, %s2478_s20  ;;  %v1734_v39 = vrot.slane %v1708_v16, 1  ;;  %v1735_v17 = vrot.slane %v1710_v47, 1  ;;  %v1714_v16 = vmul.f32 %v3134_v14, %v1706_v18  ;;  %v1713_v47 = vmul.f32 %v3137_v34, %v1706_v18 }
 0x174   : > { %v1733_v43 = vsel %vm250_vm0, %v1731_v31, %v1732_v3 }
 0x175   : > { %v3324_v55 = vpop.permute.xlu1 %1268  ;;  %v3326_v5 = vpop.permute.xlu0 %1266  ;;  %v1740_v52 = vsel %vm250_vm0, %v1735_v17, %v1739_v6 }
 0x176   : > { %4234 = vst [vmem:[#allocation80_spill] sm:$0xff] %v3324_v55  ;;  %4235 = vst [vmem:[#allocation81_spill] sm:$0xff] %v3326_v5 }
 0x177   : > { %1686 = vrot.lane.b32.xlu1 %v1671_v19, %s2478_s20  ;;  %1684 = vrot.lane.b32.xlu0 %v1668_v38, %s2478_s20  ;;  %v1736_v19 = vsel %vm250_vm0, %v1734_v39, %v1735_v17  ;;  %v1737_v38 = vrot.slane %v1711_v32, 1  ;;  %v1744_v39 = vrot.slane %v1714_v16, 1  ;;  %v1718_v32 = vmul.f32 %v3260_v57, %v1706_v18 }
 0x179   : > { %v3335_v55 = vpop.permute.xlu1 %1272  ;;  %v3337_v5 = vpop.permute.xlu0 %1270  ;;  %v1738_v31 = vsel %vm250_vm0, %v1732_v3, %v1737_v38  ;;  %v1749_v3 = vrot.slane %v1718_v32, 1 }
 0x17a   : > { %4236 = vst [vmem:[#allocation82_spill] sm:$0xff] %v3335_v55  ;;  %4237 = vst [vmem:[#allocation83_spill] sm:$0xff] %v3337_v5  ;;  %v1741_v5 = vrot.slane %v1713_v47, 1  ;;  %v1742_v55 = vrot.slane %v1715_v62, 1 }
 0x17b   : > { %1690 = vrot.lane.b32.xlu1 %v1675_v29, %s2478_s20  ;;  %1688 = vrot.lane.b32.xlu0 %v1673_v42, %s2478_s20  ;;  %v1717_v29 = vmul.f32 %v3263_v41, %v1706_v18  ;;  %v1745_v42 = vrot.slane %v1716_v28, 1 }
 0x17c   : > { %v1743_v16 = vsel %vm250_vm0, %v1741_v5, %v1742_v55 }
 0x17d   : > { %v1277_v56 = vpop.permute.xlu1 %1276  ;;  %v1275_v40 = vpop.permute.xlu0 %1274  ;;  %v1747_v17 = vrot.slane %v1717_v29, 1  ;;  %v1746_v38 = vsel %vm250_vm0, %v1744_v39, %v1745_v42 }
 0x17e   : > { %v3348_v7 = vsel %vm536_vm2, %v1275_v40, %v1277_v56  ;;  %v1781_v56 = vstv %s1780_s18  ;;  %s236_s18 = sld [smem:[#allocation2 + %s235_s25]]  ;;  %s2099_s25 = scalar_lea.sflag [#allocation4], %s169_s29 }
 0x17f   : > { %1753 = vrot.lane.b32.xlu1 %v1736_v19, %s2478_s20  ;;  %1751 = vrot.lane.b32.xlu0 %v1733_v43, %s2478_s20  ;;  %v1783_v19 = vmul.f32 %v3111_v9, %v1781_v56  ;;  %v1785_v18 = vmul.f32 %v3124_v33, %v1781_v56  ;;  %v1782_v43 = vmul.f32 %v3114_v1, %v1781_v56 }
 0x180   : > { %v1784_v28 = vmul.f32 %v3086_v54, %v1781_v56  ;;  %v1786_v13 = vmul.f32 %v3238_v48, %v1781_v56  ;;  %v1793_v58 = vmul.f32 %v3260_v57, %v1781_v56 }
 0x181   : > { %v1312_v40 = vpop.permute.xlu1 %1311  ;;  %v1310_v10 = vpop.permute.xlu0 %1309  ;;  %v1809_v5 = vrot.slane %v1783_v19, 2  ;;  %v1810_v39 = vrot.slane %v1785_v18, 2  ;;  %v1806_v32 = vrot.slane %v1782_v43, 2 }
 0x182   : > { %v3357_v6 = vsel %vm1325_vm3, %v1310_v10, %v1312_v40  ;;  %v1807_v29 = vrot.slane %v1784_v28, 2  ;;  %v1787_v40 = vmul.f32 %v3231_v11, %v1781_v56 }
 0x183   : > { %1757 = vrot.lane.b32.xlu1 %v1740_v52, %s2478_s20  ;;  %1755 = vrot.lane.b32.xlu0 %v1738_v31, %s2478_s20  ;;  %v1750_v52 = vsel %vm250_vm0, %v1745_v42, %v1749_v3  ;;  %v1748_v31 = vsel %vm250_vm0, %v1742_v55, %v1747_v17  ;;  %v1791_v42 = vmul.f32 %v3147_v30, %v1781_v56 }
 0x184   : > { %v1788_v55 = vmul.f32 %v3137_v34, %v1781_v56  ;;  %v1790_v3 = vmul.f32 %v3150_v51, %v1781_v56  ;;  %v1811_v17 = vsel %vm383_vm1, %v1809_v5, %v1810_v39  ;;  %v1808_v19 = vsel %vm383_vm1, %v1806_v32, %v1807_v29 }
 0x185   : > { %v1316_v10 = vpop.permute.xlu1 %1315  ;;  %v1314_v47 = vpop.permute.xlu0 %1313  ;;  %v1814_v18 = vrot.slane %v1787_v40, 2  ;;  %v1792_v5 = vmul.f32 %v3263_v41, %v1781_v56 }
 0x186   : > { %v3369_v62 = vsel %vm1325_vm3, %v1314_v47, %v1316_v10 }
 0x187   : > { %4238 = vst [vmem:[#allocation84_spill] sm:$0xff] %v3369_v62  ;;  %1761 = vrot.lane.b32.xlu1 %v1746_v38, %s2478_s20  ;;  %1759 = vrot.lane.b32.xlu0 %v1743_v16, %s2478_s20  ;;  %v1789_v38 = vmul.f32 %v3134_v14, %v1781_v56  ;;  %v1812_v16 = vrot.slane %v1786_v13, 2  ;;  %v1815_v32 = vsel %vm383_vm1, %v1810_v39, %v1814_v18  ;;  %v1824_v56 = vrot.slane %v1793_v58, 2 }
 0x189   : > { %v1320_v59 = vpop.permute.xlu1 %1319  ;;  %v1318_v10 = vpop.permute.xlu0 %1317  ;;  %v1813_v13 = vsel %vm383_vm1, %v1807_v29, %v1812_v16 }
 0x18a   : > { %v3379_v47 = vsel %vm1325_vm3, %v1318_v10, %v1320_v59  ;;  %v1819_v10 = vrot.slane %v1789_v38, 2 }
 0x18b   : > { %4239 = vst [vmem:[#allocation85_spill] sm:$0xff] %v3379_v47  ;;  %1765 = vrot.lane.b32.xlu1 %v1750_v52, %s2478_s20  ;;  %1763 = vrot.lane.b32.xlu0 %v1748_v31, %s2478_s20  ;;  %v1820_v47 = vrot.slane %v1791_v42, 2  ;;  %v1816_v52 = vrot.slane %v1788_v55, 2  ;;  %v1817_v31 = vrot.slane %v1790_v3, 2  ;;  %v1822_v3 = vrot.slane %v1792_v5, 2 }
 0x18d   : > { %v1324_v59 = vpop.permute.xlu1 %1323  ;;  %v1322_v43 = vpop.permute.xlu0 %1321  ;;  %v1821_v42 = vsel %vm383_vm1, %v1819_v10, %v1820_v47  ;;  %v1818_v55 = vsel %vm383_vm1, %v1816_v52, %v1817_v31  ;;  %v1825_v58 = vsel %vm383_vm1, %v1820_v47, %v1824_v56  ;;  %v1823_v52 = vsel %vm383_vm1, %v1817_v31, %v1822_v3 }
 0x18e   : > { %v3390_v28 = vsel %vm1325_vm3, %v1322_v43, %v1324_v59  ;;  %v1856_v43 = vstv %s1855_s3  ;;  %s369_s3 = sld [smem:[#allocation2 + %s368_s30]] }
 0x18f   : > { %4240 = vst [vmem:[#allocation86_spill] sm:$0xff] %v3390_v28  ;;  %1828 = vrot.lane.b32.xlu1 %v1811_v17, %s2478_s20  ;;  %1826 = vrot.lane.b32.xlu0 %v1808_v19, %s2478_s20  ;;  %v1858_v39 = vmul.f32 %v3111_v9, %v1856_v43  ;;  %v1860_v29 = vmul.f32 %v3124_v33, %v1856_v43  ;;  %v3446_v28 = vstv %s3419_s6  ;;  %s402_s6 = sadd.s32 6, %s2635_s16 }
 0x190   : > { %v1857_v17 = vmul.f32 %v3114_v1, %v1856_v43  ;;  %v1859_v19 = vmul.f32 %v3086_v54, %v1856_v43  ;;  %v1862_v10 = vmul.f32 %v3231_v11, %v1856_v43  ;;  %v1861_v5 = vmul.f32 %v3238_v48, %v1856_v43  ;;  %s3653_s7 = sld [smem:[#allocation2 + %s402_s6]] }
 0x191   : > { %v1360_v40 = vpop.permute.xlu1 %1359  ;;  %v1358_v59 = vpop.permute.xlu0 %1357  ;;  %v1864_v31 = vmul.f32 %v3134_v14, %v1856_v43 }
 0x192   : > { %v3399_v38 = vsel %vm1325_vm3, %v1358_v59, %v1360_v40  ;;  %v1885_v40 = vrot.slane %v1860_v29, 2  ;;  %v1881_v59 = vrot.slane %v1857_v17, 2  ;;  %v1887_v47 = vrot.slane %v1861_v5, 2 }
 0x193   : > { %4241 = vst [vmem:[#allocation87_spill] sm:$0xff] %v3399_v38  ;;  %1832 = vrot.lane.b32.xlu1 %v1815_v32, %s2478_s20  ;;  %1830 = vrot.lane.b32.xlu0 %v1813_v13, %s2478_s20  ;;  %v1884_v13 = vrot.slane %v1858_v39, 2  ;;  %v1882_v38 = vrot.slane %v1859_v19, 2  ;;  %v1863_v39 = vmul.f32 %v3137_v34, %v1856_v43  ;;  %v1865_v29 = vmul.f32 %v3150_v51, %v1856_v43 }
 0x194   : > { %v1894_v5 = vrot.slane %v1864_v31, 2  ;;  %v1935_v31 = vmul.f32 %v3124_v33, %v3446_v28 }
 0x195   : > { %v1364_v18 = vpop.permute.xlu1 %1363  ;;  %v1362_v16 = vpop.permute.xlu0 %1361  ;;  %v1886_v56 = vsel %vm383_vm1, %v1884_v13, %v1885_v40  ;;  %v1883_v3 = vsel %vm383_vm1, %v1881_v59, %v1882_v38  ;;  %v1868_v59 = vmul.f32 %v3260_v57, %v1856_v43 }
 0x196   : > { %v3411_v32 = vsel %vm1325_vm3, %v1362_v16, %v1364_v18 }
 0x197   : > { %4242 = vst [vmem:[#allocation88_spill] sm:$0xff] %v3411_v32  ;;  %1836 = vrot.lane.b32.xlu1 %v1821_v42, %s2478_s20  ;;  %1834 = vrot.lane.b32.xlu0 %v1818_v55, %s2478_s20  ;;  %v1889_v42 = vrot.slane %v1862_v10, 2  ;;  %v1866_v55 = vmul.f32 %v3147_v30, %v1856_v43 }
 0x199   : > { %v1368_v18 = vpop.permute.xlu1 %1367  ;;  %v1366_v16 = vpop.permute.xlu0 %1365  ;;  %v1895_v13 = vrot.slane %v1866_v55, 2 }
 0x19a   : > { %v3423_v32 = vsel %vm1325_vm3, %v1366_v16, %v1368_v18  ;;  %v1891_v18 = vrot.slane %v1863_v39, 2  ;;  %v1892_v16 = vrot.slane %v1865_v29, 2  ;;  %v1934_v39 = vmul.f32 %v3086_v54, %v3446_v28 }
 0x19b   : > { %4243 = vst [vmem:[#allocation89_spill] sm:$0xff] %v3423_v32  ;;  %1840 = vrot.lane.b32.xlu1 %v1825_v58, %s2478_s20  ;;  %1838 = vrot.lane.b32.xlu0 %v1823_v52, %s2478_s20  ;;  %v1890_v58 = vsel %vm383_vm1, %v1885_v40, %v1889_v42  ;;  %v1888_v52 = vsel %vm383_vm1, %v1882_v38, %v1887_v47  ;;  %v1899_v47 = vrot.slane %v1868_v59, 2  ;;  %v3466_v29 = vstv %s336_s26  ;;  %s201_s26 = sld [smem:[#allocation2 + %s2635_s16]] }
 0x19c   : > { %v1867_v32 = vmul.f32 %v3263_v41, %v1856_v43  ;;  %v1896_v38 = vsel %vm383_vm1, %v1894_v5, %v1895_v13  ;;  %v1933_v43 = vmul.f32 %v3111_v9, %v3446_v28  ;;  %v1893_v55 = vsel %vm383_vm1, %v1891_v18, %v1892_v16  ;;  %4246 = vst [vmem:[#allocation92_spill] sm:$0xff] %v3466_v29 }
 0x19d   : > { %v1372_v17 = vpop.permute.xlu1 %1371  ;;  %v1370_v19 = vpop.permute.xlu0 %1369  ;;  %v343_v5 = vmul.f32 %v3263_v41, %v3466_v29  ;;  %v3481_v18 = vmul.f32 %v3150_v51, %v3466_v29 }
 0x19e   : > { %v3437_v10 = vsel %vm1325_vm3, %v1370_v19, %v1372_v17 }
 0x19f   : > { %4244 = vst [vmem:[#allocation90_spill] sm:$0xff] %v3437_v10  ;;  %1903 = vrot.lane.b32.xlu1 %v1886_v56, %s2478_s20  ;;  %1901 = vrot.lane.b32.xlu0 %v1883_v3, %s2478_s20  ;;  %v1897_v56 = vrot.slane %v1867_v32, 2  ;;  %v1932_v3 = vmul.f32 %v3114_v1, %v3446_v28  ;;  %v1937_v32 = vmul.f32 %v3231_v11, %v3446_v28  ;;  %4249 = vst [vmem:[#allocation95_spill] sm:$0xff] %v3481_v18 }
 0x1a1   : > { %v1407_v17 = vpop.permute.xlu1 %1406  ;;  %v1405_v40 = vpop.permute.xlu0 %1404  ;;  %v1898_v10 = vsel %vm383_vm1, %v1892_v16, %v1897_v56  ;;  %v1956_v37 = vrot.slane %v1932_v3, 2  ;;  %v1939_v3 = vmul.f32 %v3134_v14, %v3446_v28 }
 0x1a2   : > { %v3452_v42 = vsel %vm1325_vm3, %v1405_v40, %v1407_v17  ;;  %v1900_v17 = vsel %vm383_vm1, %v1895_v13, %v1899_v47  ;;  %v1959_v40 = vrot.slane %v1933_v43, 2  ;;  %v358_v13 = vrot.slane %v343_v5, 1 }
 0x1a3   : > { %4245 = vst [vmem:[#allocation91_spill] sm:$0xff] %v3452_v42  ;;  %1907 = vrot.lane.b32.xlu1 %v1890_v58, %s2478_s20  ;;  %1905 = vrot.lane.b32.xlu0 %v1888_v52, %s2478_s20  ;;  %v3470_v52 = vstv %s3434_s8  ;;  %v1960_v42 = vrot.slane %v1935_v31, 2  ;;  %v1964_v43 = vrot.slane %v1937_v32, 2  ;;  %v4160_v31 = vrot.slane %v3481_v18, 1  ;;  %s3668_s8 = sld [smem:[#allocation2 + %s302_s23]] }
 0x1a4   : > { %4247 = vst [vmem:[#allocation93_spill] sm:$0xff] %v3470_v52  ;;  %v476_v47 = vmul.f32 %v3263_v41, %v3470_v52  ;;  %v1940_v32 = vmul.f32 %v3150_v51, %v3446_v28  ;;  %v1942_v18 = vmul.f32 %v3263_v41, %v3446_v28 }
 0x1a5   : > { %v1411_v19 = vpop.permute.xlu1 %1410  ;;  %v1409_v58 = vpop.permute.xlu0 %1408  ;;  %v1961_v56 = vsel %vm383_vm1, %v1959_v40, %v1960_v42  ;;  %v1965_v27 = vsel %vm383_vm1, %v1960_v42, %v1964_v43 }
 0x1a6   : > { %v3475_v59 = vsel %vm1325_vm3, %v1409_v58, %v1411_v19  ;;  %v1957_v19 = vrot.slane %v1934_v39, 2  ;;  %v1936_v58 = vmul.f32 %v3238_v48, %v3446_v28  ;;  %v1941_v39 = vmul.f32 %v3147_v30, %v3446_v28 }
 0x1a7   : > { %4248 = vst [vmem:[#allocation94_spill] sm:$0xff] %v3475_v59  ;;  %1911 = vrot.lane.b32.xlu1 %v1896_v38, %s2478_s20  ;;  %1909 = vrot.lane.b32.xlu0 %v1893_v55, %s2478_s20  ;;  %v3492_v59 = vstv %s3449_s15  ;;  %v3496_v38 = vmul.f32 %v3150_v51, %v3470_v52  ;;  %s435_s15 = sadd.s32 6, %s2669_s28  ;;  %s2240_s28 = sshll.u32 %s169_s29, 7 }
 0x1a8   : > { %4250 = vst [vmem:[#allocation96_spill] sm:$0xff] %v3492_v59  ;;  %v1958_v5 = vsel %vm383_vm1, %v1956_v37, %v1957_v19  ;;  %v1962_v52 = vrot.slane %v1936_v58, 2  ;;  %v491_v37 = vrot.slane %v476_v47, 2  ;;  %v1970_v62 = vrot.slane %v1941_v39, 2 }
 0x1a9   : > { %4251 = vst [vmem:[#allocation97_spill] sm:$0xff] %v3496_v38  ;;  %v1415_v55 = vpop.permute.xlu1 %1414  ;;  %v1413_v29 = vpop.permute.xlu0 %1412  ;;  %v4254_v43 = vrot.slane %v3496_v38, 2 }
 0x1aa   : > { %v3501_v16 = vsel %vm1325_vm3, %v1413_v29, %v1415_v55  ;;  %v1938_v29 = vmul.f32 %v3137_v34, %v3446_v28 }
 0x1ab   : > { %4252 = vst [vmem:[#allocation98_spill] sm:$0xff] %v3501_v16  ;;  %1915 = vrot.lane.b32.xlu1 %v1900_v17, %s2478_s20  ;;  %1913 = vrot.lane.b32.xlu0 %v1898_v10, %s2478_s20  ;;  %v230_v10 = vmul.f32 %v3150_v51, %v3492_v59  ;;  %v359_v16 = vsel %vm250_vm0, %v4160_v31, %v358_v13  ;;  %v1969_v17 = vrot.slane %v1939_v3, 2  ;;  %v1967_v31 = vrot.slane %v1940_v32, 2 }
 0x1ac   : > { %v1943_v59 = vmul.f32 %v3260_v57, %v3446_v28  ;;  %v1963_v13 = vsel %vm383_vm1, %v1957_v19, %v1962_v52  ;;  %v1966_v47 = vrot.slane %v1938_v29, 2  ;;  %v1972_v19 = vrot.slane %v1942_v18, 2 }
 0x1ad   : > { %v1419_v40 = vpop.permute.xlu1 %1418  ;;  %v1417_v55 = vpop.permute.xlu0 %1416  ;;  %v1971_v28 = vsel %vm383_vm1, %v1969_v17, %v1970_v62 }
 0x1ae   : > { %v3523_v58 = vsel %vm1325_vm3, %v1417_v55, %v1419_v40  ;;  %v2006_v40 = vstv %s3489_s4  ;;  %v367_v55 = vadd.f32 %v359_v16, %v230_v10  ;;  %v1974_v52 = vrot.slane %v1943_v59, 2  ;;  %s3854_s4 = scalar_lea.vmem [#allocation7], %s2240_s28 }
 0x1af   : > { %4253 = vst [vmem:[#allocation99_spill] sm:$0xff] %v3523_v58  ;;  %1978 = vrot.lane.b32.xlu1 %v1961_v56, %s2478_s20  ;;  %1976 = vrot.lane.b32.xlu0 %v1958_v5, %s2478_s20  ;;  %v492_v56 = vsel %vm383_vm1, %v4254_v43, %v491_v37  ;;  %v2008_v39 = vmul.f32 %v3111_v9, %v2006_v40 }
 0x1b0   : > { %v1968_v16 = vsel %vm383_vm1, %v1966_v47, %v1967_v31  ;;  %v2010_v5 = vmul.f32 %v3124_v33, %v2006_v40  ;;  %v2007_v29 = vmul.f32 %v3114_v1, %v2006_v40  ;;  %v2009_v32 = vmul.f32 %v3086_v54, %v2006_v40 }
 0x1b1   : > { %v1454_v58 = vpop.permute.xlu1 %1453  ;;  %v1452_v42 = vpop.permute.xlu0 %1451  ;;  %v500_v10 = vadd.f32 %v492_v56, %v367_v55  ;;  %v2012_v9 = vmul.f32 %v3231_v11, %v2006_v40  ;;  %v1975_v1 = vsel %vm383_vm1, %v1970_v62, %v1974_v52  ;;  %v1973_v54 = vsel %vm383_vm1, %v1967_v31, %v1972_v19 }
 0x1b2   : > { %v3538_v3 = vsel %vm1325_vm3, %v1452_v42, %v1454_v58  ;;  %v2034_v33 = vrot.slane %v2008_v39, 2  ;;  %v2011_v18 = vmul.f32 %v3238_v48, %v2006_v40  ;;  %v2031_v17 = vrot.slane %v2007_v29, 2 }
 0x1b3   : > { %4255 = vst [vmem:[#allocation100_spill] sm:$0xff] %v3538_v3  ;;  %1982 = vrot.lane.b32.xlu1 %v1965_v27, %s2478_s20  ;;  %1980 = vrot.lane.b32.xlu0 %v1963_v13, %s2478_s20  ;;  %v681_v27 = vsel %vm536_vm2, %v3012_v50, %v3010_v23  ;;  %v981_v23 = vsel %vm536_vm2, %v3163_v49, %v3161_v0  ;;  %v2035_v50 = vrot.slane %v2010_v5, 2  ;;  %v2032_v13 = vrot.slane %v2009_v32, 2 }
 0x1b4   : > { %v689_v47 = vadd.f32 %v681_v27, %v500_v10  ;;  %v2039_v43 = vrot.slane %v2012_v9, 2  ;;  %v2037_v31 = vrot.slane %v2011_v18, 2  ;;  %v2014_v56 = vmul.f32 %v3134_v14, %v2006_v40 }
 0x1b5   : > { %v1458_v37 = vpop.permute.xlu1 %1457  ;;  %v1456_v58 = vpop.permute.xlu0 %1455  ;;  %v2016_v49 = vmul.f32 %v3147_v30, %v2006_v40  ;;  %v2036_v0 = vsel %vm383_vm1, %v2034_v33, %v2035_v50  ;;  %v2013_v52 = vmul.f32 %v3137_v34, %v2006_v40  ;;  %v2015_v19 = vmul.f32 %v3150_v51, %v2006_v40 }
 0x1b6   : > { %v3552_v59 = vsel %vm1325_vm3, %v1456_v58, %v1458_v37  ;;  %v989_v62 = vadd.f32 %v981_v23, %v689_v47  ;;  %v2040_v32 = vsel %vm383_vm1, %v2035_v50, %v2039_v43  ;;  %v2038_v14 = vsel %vm383_vm1, %v2032_v13, %v2037_v31 }
 0x1b7   : > { %4256 = vst [vmem:[#allocation101_spill] sm:$0xff] %v3552_v59  ;;  %1986 = vrot.lane.b32.xlu1 %v1971_v28, %s2478_s20  ;;  %1984 = vrot.lane.b32.xlu0 %v1968_v16, %s2478_s20  ;;  %v2033_v28 = vsel %vm383_vm1, %v2031_v17, %v2032_v13  ;;  %v2044_v30 = vrot.slane %v2014_v56, 2  ;;  %v2045_v37 = vrot.slane %v2016_v49, 2  ;;  %v2041_v58 = vrot.slane %v2013_v52, 2 }
 0x1b8   : > { %v1289_v39 = vadd.f32 %v3348_v7, %v989_v62  ;;  %v2042_v27 = vrot.slane %v2015_v19, 2  ;;  %v2018_v7 = vmul.f32 %v3260_v57, %v2006_v40  ;;  %v2017_v9 = vmul.f32 %v3263_v41, %v2006_v40 }
 0x1b9   : > { %v1462_v11 = vpop.permute.xlu1 %1461  ;;  %v1460_v55 = vpop.permute.xlu0 %1459  ;;  %v2046_v33 = vsel %vm383_vm1, %v2044_v30, %v2045_v37 }
 0x1ba   : > { %v3564_v42 = vsel %vm1325_vm3, %v1460_v55, %v1462_v11  ;;  %v2043_v18 = vsel %vm383_vm1, %v2041_v58, %v2042_v27  ;;  %v2049_v23 = vrot.slane %v2018_v7, 2  ;;  %v2047_v50 = vrot.slane %v2017_v9, 2 }
 0x1bb   : > { %4257 = vst [vmem:[#allocation102_spill] sm:$0xff] %v3564_v42  ;;  %1990 = vrot.lane.b32.xlu1 %v1975_v1, %s2478_s20  ;;  %1988 = vrot.lane.b32.xlu0 %v1973_v54, %s2478_s20  ;;  %v3650_v42 = vld [vmem:[#allocation6 + $0x40] sm:$0xff] }
 0x1bc   : > { %v2050_v40 = vsel %vm383_vm1, %v2045_v37, %v2049_v23  ;;  %v2048_v13 = vsel %vm383_vm1, %v2042_v27, %v2047_v50 }
 0x1bd   : > { %v1466_v16 = vpop.permute.xlu1 %1465  ;;  %v1464_v5 = vpop.permute.xlu0 %1463 }
 0x1be   : > { %v1470_v29 = vsel %vm1325_vm3, %v1464_v5, %v1466_v16  ;;  %v370_v5 = vstv %s369_s3 }
 0x1bf   : > { %v3577_v10 = vadd.f32 %v1470_v29, %v1289_v39  ;;  %2053 = vrot.lane.b32.xlu1 %v2036_v0, %s2478_s20  ;;  %2051 = vrot.lane.b32.xlu0 %v2033_v28, %s2478_s20  ;;  %v237_v0 = vstv %s236_s18  ;;  %v3626_v39 = vld [vmem:[#allocation6 + $0x10] sm:$0xff]  ;;  %v3630_v29 = vld [vmem:[#allocation6] sm:$0xff]  ;;  %v373_v9 = vmul.f32 %v3238_v48, %v370_v5 }
 0x1c0   : > { %v240_v19 = vmul.f32 %v3238_v48, %v237_v0  ;;  %v239_v16 = vmul.f32 %v3626_v39, %v237_v0  ;;  %v241_v30 = vmul.f32 %v3137_v34, %v237_v0  ;;  %v242_v37 = vmul.f32 %v3150_v51, %v237_v0 }
 0x1c1   : > { %4258 = vst [vmem:[#allocation103_spill] sm:$0xff] %v3577_v10  ;;  %v3584_v1 = vpop.permute.xlu1 %1528  ;;  %v3586_v54 = vpop.permute.xlu0 %1526  ;;  %v371_v50 = vmul.f32 %v3630_v29, %v370_v5  ;;  %v243_v34 = vmul.f32 %v3263_v41, %v237_v0  ;;  %v3647_v10 = vld [vmem:[#allocation6 + $0x30] sm:$0xff] }
 0x1c2   : > { %v254_v7 = vrot.slane %v240_v19, 1  ;;  %v374_v19 = vmul.f32 %v3647_v10, %v370_v5 }
 0x1c3   : > { %2057 = vrot.lane.b32.xlu1 %v2040_v32, %s2478_s20  ;;  %2055 = vrot.lane.b32.xlu0 %v2038_v14, %s2478_s20  ;;  %v238_v32 = vmul.f32 %v3630_v29, %v237_v0  ;;  %v190_v14 = vstv %s189_s5  ;;  %v387_v0 = vrot.slane %v373_v9, 2 }
 0x1c4   : > { %v192_v51 = vmul.f32 %v3626_v39, %v190_v14  ;;  %v191_v3 = vmul.f32 %v3630_v29, %v190_v14 }
 0x1c5   : > { %v3592_v17 = vpop.permute.xlu1 %1532  ;;  %v3594_v57 = vpop.permute.xlu0 %1530  ;;  %v251_v23 = vrot.slane %v238_v32, 1 }
 0x1c6   : > { %4259 = vst [vmem:[#allocation104_spill] sm:$0xff] %v3592_v17  ;;  %4260 = vst [vmem:[#allocation105_spill] sm:$0xff] %v3594_v57  ;;  %v3736_v57 = vstv %s3698_s24 }
 0x1c7   : > { %2061 = vrot.lane.b32.xlu1 %v2046_v33, %s2478_s20  ;;  %2059 = vrot.lane.b32.xlu0 %v2043_v18, %s2478_s20  ;;  %v252_v33 = vrot.slane %v239_v16, 1  ;;  %v372_v18 = vmul.f32 %v3626_v39, %v370_v5  ;;  %v375_v16 = vmul.f32 %v3650_v42, %v370_v5 }
 0x1c9   : > { %v3600_v47 = vpop.permute.xlu1 %1536  ;;  %v3602_v11 = vpop.permute.xlu0 %1534  ;;  %v253_v38 = vsel %vm250_vm0, %v251_v23, %v252_v33  ;;  %v390_v9 = vrot.slane %v375_v16, 2 }
 0x1ca   : > { %4261 = vst [vmem:[#allocation106_spill] sm:$0xff] %v3600_v47  ;;  %4262 = vst [vmem:[#allocation107_spill] sm:$0xff] %v3602_v11  ;;  %v265_v23 = vadd.f32 %v253_v38, %v191_v3  ;;  %v404_v38 = vstv %s3653_s7 }
 0x1cb   : > { %2065 = vrot.lane.b32.xlu1 %v2050_v40, %s2478_s20  ;;  %2063 = vrot.lane.b32.xlu0 %v2048_v13, %s2478_s20  ;;  %s269_s20 = sadd.s32 3, %s2635_s16  ;;  %v256_v40 = vrot.slane %v241_v30, 1  ;;  %v257_v13 = vrot.slane %v242_v37, 1  ;;  %v255_v30 = vsel %vm250_vm0, %v252_v33, %v254_v7  ;;  %v385_v37 = vrot.slane %v372_v18, 2  ;;  %s3681_s16 = sld [smem:[#allocation2 + %s435_s15]] }
 0x1cc   : > { %s3635_s27 = sld [smem:[#allocation2 + %s269_s20]]  ;;  %v266_v33 = vadd.f32 %v255_v30, %v192_v51  ;;  %v410_v11 = vmul.f32 %v3263_v41, %v404_v38 }
 0x1cd   : > { %v3607_v55 = vpop.permute.xlu1 %1540  ;;  %v3609_v43 = vpop.permute.xlu0 %1538 }
 0x1ce   : > { %4263 = vst [vmem:[#allocation108_spill] sm:$0xff] %v3607_v55  ;;  %4264 = vst [vmem:[#allocation109_spill] sm:$0xff] %v3609_v43  ;;  %v425_v17 = vrot.slane %v410_v11, 2 }
 0x1d1   : > { %v3612_v62 = vpop.permute.xlu1 %1603  ;;  %v3614_v31 = vpop.permute.xlu0 %1601 }
 0x1d2   : > { %4265 = vst [vmem:[#allocation110_spill] sm:$0xff] %v3612_v62  ;;  %4266 = vst [vmem:[#allocation111_spill] sm:$0xff] %v3614_v31 }
 0x1d5   : > { %v3617_v56 = vpop.permute.xlu1 %1607  ;;  %v3619_v49 = vpop.permute.xlu0 %1605 }
 0x1d6   : > { %4267 = vst [vmem:[#allocation112_spill] sm:$0xff] %v3617_v56  ;;  %4268 = vst [vmem:[#allocation113_spill] sm:$0xff] %v3619_v49  ;;  %v271_v49 = vstv %s3635_s27 }
 0x1d7   : > { %v272_v56 = vmul.f32 %v3630_v29, %v271_v49  ;;  %v273_v31 = vmul.f32 %v3626_v39, %v271_v49  ;;  %v274_v3 = vmul.f32 %v3238_v48, %v271_v49 }
 0x1d9   : > { %v3621_v28 = vpop.permute.xlu1 %1611  ;;  %v3623_v52 = vpop.permute.xlu0 %1609 }
 0x1da   : > { %4269 = vst [vmem:[#allocation114_spill] sm:$0xff] %v3621_v28  ;;  %4270 = vst [vmem:[#allocation115_spill] sm:$0xff] %v3623_v52  ;;  %v376_v52 = vmul.f32 %v3263_v41, %v370_v5  ;;  %v258_v28 = vsel %vm250_vm0, %v256_v40, %v257_v13  ;;  %v194_v5 = vmul.f32 %v3650_v42, %v190_v14 }
 0x1dd   : > { %v3637_v58 = vpop.permute.xlu1 %1615  ;;  %v3639_v27 = vpop.permute.xlu0 %1613 }
 0x1de   : > { %4271 = vst [vmem:[#allocation116_spill] sm:$0xff] %v3637_v58  ;;  %4272 = vst [vmem:[#allocation117_spill] sm:$0xff] %v3639_v27  ;;  %v384_v27 = vrot.slane %v371_v50, 2  ;;  %v259_v58 = vrot.slane %v243_v34, 1  ;;  %v388_v50 = vsel %vm383_vm1, %v385_v37, %v387_v0 }
 0x1e0   : > { %v386_v34 = vsel %vm383_vm1, %v384_v27, %v385_v37  ;;  %v260_v40 = vsel %vm250_vm0, %v257_v13, %v259_v58  ;;  %v3690_v58 = vadd.f32 %v388_v50, %v266_v33  ;;  %v202_v13 = vstv %s201_s26 }
 0x1e1   : > { %v3655_v32 = vpop.permute.xlu1 %1678  ;;  %v3657_v59 = vpop.permute.xlu0 %1676  ;;  %v284_v37 = vrot.slane %v272_v56, 1  ;;  %v406_v33 = vmul.f32 %v3626_v39, %v404_v38  ;;  %v277_v56 = vmul.f32 %v3263_v41, %v271_v49 }
 0x1e2   : > { %4273 = vst [vmem:[#allocation118_spill] sm:$0xff] %v3655_v32  ;;  %4274 = vst [vmem:[#allocation119_spill] sm:$0xff] %v3657_v59  ;;  %v193_v32 = vmul.f32 %v3647_v10, %v190_v14  ;;  %v389_v59 = vrot.slane %v374_v19, 2  ;;  %v392_v19 = vrot.slane %v376_v52, 2  ;;  %v268_v52 = vadd.f32 %v260_v40, %v194_v5 }
 0x1e3   : > { %v407_v5 = vmul.f32 %v3238_v48, %v404_v38  ;;  %v409_v48 = vmul.f32 %v3650_v42, %v404_v38  ;;  %v292_v55 = vrot.slane %v277_v56, 1 }
 0x1e4   : > { %v267_v16 = vadd.f32 %v258_v28, %v193_v32  ;;  %v391_v51 = vsel %vm383_vm1, %v389_v59, %v390_v9  ;;  %v3692_v28 = vadd.f32 %v386_v34, %v265_v23  ;;  %v393_v27 = vsel %vm383_vm1, %v390_v9, %v392_v19 }
 0x1e5   : > { %v3671_v7 = vpop.permute.xlu1 %1682  ;;  %v3673_v18 = vpop.permute.xlu0 %1680  ;;  %v275_v32 = vmul.f32 %v3647_v10, %v271_v49  ;;  %v276_v59 = vmul.f32 %v3650_v42, %v271_v49  ;;  %v287_v23 = vrot.slane %v274_v3, 1  ;;  %v3706_v9 = vstv %s3668_s8 }
 0x1e6   : > { %4275 = vst [vmem:[#allocation120_spill] sm:$0xff] %v3671_v7  ;;  %4276 = vst [vmem:[#allocation121_spill] sm:$0xff] %v3673_v18  ;;  %v3700_v30 = vadd.f32 %v391_v51, %v267_v16  ;;  %v3712_v40 = vadd.f32 %v393_v27, %v268_v52  ;;  %v203_v19 = vmul.f32 %v3630_v29, %v202_v13  ;;  %v3725_v27 = vstv %s3681_s16 }
 0x1e7   : > { %v204_v16 = vmul.f32 %v3626_v39, %v202_v13  ;;  %v289_v51 = vrot.slane %v275_v32, 1  ;;  %v290_v3 = vrot.slane %v276_v59, 1  ;;  %v306_v52 = vmul.f32 %v3626_v39, %v3706_v9 }
 0x1e8   : > { %4281 = vst [vmem:[#allocation126_spill] sm:$0xff] %v3712_v40  ;;  %v418_v7 = vrot.slane %v406_v33, 2  ;;  %v420_v62 = vrot.slane %v407_v5, 2  ;;  %v423_v40 = vrot.slane %v409_v48, 2  ;;  %v3744_v5 = vld [vmem:[#allocation6 + $0x20] sm:$0xff] }
 0x1e9   : > { %v3686_v14 = vpop.permute.xlu1 %1686  ;;  %v3688_v0 = vpop.permute.xlu0 %1684  ;;  %v291_v47 = vsel %vm250_vm0, %v289_v51, %v290_v3  ;;  %v318_v33 = vrot.slane %v306_v52, 1  ;;  %v206_v51 = vmul.f32 %v3650_v42, %v202_v13 }
 0x1ea   : > { %4277 = vst [vmem:[#allocation122_spill] sm:$0xff] %v3686_v14  ;;  %4278 = vst [vmem:[#allocation123_spill] sm:$0xff] %v3688_v0  ;;  %v285_v14 = vrot.slane %v273_v31, 1  ;;  %v405_v0 = vmul.f32 %v3630_v29, %v404_v38  ;;  %v408_v31 = vmul.f32 %v3647_v10, %v404_v38  ;;  %v421_v52 = vsel %vm383_vm1, %v418_v7, %v420_v62 }
 0x1ec   : > { %v286_v18 = vsel %vm250_vm0, %v284_v37, %v285_v14  ;;  %v288_v49 = vsel %vm250_vm0, %v285_v14, %v287_v23  ;;  %v205_v37 = vmul.f32 %v3647_v10, %v202_v13  ;;  %v422_v43 = vrot.slane %v408_v31, 2 }
 0x1ed   : > { %v3708_v50 = vpop.permute.xlu1 %1690  ;;  %v3710_v34 = vpop.permute.xlu0 %1688  ;;  %v3742_v23 = vmul.f32 %v3626_v39, %v3725_v27  ;;  %v307_v31 = vmul.f32 %v3744_v5, %v3706_v9  ;;  %v298_v41 = vadd.f32 %v286_v18, %v203_v19  ;;  %v299_v56 = vadd.f32 %v288_v49, %v204_v16 }
 0x1ee   : > { %4279 = vst [vmem:[#allocation124_spill] sm:$0xff] %v3708_v50  ;;  %4280 = vst [vmem:[#allocation125_spill] sm:$0xff] %v3710_v34  ;;  %v305_v34 = vmul.f32 %v3630_v29, %v3706_v9  ;;  %v417_v50 = vrot.slane %v405_v0, 2  ;;  %v438_v0 = vmul.f32 %v3630_v29, %v3725_v27  ;;  %v300_v22 = vadd.f32 %v291_v47, %v205_v37 }
 0x1ef   : > { %v424_v18 = vsel %vm383_vm1, %v422_v43, %v423_v40  ;;  %v451_v16 = vrot.slane %v3742_v23, 2  ;;  %v320_v49 = vrot.slane %v307_v31, 1  ;;  %v3770_v47 = vadd.f32 %v421_v52, %v299_v56 }
 0x1f0   : > { %v317_v14 = vrot.slane %v305_v34, 1  ;;  %v419_v38 = vsel %vm383_vm1, %v417_v50, %v418_v7  ;;  %v537_v34 = vsel %vm536_vm2, %v2843_v15, %v2856_v26  ;;  %v215_v50 = vmul.f32 %v3630_v29, %v3736_v57 }
 0x1f1   : > { %v3728_v32 = vpop.permute.xlu1 %1753  ;;  %v3730_v59 = vpop.permute.xlu0 %1751  ;;  %v450_v13 = vrot.slane %v438_v0, 2  ;;  %v753_v15 = vsel %vm536_vm2, %v3023_v60, %v3021_v44  ;;  %v545_v26 = vadd.f32 %v537_v34, %v3692_v28  ;;  %v538_v7 = vsel %vm536_vm2, %v2841_v12, %v2854_v25 }
 0x1f2   : > { %4282 = vst [vmem:[#allocation127_spill] sm:$0xff] %v3728_v32  ;;  %4283 = vst [vmem:[#allocation128_spill] sm:$0xff] %v3730_v59  ;;  %v293_v32 = vsel %vm250_vm0, %v290_v3, %v292_v55  ;;  %v319_v19 = vsel %vm250_vm0, %v317_v14, %v318_v33  ;;  %v3768_v55 = vadd.f32 %v419_v38, %v298_v41 }
 0x1f3   : > { %v301_v11 = vadd.f32 %v293_v32, %v206_v51  ;;  %v426_v3 = vsel %vm383_vm1, %v423_v40, %v425_v17  ;;  %v440_v60 = vmul.f32 %v3744_v5, %v3725_v27  ;;  %v1053_v44 = vsel %vm536_vm2, %v3171_v2, %v3169_v63 }
 0x1f4   : > { %v3785_v28 = vadd.f32 %v424_v18, %v300_v22  ;;  %v331_v32 = vadd.f32 %v319_v19, %v215_v50  ;;  %v216_v37 = vmul.f32 %v3626_v39, %v3736_v57  ;;  %v761_v0 = vadd.f32 %v753_v15, %v545_v26  ;;  %v4284_v19 = vld [vmem:[#allocation59_spill] sm:$0xff]  ;;  %v4285_v15 = vld [vmem:[#allocation104_spill] sm:$0xff]  ;;  %v4286_v26 = vld [vmem:[#allocation105_spill] sm:$0xff] }
 0x1f5   : > { %v3750_v48 = vpop.permute.xlu1 %1757  ;;  %v3752_v59 = vpop.permute.xlu0 %1755  ;;  %v452_v12 = vsel %vm383_vm1, %v450_v13, %v451_v16  ;;  %v321_v25 = vsel %vm250_vm0, %v318_v33, %v320_v49  ;;  %v308_v17 = vmul.f32 %v3647_v10, %v3706_v9  ;;  %v754_v22 = vsel %vm536_vm2, %v3031_v53, %v3029_v61 }
 0x1f6   : > { %v546_v63 = vadd.f32 %v538_v7, %v3690_v58  ;;  %v3799_v2 = vadd.f32 %v426_v3, %v301_v11  ;;  %v3803_v40 = vmul.f32 %v3650_v42, %v3706_v9  ;;  %v1061_v14 = vadd.f32 %v1053_v44, %v761_v0  ;;  %v4287_v7 = vld [vmem:[#allocation84_spill] sm:$0xff] }
 0x1f7   : > { %v539_v41 = vsel %vm536_vm2, %v2866_v36, %v2864_v35  ;;  %v453_v38 = vrot.slane %v440_v60, 2  ;;  %v1054_v61 = vsel %vm536_vm2, %v3183_v8, %v3181_v4  ;;  %v1542_v53 = vsel %vm1325_vm3, %v3586_v54, %v3584_v1 }
 0x1f8   : > { %v3818_v58 = vadd.f32 %v452_v12, %v331_v32  ;;  %v332_v56 = vadd.f32 %v321_v25, %v216_v37  ;;  %v762_v51 = vadd.f32 %v754_v22, %v546_v63  ;;  %v1334_v34 = vadd.f32 %v3357_v6, %v1061_v14  ;;  %v4289_v37 = vld [vmem:[#allocation36_spill] sm:$0xff]  ;;  %v4290_v12 = vld [vmem:[#allocation126_spill] sm:$0xff] }
 0x1f9   : > { %v3772_v43 = vpop.permute.xlu1 %1761  ;;  %v3774_v62 = vpop.permute.xlu0 %1759  ;;  %v322_v52 = vrot.slane %v308_v17, 1  ;;  %v441_v35 = vmul.f32 %v3647_v10, %v3725_v27  ;;  %v3827_v36 = vmul.f32 %v3650_v42, %v3725_v27  ;;  %v755_v8 = vsel %vm536_vm2, %v3039_v21, %v3037_v20 }
 0x1fa   : > { %v547_v4 = vadd.f32 %v539_v41, %v3700_v30  ;;  %v323_v1 = vrot.slane %v3803_v40, 1  ;;  %v1062_v54 = vadd.f32 %v1054_v61, %v762_v51  ;;  %v1550_v6 = vadd.f32 %v1542_v53, %v1334_v34  ;;  %v4291_v41 = vld [vmem:[#allocation13_spill] sm:$0xff]  ;;  %v4292_v61 = vld [vmem:[#allocation14_spill] sm:$0xff]  ;;  %v4293_v53 = vld [vmem:[#allocation60_spill] sm:$0xff] }
 0x1fb   : > { %v540_v13 = vsel %vm536_vm2, %v2878_v46, %v2876_v45  ;;  %v1055_v49 = vsel %vm536_vm2, %v4284_v19, %v3192_v24  ;;  %v1543_v20 = vsel %vm1325_vm3, %v4286_v26, %v4285_v15  ;;  %v217_v30 = vmul.f32 %v3647_v10, %v3736_v57  ;;  %v2371_v46 = vld [vmem:[#allocation6 + $0x50] sm:$0xff]  ;;  %v4294_v51 = vld [vmem:[#allocation61_spill] sm:$0xff]  ;;  %v4299_v26 = vld [vmem:[#allocation38_spill] sm:$0xff] }
 0x1fc   : > { %v763_v11 = vadd.f32 %v755_v8, %v547_v4  ;;  %v1335_v3 = vadd.f32 %v4287_v7, %v1062_v54  ;;  %v455_v44 = vrot.slane %v441_v35, 2  ;;  %v456_v45 = vrot.slane %v3827_v36, 2  ;;  %v4288_v24 = vld [vmem:[#allocation35_spill] sm:$0xff]  ;;  %v4295_v35 = vld [vmem:[#allocation106_spill] sm:$0xff]  ;;  %v4298_v15 = vld [vmem:[#allocation37_spill] sm:$0xff] }
 0x1fd   : > { %v3805_v31 = vpop.permute.xlu1 %1765  ;;  %v3807_v33 = vpop.permute.xlu0 %1763  ;;  %v310_v32 = vmul.f32 %v2371_v46, %v3706_v9  ;;  %v756_v0 = vsel %vm536_vm2, %v4289_v37, %v4288_v24  ;;  %v548_v25 = vadd.f32 %v540_v13, %v4290_v12  ;;  %v324_v17 = vsel %vm250_vm0, %v322_v52, %v323_v1  ;;  %v4296_v36 = vld [vmem:[#allocation107_spill] sm:$0xff]  ;;  %v4302_v24 = vld [vmem:[#allocation62_spill] sm:$0xff]  ;;  %v4305_v37 = vld [vmem:[#allocation109_spill] sm:$0xff] }
 0x1fe   : > { %v1063_v22 = vadd.f32 %v1055_v49, %v763_v11  ;;  %v1551_v63 = vadd.f32 %v1543_v20, %v1335_v3  ;;  %v584_v9 = vsel %vm536_vm2, %v4292_v61, %v4291_v41  ;;  %v1056_v34 = vsel %vm536_vm2, %v4294_v51, %v4293_v53  ;;  %v4300_v3 = vld [vmem:[#allocation15_spill] sm:$0xff]  ;;  %v4308_v61 = vld [vmem:[#allocation40_spill] sm:$0xff] }
 0x1ff   : > { %v1544_v52 = vsel %vm1325_vm3, %v4296_v36, %v4295_v35  ;;  %v454_v4 = vsel %vm383_vm1, %v451_v16, %v453_v38  ;;  %v764_v54 = vadd.f32 %v756_v0, %v548_v25  ;;  %v333_v13 = vadd.f32 %v324_v17, %v217_v30  ;;  %v4306_v25 = vld [vmem:[#allocation86_spill] sm:$0xff]  ;;  %v4307_v41 = vld [vmem:[#allocation39_spill] sm:$0xff] }
 0x200   : > { %v457_v19 = vsel %vm383_vm1, %v455_v44, %v456_v45  ;;  %v443_v49 = vmul.f32 %v2371_v46, %v3725_v27  ;;  %v828_v20 = vsel %vm536_vm2, %v4299_v26, %v4298_v15  ;;  %v325_v11 = vrot.slane %v310_v32, 1  ;;  %v4303_v44 = vld [vmem:[#allocation63_spill] sm:$0xff]  ;;  %v4304_v46 = vld [vmem:[#allocation108_spill] sm:$0xff] }
 0x201   : > { %v1829_v18 = vpop.permute.xlu1 %1828  ;;  %v1827_v50 = vpop.permute.xlu0 %1826  ;;  %v1064_v7 = vadd.f32 %v1056_v34, %v764_v54  ;;  %v1128_v27 = vsel %vm536_vm2, %v4303_v44, %v4302_v24  ;;  %v1545_v0 = vsel %vm1325_vm3, %v4305_v37, %v4304_v46  ;;  %v3888_v32 = vadd.f32 %v454_v4, %v332_v56  ;;  %v4311_v54 = vld [vmem:[#allocation64_spill] sm:$0xff]  ;;  %v4320_v46 = vld [vmem:[#allocation19_spill] sm:$0xff] }
 0x202   : > { %v1842_v21 = vsel %vm1325_vm3, %v1827_v50, %v1829_v18  ;;  %v326_v51 = vsel %vm250_vm0, %v323_v1, %v325_v11  ;;  %v4317_v11 = vld [vmem:[#allocation92_spill] sm:$0xff] }
 0x203   : > { %v1850_v60 = vadd.f32 %v1842_v21, %v1550_v6  ;;  %v4297_v6 = vld [vmem:[#allocation85_spill] sm:$0xff]  ;;  %v592_v21 = vadd.f32 %v584_v9, %v3768_v55  ;;  %v1337_v17 = vadd.f32 %v4306_v25, %v1064_v7  ;;  %v829_v9 = vsel %vm536_vm2, %v4308_v61, %v4307_v41  ;;  %v4324_v25 = vld [vmem:[#allocation112_spill] sm:$0xff] }
 0x204   : > { %v1336_v18 = vadd.f32 %v4297_v6, %v1063_v22  ;;  %v4313_v6 = vld [vmem:[#allocation110_spill] sm:$0xff]  ;;  %v338_v7 = vmul.f32 %v3630_v29, %v4317_v11  ;;  %v4327_v61 = vld [vmem:[#allocation88_spill] sm:$0xff] }
 0x205   : > { %2079 = vst [vmem:[%s3854_s4] sm:$0xff] %v1850_v60  ;;  %v1833_v40 = vpop.permute.xlu1 %1832  ;;  %v1831_v14 = vpop.permute.xlu0 %1830  ;;  %v4301_v60 = vld [vmem:[#allocation16_spill] sm:$0xff]  ;;  %v836_v12 = vadd.f32 %v828_v20, %v592_v21  ;;  %v1553_v34 = vadd.f32 %v1545_v0, %v1337_v17  ;;  %v4322_v0 = vld [vmem:[#allocation66_spill] sm:$0xff] }
 0x206   : > { %v1843_v8 = vsel %vm1325_vm3, %v1831_v14, %v1833_v40  ;;  %v1552_v23 = vadd.f32 %v1544_v52, %v1336_v18  ;;  %v585_v30 = vsel %vm536_vm2, %v4301_v60, %v4300_v3  ;;  %v218_v40 = vmul.f32 %v3650_v42, %v3736_v57  ;;  %v4309_v52 = vld [vmem:[#allocation17_spill] sm:$0xff]  ;;  %v4314_v18 = vld [vmem:[#allocation111_spill] sm:$0xff] }
 0x207   : > { %v1851_v50 = vadd.f32 %v1843_v8, %v1551_v63  ;;  %v3891_v63 = vadd.f32 %v457_v19, %v333_v13  ;;  %v458_v14 = vrot.slane %v443_v49, 2  ;;  %v593_v53 = vadd.f32 %v585_v30, %v3770_v47  ;;  %v4310_v8 = vld [vmem:[#allocation18_spill] sm:$0xff]  ;;  %v4312_v42 = vld [vmem:[#allocation65_spill] sm:$0xff]  ;;  %v4316_v49 = vld [vmem:[#allocation87_spill] sm:$0xff] }
 0x208   : > { %v1136_v56 = vadd.f32 %v1128_v27, %v836_v12  ;;  %v586_v4 = vsel %vm536_vm2, %v4310_v8, %v4309_v52  ;;  %v1129_v57 = vsel %vm536_vm2, %v4312_v42, %v4311_v54  ;;  %v1617_v47 = vsel %vm1325_vm3, %v4314_v18, %v4313_v6  ;;  %v4330_v6 = vld [vmem:[#allocation21_spill] sm:$0xff]  ;;  %v4331_v18 = vld [vmem:[#allocation22_spill] sm:$0xff] }
 0x209   : > { %2080 = vst [vmem:[%s3854_s4 + $0x8] sm:$0xff] %v1851_v50  ;;  %v1837_v16 = vpop.permute.xlu1 %1836  ;;  %v1835_v38 = vpop.permute.xlu0 %1834  ;;  %v4315_v50 = vld [vmem:[#allocation96_spill] sm:$0xff]  ;;  %v837_v19 = vadd.f32 %v829_v9, %v593_v53  ;;  %v334_v20 = vadd.f32 %v326_v51, %v218_v40  ;;  %v459_v21 = vsel %vm383_vm1, %v456_v45, %v458_v14  ;;  %v594_v3 = vadd.f32 %v586_v4, %v3785_v28  ;;  %v4325_v28 = vld [vmem:[#allocation113_spill] sm:$0xff] }
 0x20a   : > { %v1844_v55 = vsel %vm1325_vm3, %v1835_v38, %v1837_v16  ;;  %v227_v13 = vmul.f32 %v3630_v29, %v4315_v50  ;;  %v1381_v15 = vadd.f32 %v4316_v49, %v1136_v56  ;;  %v4319_v16 = vld [vmem:[#allocation42_spill] sm:$0xff]  ;;  %v3923_v60 = vmul.f32 %v3626_v39, %v4317_v11  ;;  %v4321_v45 = vld [vmem:[#allocation20_spill] sm:$0xff]  ;;  %v4326_v40 = vld [vmem:[#allocation93_spill] sm:$0xff] }
 0x20b   : > { %v1852_v22 = vadd.f32 %v1844_v55, %v1552_v23  ;;  %v4318_v23 = vld [vmem:[#allocation41_spill] sm:$0xff]  ;;  %v1137_v30 = vadd.f32 %v1129_v57, %v837_v19  ;;  %v587_v37 = vsel %vm536_vm2, %v4321_v45, %v4320_v46  ;;  %v4323_v55 = vld [vmem:[#allocation67_spill] sm:$0xff]  ;;  %v1618_v17 = vsel %vm1325_vm3, %v4325_v28, %v4324_v25  ;;  %v4340_v28 = vld [vmem:[#allocation24_spill] sm:$0xff] }
 0x20c   : > { %v830_v38 = vsel %vm536_vm2, %v4319_v16, %v4318_v23  ;;  %v1625_v24 = vadd.f32 %v1617_v47, %v1381_v15  ;;  %v1130_v12 = vsel %vm536_vm2, %v4323_v55, %v4322_v0  ;;  %v471_v14 = vmul.f32 %v3630_v29, %v4326_v40  ;;  %v4333_v19 = vld [vmem:[#allocation69_spill] sm:$0xff]  ;;  %v4334_v15 = vld [vmem:[#allocation114_spill] sm:$0xff]  ;;  %v4339_v25 = vld [vmem:[#allocation23_spill] sm:$0xff] }
 0x20d   : > { %2081 = vst [vmem:[%s3854_s4 + $0x40] sm:$0xff] %v1852_v22  ;;  %v1841_v35 = vpop.permute.xlu1 %1840  ;;  %v1839_v36 = vpop.permute.xlu0 %1838  ;;  %v838_v41 = vadd.f32 %v830_v38, %v594_v3  ;;  %v1382_v9 = vadd.f32 %v4327_v61, %v1137_v30  ;;  %v3939_v51 = vadd.f32 %v459_v21, %v334_v20  ;;  %v350_v56 = vrot.slane %v338_v7, 1  ;;  %v4336_v23 = vld [vmem:[#allocation89_spill] sm:$0xff] }
 0x20e   : > { %v1845_v1 = vsel %vm1325_vm3, %v1839_v36, %v1841_v35  ;;  %v4328_v35 = vld [vmem:[#allocation43_spill] sm:$0xff]  ;;  %v4329_v36 = vld [vmem:[#allocation44_spill] sm:$0xff]  ;;  %v595_v8 = vadd.f32 %v587_v37, %v3799_v2  ;;  %v351_v4 = vrot.slane %v3923_v60, 1  ;;  %v631_v47 = vsel %vm536_vm2, %v4331_v18, %v4330_v6  ;;  %v4344_v61 = vld [vmem:[#allocation117_spill] sm:$0xff] }
 0x20f   : > { %v1853_v26 = vadd.f32 %v1845_v1, %v1553_v34  ;;  %v3943_v34 = vmul.f32 %v3626_v39, %v4326_v40  ;;  %v831_v52 = vsel %vm536_vm2, %v4329_v36, %v4328_v35  ;;  %v1138_v29 = vadd.f32 %v1130_v12, %v838_v41  ;;  %v4332_v1 = vld [vmem:[#allocation68_spill] sm:$0xff] }
 0x210   : > { %v1626_v54 = vadd.f32 %v1618_v17, %v1382_v9  ;;  %v1131_v49 = vsel %vm536_vm2, %v4333_v19, %v4332_v1  ;;  %v483_v21 = vrot.slane %v471_v14, 2  ;;  %v839_v7 = vadd.f32 %v831_v52, %v595_v8  ;;  %v4341_v17 = vld [vmem:[#allocation70_spill] sm:$0xff]  ;;  %v4343_v41 = vld [vmem:[#allocation116_spill] sm:$0xff] }
 0x211   : > { %2082 = vst [vmem:[%s3854_s4 + $0x48] sm:$0xff] %v1853_v26  ;;  %v1904_v44 = vpop.permute.xlu1 %1903  ;;  %v1902_v27 = vpop.permute.xlu0 %1901  ;;  %v4335_v26 = vld [vmem:[#allocation115_spill] sm:$0xff]  ;;  %v1383_v16 = vadd.f32 %v4336_v23, %v1138_v29  ;;  %v484_v3 = vrot.slane %v3943_v34, 2  ;;  %v228_v60 = vmul.f32 %v3626_v39, %v4315_v50  ;;  %v340_v30 = vmul.f32 %v3744_v5, %v4317_v11  ;;  %v4345_v34 = vld [vmem:[#allocation90_spill] sm:$0xff] }
 0x212   : > { %v1917_v22 = vsel %vm1325_vm3, %v1902_v27, %v1904_v44  ;;  %v1619_v2 = vsel %vm1325_vm3, %v4335_v26, %v4334_v15  ;;  %v4338_v44 = vld [vmem:[#allocation46_spill] sm:$0xff]  ;;  %v639_v46 = vadd.f32 %v631_v47, %v3818_v58  ;;  %v352_v45 = vsel %vm250_vm0, %v350_v56, %v351_v4  ;;  %v4350_v26 = vld [vmem:[#allocation72_spill] sm:$0xff] }
 0x213   : > { %v1925_v53 = vadd.f32 %v1917_v22, %v1625_v24  ;;  %v4337_v24 = vld [vmem:[#allocation45_spill] sm:$0xff]  ;;  %v1139_v37 = vadd.f32 %v1131_v49, %v839_v7  ;;  %v1627_v0 = vadd.f32 %v1619_v2, %v1383_v16  ;;  %v632_v39 = vsel %vm536_vm2, %v4340_v28, %v4339_v25  ;;  %v4342_v22 = vld [vmem:[#allocation71_spill] sm:$0xff]  ;;  %v4349_v15 = vld [vmem:[#allocation26_spill] sm:$0xff] }
 0x214   : > { %v903_v27 = vsel %vm536_vm2, %v4338_v44, %v4337_v24  ;;  %v1203_v14 = vsel %vm536_vm2, %v4342_v22, %v4341_v17  ;;  %v1620_v58 = vsel %vm1325_vm3, %v4344_v61, %v4343_v41  ;;  %v364_v52 = vadd.f32 %v352_v45, %v227_v13  ;;  %v4348_v49 = vld [vmem:[#allocation25_spill] sm:$0xff]  ;;  %v4353_v7 = vld [vmem:[#allocation119_spill] sm:$0xff] }
 0x215   : > { %2242 = vst [vmem:[%s3854_s4 + $0x10] sm:$0xff] %v1925_v53  ;;  %v1908_v42 = vpop.permute.xlu1 %1907  ;;  %v1906_v57 = vpop.permute.xlu0 %1905  ;;  %v473_v53 = vmul.f32 %v3744_v5, %v4326_v40  ;;  %v911_v56 = vadd.f32 %v903_v27, %v639_v46  ;;  %v1384_v35 = vadd.f32 %v4345_v34, %v1139_v37  ;;  %v485_v8 = vsel %vm383_vm1, %v483_v21, %v484_v3  ;;  %v4351_v2 = vld [vmem:[#allocation73_spill] sm:$0xff]  ;;  %v4352_v21 = vld [vmem:[#allocation118_spill] sm:$0xff]  ;;  %v4357_v22 = vld [vmem:[#allocation27_spill] sm:$0xff] }
 0x216   : > { %v1918_v20 = vsel %vm1325_vm3, %v1906_v57, %v1908_v42  ;;  %v353_v29 = vrot.slane %v340_v30, 1  ;;  %v4347_v42 = vld [vmem:[#allocation48_spill] sm:$0xff]  ;;  %v640_v6 = vadd.f32 %v632_v39, %v3888_v32  ;;  %v341_v18 = vmul.f32 %v3647_v10, %v4317_v11  ;;  %v4355_v45 = vld [vmem:[#allocation49_spill] sm:$0xff]  ;;  %v4356_v37 = vld [vmem:[#allocation50_spill] sm:$0xff] }
 0x217   : > { %v1926_v38 = vadd.f32 %v1918_v20, %v1626_v54  ;;  %v4346_v54 = vld [vmem:[#allocation47_spill] sm:$0xff]  ;;  %v1211_v47 = vadd.f32 %v1203_v14, %v911_v56  ;;  %v1628_v1 = vadd.f32 %v1620_v58, %v1384_v35  ;;  %v633_v13 = vsel %vm536_vm2, %v4349_v15, %v4348_v49  ;;  %v4358_v14 = vld [vmem:[#allocation28_spill] sm:$0xff]  ;;  %v4363_v35 = vld [vmem:[#allocation94_spill] sm:$0xff] }
 0x218   : > { %v904_v57 = vsel %vm536_vm2, %v4347_v42, %v4346_v54  ;;  %v1204_v20 = vsel %vm536_vm2, %v4351_v2, %v4350_v26  ;;  %v1692_v32 = vsel %vm1325_vm3, %v4353_v7, %v4352_v21  ;;  %v486_v23 = vrot.slane %v473_v53, 2  ;;  %v4360_v61 = vld [vmem:[#allocation75_spill] sm:$0xff]  ;;  %v4361_v58 = vld [vmem:[#allocation120_spill] sm:$0xff]  ;;  %v4368_v15 = vld [vmem:[#allocation29_spill] sm:$0xff] }
 0x219   : > { %2243 = vst [vmem:[%s3854_s4 + $0x18] sm:$0xff] %v1926_v38  ;;  %v1912_v55 = vpop.permute.xlu1 %1911  ;;  %v1910_v12 = vpop.permute.xlu0 %1909  ;;  %v912_v16 = vadd.f32 %v904_v57, %v640_v6  ;;  %v4354_v38 = vld [vmem:[#allocation91_spill] sm:$0xff]  ;;  %v497_v44 = vadd.f32 %v485_v8, %v364_v52  ;;  %v354_v27 = vsel %vm250_vm0, %v351_v4, %v353_v29  ;;  %v474_v46 = vmul.f32 %v3647_v10, %v4326_v40  ;;  %v4359_v4 = vld [vmem:[#allocation74_spill] sm:$0xff]  ;;  %v4365_v57 = vld [vmem:[#allocation52_spill] sm:$0xff] }
 0x21a   : > { %v1919_v9 = vsel %vm1325_vm3, %v1910_v12, %v1912_v55  ;;  %v1428_v30 = vadd.f32 %v4354_v38, %v1211_v47  ;;  %v641_v55 = vadd.f32 %v633_v13, %v3891_v63  ;;  %v355_v12 = vrot.slane %v341_v18, 1  ;;  %v4364_v42 = vld [vmem:[#allocation51_spill] sm:$0xff]  ;;  %v4369_v13 = vld [vmem:[#allocation30_spill] sm:$0xff]  ;;  %v4371_v26 = vld [vmem:[#allocation77_spill] sm:$0xff] }
 0x21b   : > { %v1927_v36 = vadd.f32 %v1919_v9, %v1627_v0  ;;  %v905_v0 = vsel %vm536_vm2, %v4356_v37, %v4355_v45  ;;  %v1212_v25 = vadd.f32 %v1204_v20, %v912_v16  ;;  %v634_v41 = vsel %vm536_vm2, %v4358_v14, %v4357_v22  ;;  %v4362_v9 = vld [vmem:[#allocation121_spill] sm:$0xff]  ;;  %v4366_v47 = vld [vmem:[#allocation95_spill] sm:$0xff]  ;;  %v4372_v20 = vld [vmem:[#allocation122_spill] sm:$0xff] }
 0x21c   : > { %v1700_v28 = vadd.f32 %v1692_v32, %v1428_v30  ;;  %v1205_v40 = vsel %vm536_vm2, %v4360_v61, %v4359_v4  ;;  %v1693_v53 = vsel %vm1325_vm3, %v4362_v9, %v4361_v58  ;;  %v487_v56 = vsel %vm383_vm1, %v484_v3, %v486_v23  ;;  %v4377_v37 = vld [vmem:[#allocation97_spill] sm:$0xff]  ;;  %v4380_v22 = vld [vmem:[#allocation32_spill] sm:$0xff]  ;;  %v4382_v4 = vld [vmem:[#allocation79_spill] sm:$0xff] }
 0x21d   : > { %2244 = vst [vmem:[%s3854_s4 + $0x50] sm:$0xff] %v1927_v36  ;;  %v1916_v5 = vpop.permute.xlu1 %1915  ;;  %v1914_v19 = vpop.permute.xlu0 %1913  ;;  %v913_v34 = vadd.f32 %v905_v0, %v641_v55  ;;  %v1429_v36 = vadd.f32 %v4363_v35, %v1212_v25  ;;  %v365_v8 = vadd.f32 %v354_v27, %v228_v60  ;;  %v229_v29 = vmul.f32 %v3647_v10, %v4315_v50  ;;  %v4370_v50 = vld [vmem:[#allocation76_spill] sm:$0xff]  ;;  %v4376_v27 = vld [vmem:[#allocation54_spill] sm:$0xff]  ;;  %v4386_v35 = vld [vmem:[#allocation55_spill] sm:$0xff] }
 0x21e   : > { %v1920_v11 = vsel %vm1325_vm3, %v1914_v19, %v1916_v5  ;;  %v488_v54 = vrot.slane %v474_v46, 2  ;;  %v906_v6 = vsel %vm536_vm2, %v4365_v57, %v4364_v42  ;;  %v642_v18 = vadd.f32 %v634_v41, %v3939_v51  ;;  %v4373_v51 = vld [vmem:[#allocation123_spill] sm:$0xff]  ;;  %v4381_v41 = vld [vmem:[#allocation78_spill] sm:$0xff] }
 0x21f   : > { %v1928_v24 = vadd.f32 %v1920_v11, %v1628_v1  ;;  %v4367_v1 = vrot.slane %v4366_v47, 1  ;;  %v1213_v3 = vadd.f32 %v1205_v40, %v913_v34  ;;  %v1701_v19 = vadd.f32 %v1693_v53, %v1429_v36  ;;  %v4374_v11 = vld [vmem:[#allocation98_spill] sm:$0xff]  ;;  %v4383_v40 = vld [vmem:[#allocation124_spill] sm:$0xff] }
 0x220   : > { %v678_v10 = vsel %vm536_vm2, %v4369_v13, %v4368_v15  ;;  %v1206_v2 = vsel %vm536_vm2, %v4371_v26, %v4370_v50  ;;  %v1694_v21 = vsel %vm1325_vm3, %v4373_v51, %v4372_v20  ;;  %v914_v32 = vadd.f32 %v906_v6, %v642_v18  ;;  %v4387_v36 = vld [vmem:[#allocation56_spill] sm:$0xff]  ;;  %v4388_v18 = vld [vmem:[#allocation33_spill] sm:$0xff]  ;;  %v4389_v47 = vld [vmem:[#allocation34_spill] sm:$0xff] }
 0x221   : > { %2245 = vst [vmem:[%s3854_s4 + $0x58] sm:$0xff] %v1928_v24  ;;  %v1979_v39 = vpop.permute.xlu1 %1978  ;;  %v1977_v17 = vpop.permute.xlu0 %1976  ;;  %v357_v5 = vsel %vm250_vm0, %v355_v12, %v4367_v1  ;;  %v1430_v23 = vadd.f32 %v4374_v11, %v1213_v3  ;;  %v498_v38 = vadd.f32 %v487_v56, %v365_v8  ;;  %v4375_v24 = vld [vmem:[#allocation53_spill] sm:$0xff]  ;;  %v686_v45 = vadd.f32 %v678_v10, %v497_v44  ;;  %v4394_v50 = vld [vmem:[#allocation100_spill] sm:$0xff]  ;;  %v4396_v51 = vld [vmem:[#allocation58_spill] sm:$0xff] }
 0x222   : > { %v1992_v63 = vsel %vm1325_vm3, %v1977_v17, %v1979_v39  ;;  %v366_v30 = vadd.f32 %v357_v5, %v229_v29  ;;  %v978_v46 = vsel %vm536_vm2, %v4376_v27, %v4375_v24  ;;  %v4378_v0 = vrot.slane %v4377_v37, 2  ;;  %v4379_v17 = vld [vmem:[#allocation31_spill] sm:$0xff]  ;;  %v4384_v44 = vld [vmem:[#allocation125_spill] sm:$0xff]  ;;  %v4390_v5 = vld [vmem:[#allocation80_spill] sm:$0xff] }
 0x223   : > { %v2000_v52 = vadd.f32 %v1992_v63, %v1700_v28  ;;  %v1214_v12 = vadd.f32 %v1206_v2, %v914_v32  ;;  %v1702_v25 = vadd.f32 %v1694_v21, %v1430_v23  ;;  %v679_v14 = vsel %vm536_vm2, %v4380_v22, %v4379_v17  ;;  %v4385_v63 = vld [vmem:[#allocation99_spill] sm:$0xff]  ;;  %v4391_v3 = vld [vmem:[#allocation81_spill] sm:$0xff] }
 0x224   : > { %v490_v55 = vsel %vm383_vm1, %v488_v54, %v4378_v0  ;;  %v1278_v61 = vsel %vm536_vm2, %v4382_v4, %v4381_v41  ;;  %v1695_v58 = vsel %vm1325_vm3, %v4384_v44, %v4383_v40  ;;  %v986_v53 = vadd.f32 %v978_v46, %v686_v45  ;;  %v4395_v20 = vld [vmem:[#allocation57_spill] sm:$0xff] }
 0x225   : > { %2246 = vst [vmem:[%s3854_s4 + $0x20] sm:$0xff] %v2000_v52  ;;  %v1983_v49 = vpop.permute.xlu1 %1982  ;;  %v1981_v60 = vpop.permute.xlu0 %1980  ;;  %v1431_v56 = vadd.f32 %v4385_v63, %v1214_v12  ;;  %v979_v52 = vsel %vm536_vm2, %v4387_v36, %v4386_v35  ;;  %v687_v8 = vadd.f32 %v679_v14, %v498_v38  ;;  %v499_v29 = vadd.f32 %v490_v55, %v366_v30  ;;  %v4397_v38 = vld [vmem:[#allocation82_spill] sm:$0xff]  ;;  %v4398_v30 = vld [vmem:[#allocation83_spill] sm:$0xff]  ;;  %v4399_v37 = vld [vmem:[#allocation101_spill] sm:$0xff] }
 0x226   : > { %v1993_v7 = vsel %vm1325_vm3, %v1981_v60, %v1983_v49  ;;  %v1286_v54 = vadd.f32 %v1278_v61, %v986_v53  ;;  %v680_v1 = vsel %vm536_vm2, %v4389_v47, %v4388_v18  ;;  %v4392_v49 = vld [vmem:[#allocation127_spill] sm:$0xff]  ;;  %v4393_v60 = vld [vmem:[#allocation128_spill] sm:$0xff]  ;;  %v980_v21 = vsel %vm536_vm2, %v4396_v51, %v4395_v20  ;;  %v4400_v14 = vld [vmem:[#allocation102_spill] sm:$0xff] }
 0x227   : > { %v2001_v16 = vadd.f32 %v1993_v7, %v1701_v19  ;;  %v1703_v42 = vadd.f32 %v1695_v58, %v1431_v56  ;;  %v1279_v19 = vsel %vm536_vm2, %v4391_v3, %v4390_v5  ;;  %v1767_v15 = vsel %vm1325_vm3, %v4393_v60, %v4392_v49 }
 0x228   : > { %v987_v10 = vadd.f32 %v979_v52, %v687_v8  ;;  %v1475_v26 = vadd.f32 %v4394_v50, %v1286_v54  ;;  %v688_v7 = vadd.f32 %v680_v1, %v499_v29  ;;  %v1280_v24 = vsel %vm536_vm2, %v4398_v30, %v4397_v38 }
 0x229   : > { %2247 = vst [vmem:[%s3854_s4 + $0x28] sm:$0xff] %v2001_v16  ;;  %v1987_v28 = vpop.permute.xlu1 %1986  ;;  %v1985_v39 = vpop.permute.xlu0 %1984  ;;  %v1768_v27 = vsel %vm1325_vm3, %v3752_v59, %v3750_v48  ;;  %v1769_v17 = vsel %vm1325_vm3, %v3774_v62, %v3772_v43  ;;  %v1770_v40 = vsel %vm1325_vm3, %v3807_v33, %v3805_v31 }
 0x22a   : > { %v1994_v9 = vsel %vm1325_vm3, %v1985_v39, %v1987_v28  ;;  %v1287_v32 = vadd.f32 %v1279_v19, %v987_v10  ;;  %v1775_v11 = vadd.f32 %v1767_v15, %v1475_v26  ;;  %v988_v45 = vadd.f32 %v980_v21, %v688_v7 }
 0x22b   : > { %v2002_v34 = vadd.f32 %v1994_v9, %v1702_v25  ;;  %v4401_v9 = vld [vmem:[#allocation103_spill] sm:$0xff] }
 0x22c   : > { %v1476_v0 = vadd.f32 %v4399_v37, %v1287_v32  ;;  %v1288_v12 = vadd.f32 %v1280_v24, %v988_v45  ;;  %v1778_v43 = vadd.f32 %v1770_v40, %v4401_v9 }
 0x22d   : > { %2248 = vst [vmem:[%s3854_s4 + $0x60] sm:$0xff] %v2002_v34  ;;  %v1991_v57 = vpop.permute.xlu1 %1990  ;;  %v1989_v6 = vpop.permute.xlu0 %1988 }
 0x22e   : > { %v1995_v13 = vsel %vm1325_vm3, %v1989_v6, %v1991_v57  ;;  %v1776_v25 = vadd.f32 %v1768_v27, %v1476_v0  ;;  %v1477_v59 = vadd.f32 %v4400_v14, %v1288_v12 }
 0x22f   : > { %v2003_v2 = vadd.f32 %v1995_v13, %v1703_v42 }
 0x230   : > { %v1777_v41 = vadd.f32 %v1769_v17, %v1477_v59 }
 0x231   : > { %2249 = vst [vmem:[%s3854_s4 + $0x68] sm:$0xff] %v2003_v2  ;;  %v2054_v23 = vpop.permute.xlu1 %2053  ;;  %v2052_v16 = vpop.permute.xlu0 %2051 }
 0x232   : > { %v2067_v46 = vsel %vm1325_vm3, %v2052_v16, %v2054_v23 }
 0x233   : > { %v2075_v55 = vadd.f32 %v2067_v46, %v1775_v11 }
 0x235   : > { %2250 = vst [vmem:[%s3854_s4 + $0x30] sm:$0xff] %v2075_v55  ;;  %v2058_v28 = vpop.permute.xlu1 %2057  ;;  %v2056_v39 = vpop.permute.xlu0 %2055 }
 0x236   : > { %v2068_v22 = vsel %vm1325_vm3, %v2056_v39, %v2058_v28 }
 0x237   : > { %v2076_v48 = vadd.f32 %v2068_v22, %v1776_v25 }
 0x239   : > { %2251 = vst [vmem:[%s3854_s4 + $0x38] sm:$0xff] %v2076_v48  ;;  %v2062_v4 = vpop.permute.xlu1 %2061  ;;  %v2060_v61 = vpop.permute.xlu0 %2059 }
 0x23a   : > { %v2069_v44 = vsel %vm1325_vm3, %v2060_v61, %v2062_v4 }
 0x23b   : > { %v2077_v58 = vadd.f32 %v2069_v44, %v1777_v41 }
 0x23d   : > { %2252 = vst [vmem:[%s3854_s4 + $0x70] sm:$0xff] %v2077_v58  ;;  %v2066_v62 = vpop.permute.xlu1 %2065  ;;  %v2064_v53 = vpop.permute.xlu0 %2063 }
 0x23e   : > { %v2070_v63 = vsel %vm1325_vm3, %v2064_v53, %v2066_v62 }
 0x23f   : > { %v2078_v56 = vadd.f32 %v2070_v63, %v1778_v43 }
 0x241   : > { %2253 = vst [vmem:[%s3854_s4 + $0x78] sm:$0xff] %v2078_v56 }
 0x242   : > { %s2261_s18 = sshll.u32 %s2463_s12, 10  ;;  %s2132_s30 = sshll.u32 %s3854_s4, 4  ;;  %s2133_s30 = int_to_ptr.vmem [resolvable:$true] %s2132_s30 }
 0x243   : > { %s2115_s20 = scalar_lea.hbm %s4151_s2, %s2261_s18  ;;  %s2479_s27 = smov 1024  }
 0x244   : > { %p4402_p4 = scmp.ne.s32.totalorder %s4162_s19, 0  ;;  %s2480_s29 = smov 2048  }
 0x245   : > { %s2481_s6 = smov 8   ;;  %s2482_s7 = smov 128  }
 0x246   : > { %2270 = sst [smem:[#allocation9]] (%p4402_p4), %s2479_s27  ;;  %s2483_s12 = smov [#allocation8]  }
 0x247   : > { %2271 = sst [smem:[#allocation9 + $0x1]] (%p4402_p4), %s2480_s29  ;;  %s2484_s23 = smov 0  }
 0x248   : > { %2272 = sst [smem:[#allocation9 + $0x2]] (%p4402_p4), %s2481_s6 }
 0x249   : > { %2273 = sst [smem:[#allocation9 + $0x3]] (%p4402_p4), %s2482_s7 }
 0x24a   : > { %2274 = sst [smem:[#allocation9 + $0x4]] (%p4402_p4), %s2482_s7 }
 0x24b   : > { %2275 = sst [smem:[#allocation9 + $0x5]] (%p4402_p4), %s2481_s6 }
 0x24c   : > { %2276 = dma.general (%p4402_p4), %s2133_s30, 2048, %s2115_s20, %s2099_s25, %s2483_s12, [#allocation9], %s2484_s23, 0  }
 0x24d PF: > { %p2293_p8 = scmp.ge.s32.totalorder %s2471_s14, 2  ;;  %s2160_s26 = sand.u32 1, %s2451_s9  }
 0x24e   : > { %p4403_p10 = scmp.ne.s32.totalorder %s4163_s21, 0  ;;  %s2161_s8 = scalar_lea.sflag [#allocation4], %s2160_s26 }
 0x250   : > { %p2286_p11 = pnand %p2293_p8, %p4403_p10 }
 0x252   : > { %2446 = dma.done.wait (!%p2286_p11), %s2161_s8, 2048  }
 0x253   : > { %2448 = vsyncadd (!%p2286_p11), %s2161_s8, 4294965248  ;;  %s17_s14 = sadd.s32 1, %s2471_s14   ;;  %s4404_s9 = smov %s2455_s10 }
 0x254   : > { %p14_p13 = scmp.ge.s32.totalorder %s17_s14, 4   ;;  %s4405_s10 = smov %s2459_s11 }
 0x255   : > { %s4406_s11 = smov %s2553_s22  ;;  %s4407_s12 = smov %s2467_s13 }
 0x256   : > { %s4408_s13 = smov %s4410_s17  ;;  %16 = sbr.rel (!%p14_p13) target bundleno = 6 (0x6), region = 79 }
 0x25d   :  { %2166 = vsyncpa [#allocation3], 1 }
 0x25e   :  { %2168 = vsyncpa [#allocation3 + $0x1], 1 }
 0x25f   :  { %2169 = vsyncpa [#allocation4], 1 }
 0x260   :  { %2171 = vsyncpa [#allocation4 + $0x1], 1 }
 0x261   :  { %2172 = vsyncpa [#allocation5], 1 }
 0x262   :  { %2174 = vsyncpa [#allocation5 + $0x1], 1 }

</bundles_post_ra>
